<compile_context>
chip_gen: v7x
topology: tpu7x:2x2x1
jax: 0.10.0
libtpu: 0.0.40
codegen_flags: <defaults>
</compile_context>

<pallas_src>
import math
import jax
import jax.numpy as jnp
from jax import lax
from jax.experimental import pallas as pl
from jax.experimental.pallas import tpu as pltpu

# ----- small, module-consistent shapes -----
B, C, N, T = 2, 4, 10, 8        # batch, num_heteros, num_ts, time_lags
NB, K, E = 2, 2, 16             # num_blocks, k, embedding_dim
S = NB + 2                      # outs_label stages per hetero group
G = B * C                       # flattened (batch, hetero) groups
TAU, ALPHA = 1.0, 3.0           # tau only rescales logits -> argmax-invariant in hard mode
BN_EPS, KL_EPS = 1e-5, 1e-16

# ----- packed per-channel scalar table layout (each row is a (C,) vector) -----
I_PROJ_W, I_PROJ_B = 0, 1
I_BLK = 2                              # per block: [tap-1, tap0, tap+1, b_tc, w_gc, b_gc]
_BLK_STRIDE = 6
I_DEC_W1 = I_BLK + _BLK_STRIDE * NB    # S rows (grouped 1x1 over the S stages, BN folded)
I_DEC_B1 = I_DEC_W1 + S
I_DEC_WPC = I_DEC_B1 + 1
I_DEC_BPC = I_DEC_WPC + 1
I_DEC_WF = I_DEC_BPC + 1               # C rows: column d of the full 1x1 channel mix
I_DEC_BF = I_DEC_WF + C
I_OUT_B = I_DEC_BF + 1
I_MSK_TAP = I_OUT_B + 1                # 3 rows: mask-block temporal taps
I_MSK_BT = I_MSK_TAP + 3
I_MSK_BO = I_MSK_BT + 1
P_ROWS = I_MSK_BO + 1                  # = 32


def _gelu(x):
    # TODO(synk): PyTorch nn.GELU uses exact erf; tanh approximation used for
    # guaranteed Mosaic lowering (deviation ~1e-3).
    return jax.nn.gelu(x, approximate=True)


# ---------------------------------------------------------------------------
# Fused kernel: GLEM + gumbel-softmax + KL, projection, NB HeteroBlocks,
# fc_decode + fc_out, mask_block, preds.  Single invocation (grid=()),
# everything resident in VMEM.
# ---------------------------------------------------------------------------
def _fused_kernel(beta_ref, x_ref, xt_ref, mask_ref, gum_ref,
                  gw_ref, sc_ref, tv_ref,
                  adj_ref, pack_ref, kl_ref):
    beta = beta_ref[0]
    x = x_ref[...]                                        # (B, C, T, N)

    def sc(j):
        # one packed per-channel scalar row -> (C, 1, 1); broadcasts over (B, C, T, N)
        return sc_ref[j]

    # ---- GLEM: both edge projections fused into one (T, 2E) matmul per group ----
    xt_g = xt_ref[...].reshape(G, N, T)                   # leading-dim merge (free)
    gw_g = jnp.broadcast_to(gw_ref[...][None],
                            (B, C, T, 2 * E)).reshape(G, T, 2 * E)
    e12 = jnp.tanh(ALPHA * jnp.einsum('gnt,gte->gne', xt_g, gw_g,
                                      preferred_element_type=jnp.float32))
    h = jnp.einsum('gne,gme->gnm', e12[..., :E], e12[..., E:],
                   preferred_element_type=jnp.float32) * (1.0 / math.sqrt(E))  # (G,N,N)

    # z = softmax(h, dim=-2); kl_categorical_uniform reduced to a scalar in-kernel
    zc = h - jnp.max(h, axis=1, keepdims=True)
    ez = jnp.exp(zc)
    z = ez / jnp.sum(ez, axis=1, keepdims=True)
    kl_ref[0, 0] = -jnp.sum(z * jnp.log(z + KL_EPS)) / (N * B)

    # hard gumbel-softmax over dim=-2 (eval): argmax(softmax((h+g)/tau)) == argmax(h+g),
    # so the straight-through one-hot is built directly from the noisy logits.
    y = h + gum_ref[...].reshape(G, N, N)
    mx = jnp.max(y, axis=1, keepdims=True)
    rows = lax.broadcasted_iota(jnp.int32, y.shape, 1)
    first = jnp.min(jnp.where(y == mx, rows, N), axis=1, keepdims=True)
    adj = (rows == first).astype(jnp.float32)             # (G, N, N)
    adj_ref[...] = adj.reshape(B, C, N, N)

    # ---- temporal 'same'-pad depthwise 3-tap conv == 2 zero-filled shifts + 3 FMAs ----
    zrow = jnp.zeros((B, C, 1, N), jnp.float32)

    def tconv(a, j):                                      # taps at scalar-table rows j, j+1, j+2
        prev = jnp.concatenate([zrow, a[:, :, :T - 1, :]], axis=2)   # a[t-1], zero at t=0
        nxt = jnp.concatenate([a[:, :, 1:, :], zrow], axis=2)        # a[t+1], zero at t=T-1
        return sc(j) * prev + sc(j + 1) * a + sc(j + 2) * nxt

    # ---- projection: grouped 1x1 conv == per-channel affine ----
    out = sc(I_PROJ_W) * x + sc(I_PROJ_B)                 # (B, C, T, N)

    # fc_decode stage-0 contribution folded in immediately (no live stage list)
    yd = sc(I_DEC_W1) * out + sc(I_DEC_B1)

    # ---- HeteroBlocks: temporal conv + GELU, k-step mix-hop propagation,
    #      per-channel 1x1 + GELU + residual ----
    # TODO(synk): HeteroBlock source not provided; propagation orientation h @ A
    # (contract over the softmax axis) kept identical to the previous reconstruction.
    for i in range(NB):
        base = I_BLK + _BLK_STRIDE * i
        tc = _gelu(tconv(out, base) + sc(base + 3))       # (B, C, T, N)
        tc_g = tc.reshape(G, T, N)
        hp_g = tc_g
        for _ in range(K):
            hp_g = beta * tc_g + (1.0 - beta) * jnp.einsum(
                'gtn,gnm->gtm', hp_g, adj, preferred_element_type=jnp.float32)
        hp = hp_g.reshape(B, C, T, N)
        out = _gelu(sc(base + 4) * hp + sc(base + 5)) + out
        yd = yd + sc(I_DEC_W1 + i + 1) * tc               # outs_label stage i+1
    yd = yd + sc(I_DEC_W1 + NB + 1) * out                 # outs_label stage NB+1

    # ---- fc_decode: grouped 1x1 (BN folded) -> GELU -> ResidualAdd -> GELU ----
    yd = _gelu(yd)
    r = _gelu(sc(I_DEC_WPC) * yd + sc(I_DEC_BPC))         # per-channel 1x1 (BN folded) + GELU
    mix = sc(I_DEC_WF) * r[:, 0:1]                        # full 1x1 mixing channels
    for d in range(1, C):
        mix = mix + sc(I_DEC_WF + d) * r[:, d:d + 1]
    yd = _gelu(yd + mix + sc(I_DEC_BF))

    # ---- fc_out: grouped (T,1) conv collapsing time, then tanh ----
    lab = jnp.tanh(jnp.sum(yd * tv_ref[0], axis=2, keepdims=True)
                   + sc(I_OUT_B))                         # (B, C, 1, N)

    # ---- mask block: ResidualAdd(temporal conv + GELU) -> grouped (T,1) conv -> sigmoid
    mk = mask_ref[...]
    resid = mk + _gelu(tconv(mk, I_MSK_TAP) + sc(I_MSK_BT))
    omsk = jax.nn.sigmoid(jnp.sum(resid * tv_ref[1], axis=2, keepdims=True)
                          + sc(I_MSK_BO))                 # (B, C, 1, N)

    # ---- single packed (label | mask | preds) output buffer ----
    pack_ref[:, :, 0:1, :] = lab
    pack_ref[:, :, 1:2, :] = omsk
    pack_ref[:, :, 2:3, :] = lab * omsk


# ---------------------------------------------------------------------------
# One-time weight packing (BN folding + table packing) - run OUTSIDE the
# per-call forward; only three dense tables cross the pallas_call boundary.
# ---------------------------------------------------------------------------
def prepare_weights(p):
    # fc_decode: fold eval-mode BatchNorm2d into the preceding grouped 1x1 convs.
    dec_w1 = p["dec_w1"] * p["dec_s1"]                    # (C, S)
    dec_b1 = p["dec_b1"] * p["dec_s1"] + p["dec_t1"]      # (C, 1)
    dec_wpc = p["dec_wpc"] * p["dec_s2"]
    dec_bpc = p["dec_bpc"] * p["dec_s2"] + p["dec_t2"]

    rows = [None] * P_ROWS
    rows[I_PROJ_W] = p["proj_w"]
    rows[I_PROJ_B] = p["proj_b"]
    for i in range(NB):
        base = I_BLK + _BLK_STRIDE * i
        for tap in range(3):
            rows[base + tap] = p[f"blk{i}_wtc"][:, tap]
        rows[base + 3] = p[f"blk{i}_btc"]
        rows[base + 4] = p[f"blk{i}_wgc"]
        rows[base + 5] = p[f"blk{i}_bgc"]
    for j in range(S):
        rows[I_DEC_W1 + j] = dec_w1[:, j]
    rows[I_DEC_B1] = dec_b1[:, 0]
    rows[I_DEC_WPC] = dec_wpc[:, 0]
    rows[I_DEC_BPC] = dec_bpc[:, 0]
    for d in range(C):
        rows[I_DEC_WF + d] = p["dec_wf"][:, d]            # column d -> over output channels
    rows[I_DEC_BF] = p["dec_bf"][:, 0]
    rows[I_OUT_B] = p["out_b"][:, 0]
    for tap in range(3):
        rows[I_MSK_TAP + tap] = p["msk_wt"][:, tap]
    rows[I_MSK_BT] = p["msk_bt"][:, 0]
    rows[I_MSK_BO] = p["msk_bo"][:, 0]

    sc_tab = jnp.stack(rows, axis=0).reshape(P_ROWS, C, 1, 1)
    tv_tab = jnp.stack([p["out_w"], p["msk_wo"]], axis=0).reshape(2, C, T, 1)
    gw_tab = jnp.concatenate([p["glem_w1"], p["glem_w2"]], axis=-1)   # (C, T, 2E)
    return {"sc": sc_tab, "tv": tv_tab, "gw": gw_tab}


_VMEM = pl.BlockSpec(memory_space=pltpu.MemorySpace.VMEM)
_SMEM = pl.BlockSpec(memory_space=pltpu.MemorySpace.SMEM)


def hetero_nri_forward(weights, x_batch, mask_batch, beta, gumbel_noise):
    xt = jnp.swapaxes(x_batch, 2, 3)                      # (B, C, N, T), done by XLA outside

    adj, packed, kl = pl.pallas_call(
        _fused_kernel,
        in_specs=[_SMEM] + [_VMEM] * 7,
        out_specs=[_VMEM, _VMEM, _SMEM],
        out_shape=[
            jax.ShapeDtypeStruct((B, C, N, N), jnp.float32),   # adj_mat
            jax.ShapeDtypeStruct((B, C, 3, N), jnp.float32),   # [label | mask | preds]
            jax.ShapeDtypeStruct((1, 1), jnp.float32),         # kl_loss
        ],
    )(beta, x_batch, xt, mask_batch, gumbel_noise,
      weights["gw"], weights["sc"], weights["tv"])

    return {
        "preds": packed[:, :, 2:3, :],
        "outs_label": packed[:, :, 0:1, :],
        "outs_mask": packed[:, :, 1:2, :],
        "kl_loss": kl[0, 0],
        "adj_mat": adj,
    }


# ---------------------------------------------------------------------------
# Deterministic parameter init (synthetic weights, PyTorch-default BN stats)
# ---------------------------------------------------------------------------
def init_params(key):
    ks = jax.random.split(key, 20)

    def nrm(k, shape, scale=0.3):
        return scale * jax.random.normal(k, shape, jnp.float32)

    p = {}
    p["glem_w1"] = nrm(ks[0], (C, T, E))
    p["glem_w2"] = nrm(ks[1], (C, T, E))
    p["proj_w"] = 1.0 + nrm(ks[2], (C,), 0.1)
    p["proj_b"] = nrm(ks[3], (C,), 0.1)
    for i in range(NB):
        kk = jax.random.split(ks[4 + i], 4)
        p[f"blk{i}_wtc"] = nrm(kk[0], (C, 3))
        p[f"blk{i}_btc"] = nrm(kk[1], (C,), 0.1)
        p[f"blk{i}_wgc"] = 1.0 + nrm(kk[2], (C,), 0.1)
        p[f"blk{i}_bgc"] = nrm(kk[3], (C,), 0.1)
    # fc_decode (BN: gamma=1, beta=0, running mean=0, var=1 -> folded scale/shift)
    ones, zeros = jnp.ones((C, 1), jnp.float32), jnp.zeros((C, 1), jnp.float32)
    bn_scale = ones / jnp.sqrt(ones + BN_EPS)
    p["dec_w1"] = nrm(ks[8], (C, S))
    p["dec_b1"] = nrm(ks[9], (C, 1), 0.1)
    p["dec_s1"], p["dec_t1"] = bn_scale, zeros
    p["dec_wpc"] = 1.0 + nrm(ks[10], (C, 1), 0.1)
    p["dec_bpc"] = nrm(ks[11], (C, 1), 0.1)
    p["dec_s2"], p["dec_t2"] = bn_scale, zeros
    p["dec_wf"] = nrm(ks[12], (C, C))
    p["dec_bf"] = nrm(ks[13], (C, 1), 0.1)
    p["out_w"] = nrm(ks[14], (C, T))
    p["out_b"] = nrm(ks[15], (C, 1), 0.1)
    # mask block
    p["msk_wt"] = nrm(ks[16], (C, 3))
    p["msk_bt"] = nrm(ks[17], (C, 1), 0.1)
    p["msk_wo"] = nrm(ks[18], (C, T))
    p["msk_bo"] = nrm(ks[19], (C, 1), 0.1)
    return p


if __name__ == "__main__":
    key = jax.random.PRNGKey(0)
    k_par, k_x, k_m, k_g = jax.random.split(key, 4)
    params = init_params(k_par)
    weights = prepare_weights(params)      # one-time packing, outside the forward jit

    x_batch = jax.random.normal(k_x, (B, C, T, N), jnp.float32)                     # x['input']
    mask_batch = (jax.random.uniform(k_m, (B, C, T, N)) > 0.2).astype(jnp.float32)  # x['mask']
    gumbel_noise = jax.random.gumbel(k_g, (B, C, N, N), jnp.float32)
    beta = jnp.array([0.5], jnp.float32)

    fwd = jax.jit(hetero_nri_forward)
    out = fwd(weights, x_batch, mask_batch, beta, gumbel_noise)
    out = jax.tree_util.tree_map(jax.block_until_ready, out)

    assert out["preds"].shape == (B, C, 1, N)
    assert out["outs_label"].shape == (B, C, 1, N)
    assert out["outs_mask"].shape == (B, C, 1, N)
    assert out["adj_mat"].shape == (B, C, N, N)
    assert out["kl_loss"].shape == ()
    assert bool(jnp.all(jnp.isfinite(out["preds"])))
    assert bool(jnp.all(jnp.isfinite(out["adj_mat"])))
    print("KERNEL_OK")
</pallas_src>

<mosaic_0001>
module attributes {stable_mosaic.version = 11 : i64} {
  func.func @_fused_kernel(%arg0: memref<1xf32, #tpu.memory_space<smem>>, %arg1: memref<2x4x8x10xf32, #tpu.memory_space<vmem>>, %arg2: memref<2x4x10x8xf32, #tpu.memory_space<vmem>>, %arg3: memref<2x4x8x10xf32, #tpu.memory_space<vmem>>, %arg4: memref<2x4x10x10xf32, #tpu.memory_space<vmem>>, %arg5: memref<4x8x32xf32, #tpu.memory_space<vmem>>, %arg6: memref<32x4x1x1xf32, #tpu.memory_space<vmem>>, %arg7: memref<2x4x8x1xf32, #tpu.memory_space<vmem>>, %arg8: memref<2x4x10x10xf32, #tpu.memory_space<vmem>>, %arg9: memref<2x4x3x10xf32, #tpu.memory_space<vmem>>, %arg10: memref<1x1xf32, #tpu.memory_space<smem>>) attributes {dimension_semantics = [], scalar_prefetch = 0 : i64, scratch_operands = 0 : i64, tpu.core_type = #tpu.core_type<tc>} {
    %c0 = arith.constant 0 : index
    %0 = memref.load %arg0[%c0] : memref<1xf32, #tpu.memory_space<smem>>
    %c0_0 = arith.constant 0 : index
    %c0_1 = arith.constant 0 : index
    %c0_2 = arith.constant 0 : index
    %c0_3 = arith.constant 0 : index
    %1 = vector.load %arg1[%c0_0, %c0_1, %c0_2, %c0_3] : memref<2x4x8x10xf32, #tpu.memory_space<vmem>>, vector<2x4x8x10xf32>
    %c0_4 = arith.constant 0 : index
    %c0_5 = arith.constant 0 : index
    %c0_6 = arith.constant 0 : index
    %c0_7 = arith.constant 0 : index
    %2 = vector.load %arg2[%c0_4, %c0_5, %c0_6, %c0_7] : memref<2x4x10x8xf32, #tpu.memory_space<vmem>>, vector<2x4x10x8xf32>
    %3 = vector.shape_cast %2 : vector<2x4x10x8xf32> to vector<8x10x8xf32>
    %c0_8 = arith.constant 0 : index
    %c0_9 = arith.constant 0 : index
    %c0_10 = arith.constant 0 : index
    %4 = vector.load %arg5[%c0_8, %c0_9, %c0_10] : memref<4x8x32xf32, #tpu.memory_space<vmem>>, vector<4x8x32xf32>
    %5 = vector.shape_cast %4 : vector<4x8x32xf32> to vector<1x4x8x32xf32>
    %6 = vector.shape_cast %5 : vector<1x4x8x32xf32> to vector<1x4x8x32xf32>
    %7 = vector.broadcast %6 : vector<1x4x8x32xf32> to vector<2x4x8x32xf32>
    %8 = vector.shape_cast %7 : vector<2x4x8x32xf32> to vector<8x8x32xf32>
    "tpu.trace_start"() <{level = 10 : i32, message = "gnt,gte->gne"}> : () -> ()
    %cst = arith.constant dense<0.000000e+00> : vector<8x10x32xf32>
    %9 = tpu.matmul %3, %8, %cst {dimension_numbers = #tpu.dot_dimension_numbers<[2], [1], [1], [2], [0, 0, 0, 1, 1, 2], [0], [0]>} : vector<8x10x8xf32>, vector<8x8x32xf32>, vector<8x10x32xf32> -> vector<8x10x32xf32>
    "tpu.trace_stop"() : () -> ()
    %cst_11 = arith.constant 3.000000e+00 : f32
    %10 = vector.broadcast %cst_11 : f32 to vector<8x10x32xf32>
    %11 = arith.mulf %10, %9 : vector<8x10x32xf32>
    %12 = math.tanh %11 : vector<8x10x32xf32>
    %13 = vector.extract_strided_slice %12 {offsets = [0, 0, 0], sizes = [8, 10, 16], strides = [1, 1, 1]} : vector<8x10x32xf32> to vector<8x10x16xf32>
    %14 = vector.extract_strided_slice %12 {offsets = [0, 0, 16], sizes = [8, 10, 16], strides = [1, 1, 1]} : vector<8x10x32xf32> to vector<8x10x16xf32>
    "tpu.trace_start"() <{level = 10 : i32, message = "gne,gme->gnm"}> : () -> ()
    %cst_12 = arith.constant dense<0.000000e+00> : vector<8x10x10xf32>
    %15 = tpu.matmul %13, %14, %cst_12 {dimension_numbers = #tpu.dot_dimension_numbers<[2], [2], [1], [1], [0, 0, 0, 1, 1, 1], [0], [0]>} : vector<8x10x16xf32>, vector<8x10x16xf32>, vector<8x10x10xf32> -> vector<8x10x10xf32>
    "tpu.trace_stop"() : () -> ()
    %cst_13 = arith.constant 2.500000e-01 : f32
    %16 = vector.broadcast %cst_13 : f32 to vector<8x10x10xf32>
    %17 = arith.mulf %15, %16 : vector<8x10x10xf32>
    %cst_14 = arith.constant dense<0xFF800000> : vector<8x10xf32>
    %18 = vector.multi_reduction <maximumf>, %17, %cst_14 [1] : vector<8x10x10xf32> to vector<8x10xf32>
    %19 = vector.shape_cast %18 : vector<8x10xf32> to vector<8x1x10xf32>
    %20 = vector.broadcast %19 : vector<8x1x10xf32> to vector<8x10x10xf32>
    %21 = arith.subf %17, %20 : vector<8x10x10xf32>
    %22 = math.exp %21 : vector<8x10x10xf32>
    %cst_15 = arith.constant dense<0.000000e+00> : vector<8x10xf32>
    %23 = vector.multi_reduction <add>, %22, %cst_15 [1] : vector<8x10x10xf32> to vector<8x10xf32>
    %24 = vector.shape_cast %23 : vector<8x10xf32> to vector<8x1x10xf32>
    %25 = vector.broadcast %24 : vector<8x1x10xf32> to vector<8x10x10xf32>
    %26 = arith.divf %22, %25 : vector<8x10x10xf32>
    %cst_16 = arith.constant 1.000000e-16 : f32
    %27 = vector.broadcast %cst_16 : f32 to vector<8x10x10xf32>
    %28 = arith.addf %26, %27 : vector<8x10x10xf32>
    %29 = math.log %28 : vector<8x10x10xf32>
    %30 = arith.mulf %26, %29 : vector<8x10x10xf32>
    %31 = vector.shape_cast %30 : vector<8x10x10xf32> to vector<1x8x10x10xf32>
    %cst_17 = arith.constant dense<0.000000e+00> : vector<1xf32>
    %32 = vector.multi_reduction <add>, %31, %cst_17 [1, 2, 3] : vector<1x8x10x10xf32> to vector<1xf32>
    %33 = vector.shape_cast %32 : vector<1xf32> to vector<1x1x1x1xf32>
    %34 = vector.extract %33[0, 0, 0, 0] : f32 from vector<1x1x1x1xf32>
    %cst_18 = arith.constant 0.000000e+00 : f32
    %35 = arith.subf %cst_18, %34 : f32
    %cst_19 = arith.constant 2.000000e+01 : f32
    %36 = arith.divf %35, %cst_19 : f32
    %c0_20 = arith.constant 0 : index
    %c0_21 = arith.constant 0 : index
    %37 = memref.load %arg10[%c0_20, %c0_21] : memref<1x1xf32, #tpu.memory_space<smem>>
    memref.store %36, %arg10[%c0_20, %c0_21] : memref<1x1xf32, #tpu.memory_space<smem>>
    %c0_22 = arith.constant 0 : index
    %c0_23 = arith.constant 0 : index
    %c0_24 = arith.constant 0 : index
    %c0_25 = arith.constant 0 : index
    %38 = vector.load %arg4[%c0_22, %c0_23, %c0_24, %c0_25] : memref<2x4x10x10xf32, #tpu.memory_space<vmem>>, vector<2x4x10x10xf32>
    %39 = vector.shape_cast %38 : vector<2x4x10x10xf32> to vector<8x10x10xf32>
    %40 = arith.addf %17, %39 : vector<8x10x10xf32>
    %cst_26 = arith.constant dense<0xFF800000> : vector<8x10xf32>
    %41 = vector.multi_reduction <maximumf>, %40, %cst_26 [1] : vector<8x10x10xf32> to vector<8x10xf32>
    %42 = vector.shape_cast %41 : vector<8x10xf32> to vector<8x1x10xf32>
    %43 = tpu.iota {dimensions = array<i32: 1>} : vector<8x10x10xi32>
    %44 = vector.broadcast %42 : vector<8x1x10xf32> to vector<8x10x10xf32>
    %45 = arith.cmpf oeq, %40, %44 : vector<8x10x10xf32>
    %c10_i32 = arith.constant 10 : i32
    %46 = vector.broadcast %c10_i32 : i32 to vector<8x10x10xi32>
    %47 = arith.select %45, %43, %46 : vector<8x10x10xi1>, vector<8x10x10xi32>
    %cst_27 = arith.constant dense<2147483647> : vector<8x10xi32>
    %48 = vector.multi_reduction <minsi>, %47, %cst_27 [1] : vector<8x10x10xi32> to vector<8x10xi32>
    %49 = vector.shape_cast %48 : vector<8x10xi32> to vector<8x1x10xi32>
    %50 = vector.broadcast %49 : vector<8x1x10xi32> to vector<8x10x10xi32>
    %51 = arith.cmpi eq, %43, %50 : vector<8x10x10xi32>
    %52 = arith.extui %51 : vector<8x10x10xi1> to vector<8x10x10xi32>
    %53 = arith.sitofp %52 : vector<8x10x10xi32> to vector<8x10x10xf32>
    %54 = vector.shape_cast %53 : vector<8x10x10xf32> to vector<2x4x10x10xf32>
    %c0_28 = arith.constant 0 : index
    %c0_29 = arith.constant 0 : index
    %c0_30 = arith.constant 0 : index
    %c0_31 = arith.constant 0 : index
    %55 = vector.load %arg8[%c0_28, %c0_29, %c0_30, %c0_31] : memref<2x4x10x10xf32, #tpu.memory_space<vmem>>, vector<2x4x10x10xf32>
    tpu.vector_store %arg8[%c0_28, %c0_29, %c0_30, %c0_31], %54 {strides = array<i32>} : memref<2x4x10x10xf32, #tpu.memory_space<vmem>>, vector<2x4x10x10xf32>,
    %cst_32 = arith.constant 0.000000e+00 : f32
    %56 = vector.broadcast %cst_32 : f32 to vector<2x4x1x10xf32>
    %c0_33 = arith.constant 0 : index
    %c0_34 = arith.constant 0 : index
    %c0_35 = arith.constant 0 : index
    %c0_36 = arith.constant 0 : index
    %57 = vector.load %arg6[%c0_33, %c0_34, %c0_35, %c0_36] : memref<32x4x1x1xf32, #tpu.memory_space<vmem>>, vector<1x4x1x1xf32>
    %58 = vector.shape_cast %57 : vector<1x4x1x1xf32> to vector<4x1x1xf32>
    %59 = vector.shape_cast %58 : vector<4x1x1xf32> to vector<1x4x1x1xf32>
    %60 = vector.broadcast %59 : vector<1x4x1x1xf32> to vector<2x4x8x10xf32>
    %61 = arith.mulf %60, %1 : vector<2x4x8x10xf32>
    %c1 = arith.constant 1 : index
    %c0_37 = arith.constant 0 : index
    %c0_38 = arith.constant 0 : index
    %c0_39 = arith.constant 0 : index
    %62 = vector.load %arg6[%c1, %c0_37, %c0_38, %c0_39] : memref<32x4x1x1xf32, #tpu.memory_space<vmem>>, vector<1x4x1x1xf32>
    %63 = vector.shape_cast %62 : vector<1x4x1x1xf32> to vector<4x1x1xf32>
    %64 = vector.shape_cast %63 : vector<4x1x1xf32> to vector<1x4x1x1xf32>
    %65 = vector.broadcast %64 : vector<1x4x1x1xf32> to vector<2x4x8x10xf32>
    %66 = arith.addf %61, %65 : vector<2x4x8x10xf32>
    %c14 = arith.constant 14 : index
    %c0_40 = arith.constant 0 : index
    %c0_41 = arith.constant 0 : index
    %c0_42 = arith.constant 0 : index
    %67 = vector.load %arg6[%c14, %c0_40, %c0_41, %c0_42] : memref<32x4x1x1xf32, #tpu.memory_space<vmem>>, vector<1x4x1x1xf32>
    %68 = vector.shape_cast %67 : vector<1x4x1x1xf32> to vector<4x1x1xf32>
    %69 = vector.shape_cast %68 : vector<4x1x1xf32> to vector<1x4x1x1xf32>
    %70 = vector.broadcast %69 : vector<1x4x1x1xf32> to vector<2x4x8x10xf32>
    %71 = arith.mulf %70, %66 : vector<2x4x8x10xf32>
    %c18 = arith.constant 18 : index
    %c0_43 = arith.constant 0 : index
    %c0_44 = arith.constant 0 : index
    %c0_45 = arith.constant 0 : index
    %72 = vector.load %arg6[%c18, %c0_43, %c0_44, %c0_45] : memref<32x4x1x1xf32, #tpu.memory_space<vmem>>, vector<1x4x1x1xf32>
    %73 = vector.shape_cast %72 : vector<1x4x1x1xf32> to vector<4x1x1xf32>
    %74 = vector.shape_cast %73 : vector<4x1x1xf32> to vector<1x4x1x1xf32>
    %75 = vector.broadcast %74 : vector<1x4x1x1xf32> to vector<2x4x8x10xf32>
    %76 = arith.addf %71, %75 : vector<2x4x8x10xf32>
    %77 = vector.extract_strided_slice %66 {offsets = [0, 0, 0, 0], sizes = [2, 4, 7, 10], strides = [1, 1, 1, 1]} : vector<2x4x8x10xf32> to vector<2x4x7x10xf32>
    %78 = tpu.concatenate %56, %77 in 2 : vector<2x4x1x10xf32>, vector<2x4x7x10xf32> -> vector<2x4x8x10xf32>
    %79 = vector.extract_strided_slice %66 {offsets = [0, 0, 1, 0], sizes = [2, 4, 7, 10], strides = [1, 1, 1, 1]} : vector<2x4x8x10xf32> to vector<2x4x7x10xf32>
    %80 = tpu.concatenate %79, %56 in 2 : vector<2x4x7x10xf32>, vector<2x4x1x10xf32> -> vector<2x4x8x10xf32>
    %c2 = arith.constant 2 : index
    %c0_46 = arith.constant 0 : index
    %c0_47 = arith.constant 0 : index
    %c0_48 = arith.constant 0 : index
    %81 = vector.load %arg6[%c2, %c0_46, %c0_47, %c0_48] : memref<32x4x1x1xf32, #tpu.memory_space<vmem>>, vector<1x4x1x1xf32>
    %82 = vector.shape_cast %81 : vector<1x4x1x1xf32> to vector<4x1x1xf32>
    %83 = vector.shape_cast %82 : vector<4x1x1xf32> to vector<1x4x1x1xf32>
    %84 = vector.broadcast %83 : vector<1x4x1x1xf32> to vector<2x4x8x10xf32>
    %85 = arith.mulf %84, %78 : vector<2x4x8x10xf32>
    %c3 = arith.constant 3 : index
    %c0_49 = arith.constant 0 : index
    %c0_50 = arith.constant 0 : index
    %c0_51 = arith.constant 0 : index
    %86 = vector.load %arg6[%c3, %c0_49, %c0_50, %c0_51] : memref<32x4x1x1xf32, #tpu.memory_space<vmem>>, vector<1x4x1x1xf32>
    %87 = vector.shape_cast %86 : vector<1x4x1x1xf32> to vector<4x1x1xf32>
    %88 = vector.shape_cast %87 : vector<4x1x1xf32> to vector<1x4x1x1xf32>
    %89 = vector.broadcast %88 : vector<1x4x1x1xf32> to vector<2x4x8x10xf32>
    %90 = arith.mulf %89, %66 : vector<2x4x8x10xf32>
    %91 = arith.addf %85, %90 : vector<2x4x8x10xf32>
    %c4 = arith.constant 4 : index
    %c0_52 = arith.constant 0 : index
    %c0_53 = arith.constant 0 : index
    %c0_54 = arith.constant 0 : index
    %92 = vector.load %arg6[%c4, %c0_52, %c0_53, %c0_54] : memref<32x4x1x1xf32, #tpu.memory_space<vmem>>, vector<1x4x1x1xf32>
    %93 = vector.shape_cast %92 : vector<1x4x1x1xf32> to vector<4x1x1xf32>
    %94 = vector.shape_cast %93 : vector<4x1x1xf32> to vector<1x4x1x1xf32>
    %95 = vector.broadcast %94 : vector<1x4x1x1xf32> to vector<2x4x8x10xf32>
    %96 = arith.mulf %95, %80 : vector<2x4x8x10xf32>
    %97 = arith.addf %91, %96 : vector<2x4x8x10xf32>
    %c5 = arith.constant 5 : index
    %c0_55 = arith.constant 0 : index
    %c0_56 = arith.constant 0 : index
    %c0_57 = arith.constant 0 : index
    %98 = vector.load %arg6[%c5, %c0_55, %c0_56, %c0_57] : memref<32x4x1x1xf32, #tpu.memory_space<vmem>>, vector<1x4x1x1xf32>
    %99 = vector.shape_cast %98 : vector<1x4x1x1xf32> to vector<4x1x1xf32>
    %100 = vector.shape_cast %99 : vector<4x1x1xf32> to vector<1x4x1x1xf32>
    %101 = vector.broadcast %100 : vector<1x4x1x1xf32> to vector<2x4x8x10xf32>
    %102 = arith.addf %97, %101 : vector<2x4x8x10xf32>
    %103 = arith.mulf %102, %102 : vector<2x4x8x10xf32>
    %104 = arith.mulf %102, %103 : vector<2x4x8x10xf32>
    %cst_58 = arith.constant 4.471500e-02 : f32
    %105 = vector.broadcast %cst_58 : f32 to vector<2x4x8x10xf32>
    %106 = arith.mulf %105, %104 : vector<2x4x8x10xf32>
    %107 = arith.addf %102, %106 : vector<2x4x8x10xf32>
    %cst_59 = arith.constant 0.797884583 : f32
    %108 = vector.broadcast %cst_59 : f32 to vector<2x4x8x10xf32>
    %109 = arith.mulf %108, %107 : vector<2x4x8x10xf32>
    %110 = math.tanh %109 : vector<2x4x8x10xf32>
    %cst_60 = arith.constant 1.000000e+00 : f32
    %111 = vector.broadcast %cst_60 : f32 to vector<2x4x8x10xf32>
    %112 = arith.addf %111, %110 : vector<2x4x8x10xf32>
    %cst_61 = arith.constant 5.000000e-01 : f32
    %113 = vector.broadcast %cst_61 : f32 to vector<2x4x8x10xf32>
    %114 = arith.mulf %113, %112 : vector<2x4x8x10xf32>
    %115 = arith.mulf %102, %114 : vector<2x4x8x10xf32>
    %116 = vector.shape_cast %115 : vector<2x4x8x10xf32> to vector<8x8x10xf32>
    %117 = vector.broadcast %0 : f32 to vector<8x8x10xf32>
    %118 = arith.mulf %117, %116 : vector<8x8x10xf32>
    %cst_62 = arith.constant 1.000000e+00 : f32
    %119 = arith.subf %cst_62, %0 : f32
    "tpu.trace_start"() <{level = 10 : i32, message = "gtn,gnm->gtm"}> : () -> ()
    %cst_63 = arith.constant dense<0.000000e+00> : vector<8x8x10xf32>
    %120 = tpu.matmul %116, %53, %cst_63 {dimension_numbers = #tpu.dot_dimension_numbers<[2], [1], [1], [2], [0, 0, 0, 1, 1, 2], [0], [0]>} : vector<8x8x10xf32>, vector<8x10x10xf32>, vector<8x8x10xf32> -> vector<8x8x10xf32>
    "tpu.trace_stop"() : () -> ()
    %121 = vector.broadcast %119 : f32 to vector<8x8x10xf32>
    %122 = arith.mulf %121, %120 : vector<8x8x10xf32>
    %123 = arith.addf %118, %122 : vector<8x8x10xf32>
    %124 = vector.broadcast %0 : f32 to vector<8x8x10xf32>
    %125 = arith.mulf %124, %116 : vector<8x8x10xf32>
    %cst_64 = arith.constant 1.000000e+00 : f32
    %126 = arith.subf %cst_64, %0 : f32
    "tpu.trace_start"() <{level = 10 : i32, message = "gtn,gnm->gtm"}> : () -> ()
    %cst_65 = arith.constant dense<0.000000e+00> : vector<8x8x10xf32>
    %127 = tpu.matmul %123, %53, %cst_65 {dimension_numbers = #tpu.dot_dimension_numbers<[2], [1], [1], [2], [0, 0, 0, 1, 1, 2], [0], [0]>} : vector<8x8x10xf32>, vector<8x10x10xf32>, vector<8x8x10xf32> -> vector<8x8x10xf32>
    "tpu.trace_stop"() : () -> ()
    %128 = vector.broadcast %126 : f32 to vector<8x8x10xf32>
    %129 = arith.mulf %128, %127 : vector<8x8x10xf32>
    %130 = arith.addf %125, %129 : vector<8x8x10xf32>
    %131 = vector.shape_cast %130 : vector<8x8x10xf32> to vector<2x4x8x10xf32>
    %c6 = arith.constant 6 : index
    %c0_66 = arith.constant 0 : index
    %c0_67 = arith.constant 0 : index
    %c0_68 = arith.constant 0 : index
    %132 = vector.load %arg6[%c6, %c0_66, %c0_67, %c0_68] : memref<32x4x1x1xf32, #tpu.memory_space<vmem>>, vector<1x4x1x1xf32>
    %133 = vector.shape_cast %132 : vector<1x4x1x1xf32> to vector<4x1x1xf32>
    %134 = vector.shape_cast %133 : vector<4x1x1xf32> to vector<1x4x1x1xf32>
    %135 = vector.broadcast %134 : vector<1x4x1x1xf32> to vector<2x4x8x10xf32>
    %136 = arith.mulf %135, %131 : vector<2x4x8x10xf32>
    %c7 = arith.constant 7 : index
    %c0_69 = arith.constant 0 : index
    %c0_70 = arith.constant 0 : index
    %c0_71 = arith.constant 0 : index
    %137 = vector.load %arg6[%c7, %c0_69, %c0_70, %c0_71] : memref<32x4x1x1xf32, #tpu.memory_space<vmem>>, vector<1x4x1x1xf32>
    %138 = vector.shape_cast %137 : vector<1x4x1x1xf32> to vector<4x1x1xf32>
    %139 = vector.shape_cast %138 : vector<4x1x1xf32> to vector<1x4x1x1xf32>
    %140 = vector.broadcast %139 : vector<1x4x1x1xf32> to vector<2x4x8x10xf32>
    %141 = arith.addf %136, %140 : vector<2x4x8x10xf32>
    %142 = arith.mulf %141, %141 : vector<2x4x8x10xf32>
    %143 = arith.mulf %141, %142 : vector<2x4x8x10xf32>
    %cst_72 = arith.constant 4.471500e-02 : f32
    %144 = vector.broadcast %cst_72 : f32 to vector<2x4x8x10xf32>
    %145 = arith.mulf %144, %143 : vector<2x4x8x10xf32>
    %146 = arith.addf %141, %145 : vector<2x4x8x10xf32>
    %cst_73 = arith.constant 0.797884583 : f32
    %147 = vector.broadcast %cst_73 : f32 to vector<2x4x8x10xf32>
    %148 = arith.mulf %147, %146 : vector<2x4x8x10xf32>
    %149 = math.tanh %148 : vector<2x4x8x10xf32>
    %cst_74 = arith.constant 1.000000e+00 : f32
    %150 = vector.broadcast %cst_74 : f32 to vector<2x4x8x10xf32>
    %151 = arith.addf %150, %149 : vector<2x4x8x10xf32>
    %cst_75 = arith.constant 5.000000e-01 : f32
    %152 = vector.broadcast %cst_75 : f32 to vector<2x4x8x10xf32>
    %153 = arith.mulf %152, %151 : vector<2x4x8x10xf32>
    %154 = arith.mulf %141, %153 : vector<2x4x8x10xf32>
    %155 = arith.addf %154, %66 : vector<2x4x8x10xf32>
    %c15 = arith.constant 15 : index
    %c0_76 = arith.constant 0 : index
    %c0_77 = arith.constant 0 : index
    %c0_78 = arith.constant 0 : index
    %156 = vector.load %arg6[%c15, %c0_76, %c0_77, %c0_78] : memref<32x4x1x1xf32, #tpu.memory_space<vmem>>, vector<1x4x1x1xf32>
    %157 = vector.shape_cast %156 : vector<1x4x1x1xf32> to vector<4x1x1xf32>
    %158 = vector.shape_cast %157 : vector<4x1x1xf32> to vector<1x4x1x1xf32>
    %159 = vector.broadcast %158 : vector<1x4x1x1xf32> to vector<2x4x8x10xf32>
    %160 = arith.mulf %159, %115 : vector<2x4x8x10xf32>
    %161 = arith.addf %76, %160 : vector<2x4x8x10xf32>
    %162 = vector.extract_strided_slice %155 {offsets = [0, 0, 0, 0], sizes = [2, 4, 7, 10], strides = [1, 1, 1, 1]} : vector<2x4x8x10xf32> to vector<2x4x7x10xf32>
    %163 = tpu.concatenate %56, %162 in 2 : vector<2x4x1x10xf32>, vector<2x4x7x10xf32> -> vector<2x4x8x10xf32>
    %164 = vector.extract_strided_slice %155 {offsets = [0, 0, 1, 0], sizes = [2, 4, 7, 10], strides = [1, 1, 1, 1]} : vector<2x4x8x10xf32> to vector<2x4x7x10xf32>
    %165 = tpu.concatenate %164, %56 in 2 : vector<2x4x7x10xf32>, vector<2x4x1x10xf32> -> vector<2x4x8x10xf32>
    %c8 = arith.constant 8 : index
    %c0_79 = arith.constant 0 : index
    %c0_80 = arith.constant 0 : index
    %c0_81 = arith.constant 0 : index
    %166 = vector.load %arg6[%c8, %c0_79, %c0_80, %c0_81] : memref<32x4x1x1xf32, #tpu.memory_space<vmem>>, vector<1x4x1x1xf32>
    %167 = vector.shape_cast %166 : vector<1x4x1x1xf32> to vector<4x1x1xf32>
    %168 = vector.shape_cast %167 : vector<4x1x1xf32> to vector<1x4x1x1xf32>
    %169 = vector.broadcast %168 : vector<1x4x1x1xf32> to vector<2x4x8x10xf32>
    %170 = arith.mulf %169, %163 : vector<2x4x8x10xf32>
    %c9 = arith.constant 9 : index
    %c0_82 = arith.constant 0 : index
    %c0_83 = arith.constant 0 : index
    %c0_84 = arith.constant 0 : index
    %171 = vector.load %arg6[%c9, %c0_82, %c0_83, %c0_84] : memref<32x4x1x1xf32, #tpu.memory_space<vmem>>, vector<1x4x1x1xf32>
    %172 = vector.shape_cast %171 : vector<1x4x1x1xf32> to vector<4x1x1xf32>
    %173 = vector.shape_cast %172 : vector<4x1x1xf32> to vector<1x4x1x1xf32>
    %174 = vector.broadcast %173 : vector<1x4x1x1xf32> to vector<2x4x8x10xf32>
    %175 = arith.mulf %174, %155 : vector<2x4x8x10xf32>
    %176 = arith.addf %170, %175 : vector<2x4x8x10xf32>
    %c10 = arith.constant 10 : index
    %c0_85 = arith.constant 0 : index
    %c0_86 = arith.constant 0 : index
    %c0_87 = arith.constant 0 : index
    %177 = vector.load %arg6[%c10, %c0_85, %c0_86, %c0_87] : memref<32x4x1x1xf32, #tpu.memory_space<vmem>>, vector<1x4x1x1xf32>
    %178 = vector.shape_cast %177 : vector<1x4x1x1xf32> to vector<4x1x1xf32>
    %179 = vector.shape_cast %178 : vector<4x1x1xf32> to vector<1x4x1x1xf32>
    %180 = vector.broadcast %179 : vector<1x4x1x1xf32> to vector<2x4x8x10xf32>
    %181 = arith.mulf %180, %165 : vector<2x4x8x10xf32>
    %182 = arith.addf %176, %181 : vector<2x4x8x10xf32>
    %c11 = arith.constant 11 : index
    %c0_88 = arith.constant 0 : index
    %c0_89 = arith.constant 0 : index
    %c0_90 = arith.constant 0 : index
    %183 = vector.load %arg6[%c11, %c0_88, %c0_89, %c0_90] : memref<32x4x1x1xf32, #tpu.memory_space<vmem>>, vector<1x4x1x1xf32>
    %184 = vector.shape_cast %183 : vector<1x4x1x1xf32> to vector<4x1x1xf32>
    %185 = vector.shape_cast %184 : vector<4x1x1xf32> to vector<1x4x1x1xf32>
    %186 = vector.broadcast %185 : vector<1x4x1x1xf32> to vector<2x4x8x10xf32>
    %187 = arith.addf %182, %186 : vector<2x4x8x10xf32>
    %188 = arith.mulf %187, %187 : vector<2x4x8x10xf32>
    %189 = arith.mulf %187, %188 : vector<2x4x8x10xf32>
    %cst_91 = arith.constant 4.471500e-02 : f32
    %190 = vector.broadcast %cst_91 : f32 to vector<2x4x8x10xf32>
    %191 = arith.mulf %190, %189 : vector<2x4x8x10xf32>
    %192 = arith.addf %187, %191 : vector<2x4x8x10xf32>
    %cst_92 = arith.constant 0.797884583 : f32
    %193 = vector.broadcast %cst_92 : f32 to vector<2x4x8x10xf32>
    %194 = arith.mulf %193, %192 : vector<2x4x8x10xf32>
    %195 = math.tanh %194 : vector<2x4x8x10xf32>
    %cst_93 = arith.constant 1.000000e+00 : f32
    %196 = vector.broadcast %cst_93 : f32 to vector<2x4x8x10xf32>
    %197 = arith.addf %196, %195 : vector<2x4x8x10xf32>
    %cst_94 = arith.constant 5.000000e-01 : f32
    %198 = vector.broadcast %cst_94 : f32 to vector<2x4x8x10xf32>
    %199 = arith.mulf %198, %197 : vector<2x4x8x10xf32>
    %200 = arith.mulf %187, %199 : vector<2x4x8x10xf32>
    %201 = vector.shape_cast %200 : vector<2x4x8x10xf32> to vector<8x8x10xf32>
    %202 = vector.broadcast %0 : f32 to vector<8x8x10xf32>
    %203 = arith.mulf %202, %201 : vector<8x8x10xf32>
    %cst_95 = arith.constant 1.000000e+00 : f32
    %204 = arith.subf %cst_95, %0 : f32
    "tpu.trace_start"() <{level = 10 : i32, message = "gtn,gnm->gtm"}> : () -> ()
    %cst_96 = arith.constant dense<0.000000e+00> : vector<8x8x10xf32>
    %205 = tpu.matmul %201, %53, %cst_96 {dimension_numbers = #tpu.dot_dimension_numbers<[2], [1], [1], [2], [0, 0, 0, 1, 1, 2], [0], [0]>} : vector<8x8x10xf32>, vector<8x10x10xf32>, vector<8x8x10xf32> -> vector<8x8x10xf32>
    "tpu.trace_stop"() : () -> ()
    %206 = vector.broadcast %204 : f32 to vector<8x8x10xf32>
    %207 = arith.mulf %206, %205 : vector<8x8x10xf32>
    %208 = arith.addf %203, %207 : vector<8x8x10xf32>
    %209 = vector.broadcast %0 : f32 to vector<8x8x10xf32>
    %210 = arith.mulf %209, %201 : vector<8x8x10xf32>
    %cst_97 = arith.constant 1.000000e+00 : f32
    %211 = arith.subf %cst_97, %0 : f32
    "tpu.trace_start"() <{level = 10 : i32, message = "gtn,gnm->gtm"}> : () -> ()
    %cst_98 = arith.constant dense<0.000000e+00> : vector<8x8x10xf32>
    %212 = tpu.matmul %208, %53, %cst_98 {dimension_numbers = #tpu.dot_dimension_numbers<[2], [1], [1], [2], [0, 0, 0, 1, 1, 2], [0], [0]>} : vector<8x8x10xf32>, vector<8x10x10xf32>, vector<8x8x10xf32> -> vector<8x8x10xf32>
    "tpu.trace_stop"() : () -> ()
    %213 = vector.broadcast %211 : f32 to vector<8x8x10xf32>
    %214 = arith.mulf %213, %212 : vector<8x8x10xf32>
    %215 = arith.addf %210, %214 : vector<8x8x10xf32>
    %216 = vector.shape_cast %215 : vector<8x8x10xf32> to vector<2x4x8x10xf32>
    %c12 = arith.constant 12 : index
    %c0_99 = arith.constant 0 : index
    %c0_100 = arith.constant 0 : index
    %c0_101 = arith.constant 0 : index
    %217 = vector.load %arg6[%c12, %c0_99, %c0_100, %c0_101] : memref<32x4x1x1xf32, #tpu.memory_space<vmem>>, vector<1x4x1x1xf32>
    %218 = vector.shape_cast %217 : vector<1x4x1x1xf32> to vector<4x1x1xf32>
    %219 = vector.shape_cast %218 : vector<4x1x1xf32> to vector<1x4x1x1xf32>
    %220 = vector.broadcast %219 : vector<1x4x1x1xf32> to vector<2x4x8x10xf32>
    %221 = arith.mulf %220, %216 : vector<2x4x8x10xf32>
    %c13 = arith.constant 13 : index
    %c0_102 = arith.constant 0 : index
    %c0_103 = arith.constant 0 : index
    %c0_104 = arith.constant 0 : index
    %222 = vector.load %arg6[%c13, %c0_102, %c0_103, %c0_104] : memref<32x4x1x1xf32, #tpu.memory_space<vmem>>, vector<1x4x1x1xf32>
    %223 = vector.shape_cast %222 : vector<1x4x1x1xf32> to vector<4x1x1xf32>
    %224 = vector.shape_cast %223 : vector<4x1x1xf32> to vector<1x4x1x1xf32>
    %225 = vector.broadcast %224 : vector<1x4x1x1xf32> to vector<2x4x8x10xf32>
    %226 = arith.addf %221, %225 : vector<2x4x8x10xf32>
    %227 = arith.mulf %226, %226 : vector<2x4x8x10xf32>
    %228 = arith.mulf %226, %227 : vector<2x4x8x10xf32>
    %cst_105 = arith.constant 4.471500e-02 : f32
    %229 = vector.broadcast %cst_105 : f32 to vector<2x4x8x10xf32>
    %230 = arith.mulf %229, %228 : vector<2x4x8x10xf32>
    %231 = arith.addf %226, %230 : vector<2x4x8x10xf32>
    %cst_106 = arith.constant 0.797884583 : f32
    %232 = vector.broadcast %cst_106 : f32 to vector<2x4x8x10xf32>
    %233 = arith.mulf %232, %231 : vector<2x4x8x10xf32>
    %234 = math.tanh %233 : vector<2x4x8x10xf32>
    %cst_107 = arith.constant 1.000000e+00 : f32
    %235 = vector.broadcast %cst_107 : f32 to vector<2x4x8x10xf32>
    %236 = arith.addf %235, %234 : vector<2x4x8x10xf32>
    %cst_108 = arith.constant 5.000000e-01 : f32
    %237 = vector.broadcast %cst_108 : f32 to vector<2x4x8x10xf32>
    %238 = arith.mulf %237, %236 : vector<2x4x8x10xf32>
    %239 = arith.mulf %226, %238 : vector<2x4x8x10xf32>
    %240 = arith.addf %239, %155 : vector<2x4x8x10xf32>
    %c16 = arith.constant 16 : index
    %c0_109 = arith.constant 0 : index
    %c0_110 = arith.constant 0 : index
    %c0_111 = arith.constant 0 : index
    %241 = vector.load %arg6[%c16, %c0_109, %c0_110, %c0_111] : memref<32x4x1x1xf32, #tpu.memory_space<vmem>>, vector<1x4x1x1xf32>
    %242 = vector.shape_cast %241 : vector<1x4x1x1xf32> to vector<4x1x1xf32>
    %243 = vector.shape_cast %242 : vector<4x1x1xf32> to vector<1x4x1x1xf32>
    %244 = vector.broadcast %243 : vector<1x4x1x1xf32> to vector<2x4x8x10xf32>
    %245 = arith.mulf %244, %200 : vector<2x4x8x10xf32>
    %246 = arith.addf %161, %245 : vector<2x4x8x10xf32>
    %c17 = arith.constant 17 : index
    %c0_112 = arith.constant 0 : index
    %c0_113 = arith.constant 0 : index
    %c0_114 = arith.constant 0 : index
    %247 = vector.load %arg6[%c17, %c0_112, %c0_113, %c0_114] : memref<32x4x1x1xf32, #tpu.memory_space<vmem>>, vector<1x4x1x1xf32>
    %248 = vector.shape_cast %247 : vector<1x4x1x1xf32> to vector<4x1x1xf32>
    %249 = vector.shape_cast %248 : vector<4x1x1xf32> to vector<1x4x1x1xf32>
    %250 = vector.broadcast %249 : vector<1x4x1x1xf32> to vector<2x4x8x10xf32>
    %251 = arith.mulf %250, %240 : vector<2x4x8x10xf32>
    %252 = arith.addf %246, %251 : vector<2x4x8x10xf32>
    %253 = arith.mulf %252, %252 : vector<2x4x8x10xf32>
    %254 = arith.mulf %252, %253 : vector<2x4x8x10xf32>
    %cst_115 = arith.constant 4.471500e-02 : f32
    %255 = vector.broadcast %cst_115 : f32 to vector<2x4x8x10xf32>
    %256 = arith.mulf %255, %254 : vector<2x4x8x10xf32>
    %257 = arith.addf %252, %256 : vector<2x4x8x10xf32>
    %cst_116 = arith.constant 0.797884583 : f32
    %258 = vector.broadcast %cst_116 : f32 to vector<2x4x8x10xf32>
    %259 = arith.mulf %258, %257 : vector<2x4x8x10xf32>
    %260 = math.tanh %259 : vector<2x4x8x10xf32>
    %cst_117 = arith.constant 1.000000e+00 : f32
    %261 = vector.broadcast %cst_117 : f32 to vector<2x4x8x10xf32>
    %262 = arith.addf %261, %260 : vector<2x4x8x10xf32>
    %cst_118 = arith.constant 5.000000e-01 : f32
    %263 = vector.broadcast %cst_118 : f32 to vector<2x4x8x10xf32>
    %264 = arith.mulf %263, %262 : vector<2x4x8x10xf32>
    %265 = arith.mulf %252, %264 : vector<2x4x8x10xf32>
    %c19 = arith.constant 19 : index
    %c0_119 = arith.constant 0 : index
    %c0_120 = arith.constant 0 : index
    %c0_121 = arith.constant 0 : index
    %266 = vector.load %arg6[%c19, %c0_119, %c0_120, %c0_121] : memref<32x4x1x1xf32, #tpu.memory_space<vmem>>, vector<1x4x1x1xf32>
    %267 = vector.shape_cast %266 : vector<1x4x1x1xf32> to vector<4x1x1xf32>
    %268 = vector.shape_cast %267 : vector<4x1x1xf32> to vector<1x4x1x1xf32>
    %269 = vector.broadcast %268 : vector<1x4x1x1xf32> to vector<2x4x8x10xf32>
    %270 = arith.mulf %269, %265 : vector<2x4x8x10xf32>
    %c20 = arith.constant 20 : index
    %c0_122 = arith.constant 0 : index
    %c0_123 = arith.constant 0 : index
    %c0_124 = arith.constant 0 : index
    %271 = vector.load %arg6[%c20, %c0_122, %c0_123, %c0_124] : memref<32x4x1x1xf32, #tpu.memory_space<vmem>>, vector<1x4x1x1xf32>
    %272 = vector.shape_cast %271 : vector<1x4x1x1xf32> to vector<4x1x1xf32>
    %273 = vector.shape_cast %272 : vector<4x1x1xf32> to vector<1x4x1x1xf32>
    %274 = vector.broadcast %273 : vector<1x4x1x1xf32> to vector<2x4x8x10xf32>
    %275 = arith.addf %270, %274 : vector<2x4x8x10xf32>
    %276 = arith.mulf %275, %275 : vector<2x4x8x10xf32>
    %277 = arith.mulf %275, %276 : vector<2x4x8x10xf32>
    %cst_125 = arith.constant 4.471500e-02 : f32
    %278 = vector.broadcast %cst_125 : f32 to vector<2x4x8x10xf32>
    %279 = arith.mulf %278, %277 : vector<2x4x8x10xf32>
    %280 = arith.addf %275, %279 : vector<2x4x8x10xf32>
    %cst_126 = arith.constant 0.797884583 : f32
    %281 = vector.broadcast %cst_126 : f32 to vector<2x4x8x10xf32>
    %282 = arith.mulf %281, %280 : vector<2x4x8x10xf32>
    %283 = math.tanh %282 : vector<2x4x8x10xf32>
    %cst_127 = arith.constant 1.000000e+00 : f32
    %284 = vector.broadcast %cst_127 : f32 to vector<2x4x8x10xf32>
    %285 = arith.addf %284, %283 : vector<2x4x8x10xf32>
    %cst_128 = arith.constant 5.000000e-01 : f32
    %286 = vector.broadcast %cst_128 : f32 to vector<2x4x8x10xf32>
    %287 = arith.mulf %286, %285 : vector<2x4x8x10xf32>
    %288 = arith.mulf %275, %287 : vector<2x4x8x10xf32>
    %c21 = arith.constant 21 : index
    %c0_129 = arith.constant 0 : index
    %c0_130 = arith.constant 0 : index
    %c0_131 = arith.constant 0 : index
    %289 = vector.load %arg6[%c21, %c0_129, %c0_130, %c0_131] : memref<32x4x1x1xf32, #tpu.memory_space<vmem>>, vector<1x4x1x1xf32>
    %290 = vector.shape_cast %289 : vector<1x4x1x1xf32> to vector<4x1x1xf32>
    %291 = vector.extract_strided_slice %288 {offsets = [0, 0, 0, 0], sizes = [2, 1, 8, 10], strides = [1, 1, 1, 1]} : vector<2x4x8x10xf32> to vector<2x1x8x10xf32>
    %292 = vector.shape_cast %290 : vector<4x1x1xf32> to vector<1x4x1x1xf32>
    %293 = vector.broadcast %292 : vector<1x4x1x1xf32> to vector<2x4x8x10xf32>
    %294 = vector.broadcast %291 : vector<2x1x8x10xf32> to vector<2x4x8x10xf32>
    %295 = arith.mulf %293, %294 : vector<2x4x8x10xf32>
    %c22 = arith.constant 22 : index
    %c0_132 = arith.constant 0 : index
    %c0_133 = arith.constant 0 : index
    %c0_134 = arith.constant 0 : index
    %296 = vector.load %arg6[%c22, %c0_132, %c0_133, %c0_134] : memref<32x4x1x1xf32, #tpu.memory_space<vmem>>, vector<1x4x1x1xf32>
    %297 = vector.shape_cast %296 : vector<1x4x1x1xf32> to vector<4x1x1xf32>
    %298 = vector.extract_strided_slice %288 {offsets = [0, 1, 0, 0], sizes = [2, 1, 8, 10], strides = [1, 1, 1, 1]} : vector<2x4x8x10xf32> to vector<2x1x8x10xf32>
    %299 = vector.shape_cast %297 : vector<4x1x1xf32> to vector<1x4x1x1xf32>
    %300 = vector.broadcast %299 : vector<1x4x1x1xf32> to vector<2x4x8x10xf32>
    %301 = vector.broadcast %298 : vector<2x1x8x10xf32> to vector<2x4x8x10xf32>
    %302 = arith.mulf %300, %301 : vector<2x4x8x10xf32>
    %303 = arith.addf %295, %302 : vector<2x4x8x10xf32>
    %c23 = arith.constant 23 : index
    %c0_135 = arith.constant 0 : index
    %c0_136 = arith.constant 0 : index
    %c0_137 = arith.constant 0 : index
    %304 = vector.load %arg6[%c23, %c0_135, %c0_136, %c0_137] : memref<32x4x1x1xf32, #tpu.memory_space<vmem>>, vector<1x4x1x1xf32>
    %305 = vector.shape_cast %304 : vector<1x4x1x1xf32> to vector<4x1x1xf32>
    %306 = vector.extract_strided_slice %288 {offsets = [0, 2, 0, 0], sizes = [2, 1, 8, 10], strides = [1, 1, 1, 1]} : vector<2x4x8x10xf32> to vector<2x1x8x10xf32>
    %307 = vector.shape_cast %305 : vector<4x1x1xf32> to vector<1x4x1x1xf32>
    %308 = vector.broadcast %307 : vector<1x4x1x1xf32> to vector<2x4x8x10xf32>
    %309 = vector.broadcast %306 : vector<2x1x8x10xf32> to vector<2x4x8x10xf32>
    %310 = arith.mulf %308, %309 : vector<2x4x8x10xf32>
    %311 = arith.addf %303, %310 : vector<2x4x8x10xf32>
    %c24 = arith.constant 24 : index
    %c0_138 = arith.constant 0 : index
    %c0_139 = arith.constant 0 : index
    %c0_140 = arith.constant 0 : index
    %312 = vector.load %arg6[%c24, %c0_138, %c0_139, %c0_140] : memref<32x4x1x1xf32, #tpu.memory_space<vmem>>, vector<1x4x1x1xf32>
    %313 = vector.shape_cast %312 : vector<1x4x1x1xf32> to vector<4x1x1xf32>
    %314 = vector.extract_strided_slice %288 {offsets = [0, 3, 0, 0], sizes = [2, 1, 8, 10], strides = [1, 1, 1, 1]} : vector<2x4x8x10xf32> to vector<2x1x8x10xf32>
    %315 = vector.shape_cast %313 : vector<4x1x1xf32> to vector<1x4x1x1xf32>
    %316 = vector.broadcast %315 : vector<1x4x1x1xf32> to vector<2x4x8x10xf32>
    %317 = vector.broadcast %314 : vector<2x1x8x10xf32> to vector<2x4x8x10xf32>
    %318 = arith.mulf %316, %317 : vector<2x4x8x10xf32>
    %319 = arith.addf %311, %318 : vector<2x4x8x10xf32>
    %320 = arith.addf %265, %319 : vector<2x4x8x10xf32>
    %c25 = arith.constant 25 : index
    %c0_141 = arith.constant 0 : index
    %c0_142 = arith.constant 0 : index
    %c0_143 = arith.constant 0 : index
    %321 = vector.load %arg6[%c25, %c0_141, %c0_142, %c0_143] : memref<32x4x1x1xf32, #tpu.memory_space<vmem>>, vector<1x4x1x1xf32>
    %322 = vector.shape_cast %321 : vector<1x4x1x1xf32> to vector<4x1x1xf32>
    %323 = vector.shape_cast %322 : vector<4x1x1xf32> to vector<1x4x1x1xf32>
    %324 = vector.broadcast %323 : vector<1x4x1x1xf32> to vector<2x4x8x10xf32>
    %325 = arith.addf %320, %324 : vector<2x4x8x10xf32>
    %326 = arith.mulf %325, %325 : vector<2x4x8x10xf32>
    %327 = arith.mulf %325, %326 : vector<2x4x8x10xf32>
    %cst_144 = arith.constant 4.471500e-02 : f32
    %328 = vector.broadcast %cst_144 : f32 to vector<2x4x8x10xf32>
    %329 = arith.mulf %328, %327 : vector<2x4x8x10xf32>
    %330 = arith.addf %325, %329 : vector<2x4x8x10xf32>
    %cst_145 = arith.constant 0.797884583 : f32
    %331 = vector.broadcast %cst_145 : f32 to vector<2x4x8x10xf32>
    %332 = arith.mulf %331, %330 : vector<2x4x8x10xf32>
    %333 = math.tanh %332 : vector<2x4x8x10xf32>
    %cst_146 = arith.constant 1.000000e+00 : f32
    %334 = vector.broadcast %cst_146 : f32 to vector<2x4x8x10xf32>
    %335 = arith.addf %334, %333 : vector<2x4x8x10xf32>
    %cst_147 = arith.constant 5.000000e-01 : f32
    %336 = vector.broadcast %cst_147 : f32 to vector<2x4x8x10xf32>
    %337 = arith.mulf %336, %335 : vector<2x4x8x10xf32>
    %338 = arith.mulf %325, %337 : vector<2x4x8x10xf32>
    %c0_148 = arith.constant 0 : index
    %c0_149 = arith.constant 0 : index
    %c0_150 = arith.constant 0 : index
    %c0_151 = arith.constant 0 : index
    %339 = vector.load %arg7[%c0_148, %c0_149, %c0_150, %c0_151] : memref<2x4x8x1xf32, #tpu.memory_space<vmem>>, vector<1x4x8x1xf32>
    %340 = vector.shape_cast %339 : vector<1x4x8x1xf32> to vector<4x8x1xf32>
    %341 = vector.shape_cast %340 : vector<4x8x1xf32> to vector<1x4x8x1xf32>
    %342 = vector.broadcast %341 : vector<1x4x8x1xf32> to vector<2x4x8x10xf32>
    %343 = arith.mulf %338, %342 : vector<2x4x8x10xf32>
    %cst_152 = arith.constant dense<0.000000e+00> : vector<2x4x10xf32>
    %344 = vector.multi_reduction <add>, %343, %cst_152 [2] : vector<2x4x8x10xf32> to vector<2x4x10xf32>
    %345 = vector.shape_cast %344 : vector<2x4x10xf32> to vector<2x4x1x10xf32>
    %c26 = arith.constant 26 : index
    %c0_153 = arith.constant 0 : index
    %c0_154 = arith.constant 0 : index
    %c0_155 = arith.constant 0 : index
    %346 = vector.load %arg6[%c26, %c0_153, %c0_154, %c0_155] : memref<32x4x1x1xf32, #tpu.memory_space<vmem>>, vector<1x4x1x1xf32>
    %347 = vector.shape_cast %346 : vector<1x4x1x1xf32> to vector<4x1x1xf32>
    %348 = vector.shape_cast %347 : vector<4x1x1xf32> to vector<1x4x1x1xf32>
    %349 = vector.broadcast %348 : vector<1x4x1x1xf32> to vector<2x4x1x10xf32>
    %350 = arith.addf %345, %349 : vector<2x4x1x10xf32>
    %351 = math.tanh %350 : vector<2x4x1x10xf32>
    %c0_156 = arith.constant 0 : index
    %c0_157 = arith.constant 0 : index
    %c0_158 = arith.constant 0 : index
    %c0_159 = arith.constant 0 : index
    %352 = vector.load %arg3[%c0_156, %c0_157, %c0_158, %c0_159] : memref<2x4x8x10xf32, #tpu.memory_space<vmem>>, vector<2x4x8x10xf32>
    %353 = vector.extract_strided_slice %352 {offsets = [0, 0, 0, 0], sizes = [2, 4, 7, 10], strides = [1, 1, 1, 1]} : vector<2x4x8x10xf32> to vector<2x4x7x10xf32>
    %354 = tpu.concatenate %56, %353 in 2 : vector<2x4x1x10xf32>, vector<2x4x7x10xf32> -> vector<2x4x8x10xf32>
    %355 = vector.extract_strided_slice %352 {offsets = [0, 0, 1, 0], sizes = [2, 4, 7, 10], strides = [1, 1, 1, 1]} : vector<2x4x8x10xf32> to vector<2x4x7x10xf32>
    %356 = tpu.concatenate %355, %56 in 2 : vector<2x4x7x10xf32>, vector<2x4x1x10xf32> -> vector<2x4x8x10xf32>
    %c27 = arith.constant 27 : index
    %c0_160 = arith.constant 0 : index
    %c0_161 = arith.constant 0 : index
    %c0_162 = arith.constant 0 : index
    %357 = vector.load %arg6[%c27, %c0_160, %c0_161, %c0_162] : memref<32x4x1x1xf32, #tpu.memory_space<vmem>>, vector<1x4x1x1xf32>
    %358 = vector.shape_cast %357 : vector<1x4x1x1xf32> to vector<4x1x1xf32>
    %359 = vector.shape_cast %358 : vector<4x1x1xf32> to vector<1x4x1x1xf32>
    %360 = vector.broadcast %359 : vector<1x4x1x1xf32> to vector<2x4x8x10xf32>
    %361 = arith.mulf %360, %354 : vector<2x4x8x10xf32>
    %c28 = arith.constant 28 : index
    %c0_163 = arith.constant 0 : index
    %c0_164 = arith.constant 0 : index
    %c0_165 = arith.constant 0 : index
    %362 = vector.load %arg6[%c28, %c0_163, %c0_164, %c0_165] : memref<32x4x1x1xf32, #tpu.memory_space<vmem>>, vector<1x4x1x1xf32>
    %363 = vector.shape_cast %362 : vector<1x4x1x1xf32> to vector<4x1x1xf32>
    %364 = vector.shape_cast %363 : vector<4x1x1xf32> to vector<1x4x1x1xf32>
    %365 = vector.broadcast %364 : vector<1x4x1x1xf32> to vector<2x4x8x10xf32>
    %366 = arith.mulf %365, %352 : vector<2x4x8x10xf32>
    %367 = arith.addf %361, %366 : vector<2x4x8x10xf32>
    %c29 = arith.constant 29 : index
    %c0_166 = arith.constant 0 : index
    %c0_167 = arith.constant 0 : index
    %c0_168 = arith.constant 0 : index
    %368 = vector.load %arg6[%c29, %c0_166, %c0_167, %c0_168] : memref<32x4x1x1xf32, #tpu.memory_space<vmem>>, vector<1x4x1x1xf32>
    %369 = vector.shape_cast %368 : vector<1x4x1x1xf32> to vector<4x1x1xf32>
    %370 = vector.shape_cast %369 : vector<4x1x1xf32> to vector<1x4x1x1xf32>
    %371 = vector.broadcast %370 : vector<1x4x1x1xf32> to vector<2x4x8x10xf32>
    %372 = arith.mulf %371, %356 : vector<2x4x8x10xf32>
    %373 = arith.addf %367, %372 : vector<2x4x8x10xf32>
    %c30 = arith.constant 30 : index
    %c0_169 = arith.constant 0 : index
    %c0_170 = arith.constant 0 : index
    %c0_171 = arith.constant 0 : index
    %374 = vector.load %arg6[%c30, %c0_169, %c0_170, %c0_171] : memref<32x4x1x1xf32, #tpu.memory_space<vmem>>, vector<1x4x1x1xf32>
    %375 = vector.shape_cast %374 : vector<1x4x1x1xf32> to vector<4x1x1xf32>
    %376 = vector.shape_cast %375 : vector<4x1x1xf32> to vector<1x4x1x1xf32>
    %377 = vector.broadcast %376 : vector<1x4x1x1xf32> to vector<2x4x8x10xf32>
    %378 = arith.addf %373, %377 : vector<2x4x8x10xf32>
    %379 = arith.mulf %378, %378 : vector<2x4x8x10xf32>
    %380 = arith.mulf %378, %379 : vector<2x4x8x10xf32>
    %cst_172 = arith.constant 4.471500e-02 : f32
    %381 = vector.broadcast %cst_172 : f32 to vector<2x4x8x10xf32>
    %382 = arith.mulf %381, %380 : vector<2x4x8x10xf32>
    %383 = arith.addf %378, %382 : vector<2x4x8x10xf32>
    %cst_173 = arith.constant 0.797884583 : f32
    %384 = vector.broadcast %cst_173 : f32 to vector<2x4x8x10xf32>
    %385 = arith.mulf %384, %383 : vector<2x4x8x10xf32>
    %386 = math.tanh %385 : vector<2x4x8x10xf32>
    %cst_174 = arith.constant 1.000000e+00 : f32
    %387 = vector.broadcast %cst_174 : f32 to vector<2x4x8x10xf32>
    %388 = arith.addf %387, %386 : vector<2x4x8x10xf32>
    %cst_175 = arith.constant 5.000000e-01 : f32
    %389 = vector.broadcast %cst_175 : f32 to vector<2x4x8x10xf32>
    %390 = arith.mulf %389, %388 : vector<2x4x8x10xf32>
    %391 = arith.mulf %378, %390 : vector<2x4x8x10xf32>
    %392 = arith.addf %352, %391 : vector<2x4x8x10xf32>
    %c1_176 = arith.constant 1 : index
    %c0_177 = arith.constant 0 : index
    %c0_178 = arith.constant 0 : index
    %c0_179 = arith.constant 0 : index
    %393 = vector.load %arg7[%c1_176, %c0_177, %c0_178, %c0_179] : memref<2x4x8x1xf32, #tpu.memory_space<vmem>>, vector<1x4x8x1xf32>
    %394 = vector.shape_cast %393 : vector<1x4x8x1xf32> to vector<4x8x1xf32>
    %395 = vector.shape_cast %394 : vector<4x8x1xf32> to vector<1x4x8x1xf32>
    %396 = vector.broadcast %395 : vector<1x4x8x1xf32> to vector<2x4x8x10xf32>
    %397 = arith.mulf %392, %396 : vector<2x4x8x10xf32>
    %cst_180 = arith.constant dense<0.000000e+00> : vector<2x4x10xf32>
    %398 = vector.multi_reduction <add>, %397, %cst_180 [2] : vector<2x4x8x10xf32> to vector<2x4x10xf32>
    %399 = vector.shape_cast %398 : vector<2x4x10xf32> to vector<2x4x1x10xf32>
    %c31 = arith.constant 31 : index
    %c0_181 = arith.constant 0 : index
    %c0_182 = arith.constant 0 : index
    %c0_183 = arith.constant 0 : index
    %400 = vector.load %arg6[%c31, %c0_181, %c0_182, %c0_183] : memref<32x4x1x1xf32, #tpu.memory_space<vmem>>, vector<1x4x1x1xf32>
    %401 = vector.shape_cast %400 : vector<1x4x1x1xf32> to vector<4x1x1xf32>
    %402 = vector.shape_cast %401 : vector<4x1x1xf32> to vector<1x4x1x1xf32>
    %403 = vector.broadcast %402 : vector<1x4x1x1xf32> to vector<2x4x1x10xf32>
    %404 = arith.addf %399, %403 : vector<2x4x1x10xf32>
    %405 = arith.negf %404 : vector<2x4x1x10xf32>
    %406 = math.exp %405 : vector<2x4x1x10xf32>
    %cst_184 = arith.constant 1.000000e+00 : f32
    %407 = vector.broadcast %cst_184 : f32 to vector<2x4x1x10xf32>
    %408 = arith.addf %407, %406 : vector<2x4x1x10xf32>
    %409 = arith.divf %407, %408 : vector<2x4x1x10xf32>
    %c0_185 = arith.constant 0 : index
    %c0_186 = arith.constant 0 : index
    %c0_187 = arith.constant 0 : index
    %c0_188 = arith.constant 0 : index
    %410 = vector.load %arg9[%c0_185, %c0_186, %c0_187, %c0_188] : memref<2x4x3x10xf32, #tpu.memory_space<vmem>>, vector<2x4x1x10xf32>
    tpu.vector_store %arg9[%c0_185, %c0_186, %c0_187, %c0_188], %351 {strides = array<i32>} : memref<2x4x3x10xf32, #tpu.memory_space<vmem>>, vector<2x4x1x10xf32>,
    %c0_189 = arith.constant 0 : index
    %c0_190 = arith.constant 0 : index
    %c1_191 = arith.constant 1 : index
    %c0_192 = arith.constant 0 : index
    %411 = vector.load %arg9[%c0_189, %c0_190, %c1_191, %c0_192] : memref<2x4x3x10xf32, #tpu.memory_space<vmem>>, vector<2x4x1x10xf32>
    tpu.vector_store %arg9[%c0_189, %c0_190, %c1_191, %c0_192], %409 {strides = array<i32>} : memref<2x4x3x10xf32, #tpu.memory_space<vmem>>, vector<2x4x1x10xf32>,
    %412 = arith.mulf %351, %409 : vector<2x4x1x10xf32>
    %c0_193 = arith.constant 0 : index
    %c0_194 = arith.constant 0 : index
    %c2_195 = arith.constant 2 : index
    %c0_196 = arith.constant 0 : index
    %413 = vector.load %arg9[%c0_193, %c0_194, %c2_195, %c0_196] : memref<2x4x3x10xf32, #tpu.memory_space<vmem>>, vector<2x4x1x10xf32>
    tpu.vector_store %arg9[%c0_193, %c0_194, %c2_195, %c0_196], %412 {strides = array<i32>} : memref<2x4x3x10xf32, #tpu.memory_space<vmem>>, vector<2x4x1x10xf32>,
    return
  }
}

</mosaic_0001>

<bundles_post_ra>
// kernel: hetero_nri_forward.1
= control target key start
LH: loop header
LB: loop body
LE: loop exit
PB: predicated region body
PF: predicated region fallthrough
CT: control target
= control target key end

     0   :  { %vm63_vm0 = vcmask 64512   ;;  %s11989_s0 = inlined_call_operand.<no memory space> [shape: f32[1], index: 0, kind: input, shape index: {}]   ;;  %s11990_s1 = inlined_call_operand.vmem [shape: f32[2,4,8,10], index: 1, kind: input, shape index: {}]   ;;  %s11991_s2 = inlined_call_operand.vmem [shape: f32[2,4,10,8], index: 2, kind: input, shape index: {}]   ;;  %s11992_s3 = inlined_call_operand.vmem [shape: f32[2,4,8,10], index: 3, kind: input, shape index: {}]   ;;  %s11993_s4 = inlined_call_operand.vmem [shape: f32[2,4,10,10], index: 4, kind: input, shape index: {}]   ;;  %s11994_s5 = inlined_call_operand.vmem [shape: f32[4,8,32], index: 5, kind: input, shape index: {}]   ;;  %s11995_s6 = inlined_call_operand.vmem [shape: f32[32,4,1,1], index: 6, kind: input, shape index: {}]   ;;  %s11996_s7 = inlined_call_operand.vmem [shape: f32[2,4,8,1], index: 7, kind: input, shape index: {}]   ;;  %s11997_s8 = inlined_call_operand.vmem [shape: f32[2,4,10,10], index: 8, kind: output, shape index: {0}]   ;;  %s11998_s9 = inlined_call_operand.vmem [shape: f32[2,4,3,10], index: 9, kind: output, shape index: {1}]   ;;  %s11999_s10 = inlined_call_operand.hbm [shape: f32[1,1], index: 10, kind: output, shape index: {2}]  }
   0x1   :  { %v59_v0 = vld [vmem:[%s11994_s5] sm:$0xff]  ;;  %v44_v2 = vld [vmem:[%s11991_s2 + $0x8] sm:$0x3]  ;;  %v45_v4 = vld [vmem:[%s11991_s2 + $0x10] sm:$0xff] }
   0x2   :  { %v43_v1 = vld [vmem:[%s11991_s2] sm:$0xff]  ;;  %7856 = vmatprep.subr.mxu0 %v59_v0  ;;  %v60_v3 = vld [vmem:[%s11994_s5 + $0x8] sm:$0xff]  ;;  %v61_v5 = vld [vmem:[%s11994_s5 + $0x10] sm:$0xff]  ;;  %7863 = vmatprep.mubr.msk.f32.mxu1 %vm63_vm0, %v45_v4 }
   0x3   :  { %7858 = vmatprep.mubr.msk.f32.mxu0 %vm63_vm0, %v43_v1  ;;  %7857 = vmatpush3.msra.mxu0 %v59_v0  ;;  %v46_v6 = vld [vmem:[%s11991_s2 + $0x18] sm:$0x3]  ;;  %v47_v7 = vld [vmem:[%s11991_s2 + $0x20] sm:$0xff]  ;;  %v48_v9 = vld [vmem:[%s11991_s2 + $0x28] sm:$0x3] }
   0x4   :  { %7861 = vmatprep.subr.mxu1 %v60_v3  ;;  %7859 = vmatmul.mubr.msk.f32.vlgmr.msra.gmra.mrb[0].mxu0 %vm63_vm0, %v44_v2  ;;  %v62_v8 = vld [vmem:[%s11994_s5 + $0x18] sm:$0xff]  ;;  %v49_v10 = vld [vmem:[%s11991_s2 + $0x30] sm:$0xff]  ;;  %v51_v11 = vld [vmem:[%s11991_s2 + $0x40] sm:$0xff] }
   0x5   :  { %7862 = vmatpush3.msra.mxu1 %v60_v3  ;;  %7866 = vmatprep.subr.mxu0 %v61_v5 }
   0x6   :  { %7864 = vmatmul.mubr.msk.f32.vlgmr.msra.gmra.mrb[0].mxu1 %vm63_vm0, %v46_v6  ;;  %7867 = vmatpush3.msra.mxu0 %v61_v5 }
   0x7   :  { %7868 = vmatprep.mubr.msk.f32.mxu0 %vm63_vm0, %v47_v7  ;;  %7871 = vmatprep.subr.mxu1 %v62_v8 }
   0x8   :  { %17 = vsyncpa [#allocation4], 0  ;;  %7869 = vmatmul.mubr.msk.f32.vlgmr.msra.gmra.mrb[2].mxu0 %vm63_vm0, %v48_v9  ;;  %7876 = vmatprep.subr.mxu0 %v59_v0  ;;  %v50_v12 = vld [vmem:[%s11991_s2 + $0x38] sm:$0x3]  ;;  %v52_v13 = vld [vmem:[%s11991_s2 + $0x48] sm:$0x3] }
   0x9   :  { %7872 = vmatpush3.msra.mxu1 %v62_v8  ;;  %7873 = vmatprep.mubr.msk.f32.mxu1 %vm63_vm0, %v49_v10  ;;  %v53_v14 = vld [vmem:[%s11991_s2 + $0x50] sm:$0xff]  ;;  %v55_v15 = vld [vmem:[%s11991_s2 + $0x60] sm:$0xff]  ;;  %v54_v16 = vld [vmem:[%s11991_s2 + $0x58] sm:$0x3]  ;;  %v8705_v20 = vmov 0   ;;  %vm750_vm1 = vcmask 130048  }
   0xa   :  { %7877 = vmatpush3.msra.mxu0 %v59_v0  ;;  %7878 = vmatprep.mubr.msk.f32.mxu0 %vm63_vm0, %v51_v11  ;;  %v56_v17 = vld [vmem:[%s11991_s2 + $0x68] sm:$0x3]  ;;  %v57_v18 = vld [vmem:[%s11991_s2 + $0x70] sm:$0xff]  ;;  %v58_v19 = vld [vmem:[%s11991_s2 + $0x78] sm:$0x3]  ;;  %s8706_s2 = smov 112  }
   0xb   :  { %7874 = vmatmul.mubr.msk.f32.vlgmr.msra.gmra.mrb[2].mxu1 %vm63_vm0, %v50_v12  ;;  %7881 = vmatprep.subr.mxu1 %v60_v3  ;;  %vm9050_vm2 = vmpackc.low %vm750_vm1, %vm750_vm1  ;;  %vm2327_vm3 = vcmask 1040384   ;;  %vm12090_vm4 = vcmask 1046528   ;;  %vm1475_vm5 = vcmask 74752   ;;  %vm1473_vm6 = vcmask 80896   ;;  %s2654_s11 = ssub.f32 1.0, %s11989_s0  ;;  %s8693_s18 = scalar_lea.hbm %s11999_s10, 16 }
   0xc   :  { %7879 = vmatmul.mubr.msk.f32.vlgmr.msra.gmra.mrb[4].mxu0 %vm63_vm0, %v52_v13  ;;  %7886 = vmatprep.subr.mxu0 %v61_v5  ;;  %v7352_v13 = vld [vmem:[%s11995_s6] ss:$0 sm:$0xff]  ;;  %p8694_p0 = scmp.ne.s32.totalorder %s11999_s10, %s8693_s18  ;;  %p8697_p1 = scmp.lt.u32.totalorder %s8693_s18, %s11999_s10 }
   0xd   :  { %7882 = vmatpush3.msra.mxu1 %v60_v3  ;;  %7883 = vmatprep.mubr.msk.f32.mxu1 %vm63_vm0, %v53_v14  ;;  %v7353_v14 = vld [vmem:[%s11995_s6 + $0x1] ss:$0 sm:$0xff] }
   0xe   :  { %7887 = vmatpush3.msra.mxu0 %v61_v5  ;;  %7888 = vmatprep.mubr.msk.f32.mxu0 %vm63_vm0, %v55_v15  ;;  %v7354_v15 = vld [vmem:[%s11995_s6 + $0x2] ss:$0 sm:$0xff]  ;;  %p8699_p2 = pnand %p8697_p1, %p8694_p0 }
   0xf   :  { %7884 = vmatmul.mubr.msk.f32.vlgmr.msra.gmra.mrb[4].mxu1 %vm63_vm0, %v54_v16  ;;  %7891 = vmatprep.subr.mxu1 %v62_v8  ;;  %v7360_v16 = vld [vmem:[%s11995_s6 + $0x4] ss:$0 sm:$0xff] }
  0x10   :  { %7889 = vmatmul.mubr.msk.f32.vlgmr.msra.gmra.mrb[6].mxu0 %vm63_vm0, %v56_v17  ;;  %7892 = vmatpush3.msra.mxu1 %v62_v8  ;;  %v7355_v17 = vld [vmem:[%s11995_s6 + $0x3] ss:$0 sm:$0xff] }
  0x11   :  { %7893 = vmatprep.mubr.msk.f32.mxu1 %vm63_vm0, %v57_v18  ;;  %8401 = vset.pattern.permute.xlu0 %v8705_v20  ;;  %v7361_v18 = vld [vmem:[%s11995_s6 + $0x5] ss:$0 sm:$0xff] }
  0x12   :  { %8402 = vset.pattern.permute.xlu1 %v8705_v20  ;;  %v7362_v20 = vld [vmem:[%s11995_s6 + $0x6] ss:$0 sm:$0xff] }
  0x13   :  { %7894 = vmatmul.mubr.msk.f32.vlgmr.msra.gmra.mrb[6].mxu1 %vm63_vm0, %v58_v19  ;;  %v7384_v19 = vld [vmem:[%s11995_s6 + $0x8] ss:$0 sm:$0xff] }
  0xd7   :  { %v7860_v21 = vpop.f32.mrb[0].mxu0 }
  0xd8   :  { %v713_v22 = vmul.f32 3.0, %v7860_v21  ;;  %v136_v23 = vpop.f32.mrb[1].mxu0  ;;  %v7363_v21 = vld [vmem:[%s11995_s6 + $0x7] ss:$0 sm:$0xff] }
  0xd9   :  { %v712_v24 = vmul.f32 3.0, %v136_v23  ;;  %v7865_v25 = vpop.f32.mrb[0].mxu1  ;;  %v7393_v23 = vld [vmem:[%s11995_s6 + $0xd] ss:$0 sm:$0xff] }
  0xda   :  { %8403 = vtanh.f32 %v713_v22  ;;  %v715_v26 = vmul.f32 3.0, %v7865_v25  ;;  %v217_v27 = vpop.f32.mrb[1].mxu1  ;;  %v7392_v22 = vld [vmem:[%s11995_s6 + $0xc] ss:$0 sm:$0xff]  ;;  %v7386_v25 = vld [vmem:[%s11995_s6 + $0xa] ss:$0 sm:$0xff] }
  0xdb   :  { %8405 = vtanh.f32 %v712_v24  ;;  %v714_v28 = vmul.f32 3.0, %v217_v27  ;;  %v7870_v29 = vpop.f32.mrb[2].mxu0  ;;  %v7385_v24 = vld [vmem:[%s11995_s6 + $0x9] ss:$0 sm:$0xff]  ;;  %v7401_v27 = vld [vmem:[%s11995_s6 + $0x11] ss:$0 sm:$0xff] }
  0xdc   :  { %8407 = vtanh.f32 %v715_v26  ;;  %v717_v30 = vmul.f32 3.0, %v7870_v29  ;;  %v298_v31 = vpop.f32.mrb[3].mxu0  ;;  %v7400_v26 = vld [vmem:[%s11995_s6 + $0x10] ss:$0 sm:$0xff]  ;;  %v7395_v29 = vld [vmem:[%s11995_s6 + $0xf] ss:$0 sm:$0xff] }
  0xdd   :  { %8409 = vtanh.f32 %v714_v28  ;;  %v716_v32 = vmul.f32 3.0, %v298_v31  ;;  %v7394_v28 = vld [vmem:[%s11995_s6 + $0xe] ss:$0 sm:$0xff]  ;;  %v7408_v31 = vld [vmem:[%s11995_s6 + $0x14] ss:$0 sm:$0xff] }
  0xde   :  { %8411 = vtanh.f32 %v717_v30  ;;  %v7875_v33 = vpop.f32.mrb[2].mxu1  ;;  %v7387_v30 = vld [vmem:[%s11995_s6 + $0xb] ss:$0 sm:$0xff] }
  0xdf   :  { %8413 = vtanh.f32 %v716_v32  ;;  %v719_v34 = vmul.f32 3.0, %v7875_v33  ;;  %v7880_v35 = vpop.f32.mrb[4].mxu0  ;;  %v379_v36 = vpop.f32.mrb[3].mxu1  ;;  %v7402_v32 = vld [vmem:[%s11995_s6 + $0x12] ss:$0 sm:$0xff] }
  0xe0   :  { %v721_v37 = vmul.f32 3.0, %v7880_v35  ;;  %v718_v38 = vmul.f32 3.0, %v379_v36  ;;  %v460_v39 = vpop.f32.mrb[5].mxu0  ;;  %v7409_v33 = vld [vmem:[%s11995_s6 + $0x15] ss:$0 sm:$0xff] }
  0xe1   :  { %8415 = vtanh.f32 %v719_v34  ;;  %v720_v40 = vmul.f32 3.0, %v460_v39  ;;  %v7403_v34 = vld [vmem:[%s11995_s6 + $0x13] ss:$0 sm:$0xff]  ;;  %v7411_v35 = vld [vmem:[%s11995_s6 + $0x17] ss:$0 sm:$0xff] }
  0xe2   :  { %8417 = vtanh.f32 %v721_v37  ;;  %v7885_v41 = vpop.f32.mrb[4].mxu1  ;;  %v7410_v36 = vld [vmem:[%s11995_s6 + $0x16] ss:$0 sm:$0xff]  ;;  %v7465_v37 = vld [vmem:[%s11995_s6 + $0x19] ss:$0 sm:$0xff] }
  0xe3   :  { %8419 = vtanh.f32 %v718_v38  ;;  %v723_v42 = vmul.f32 3.0, %v7885_v41  ;;  %v7890_v43 = vpop.f32.mrb[6].mxu0  ;;  %v541_v44 = vpop.f32.mrb[5].mxu1  ;;  %v7464_v38 = vld [vmem:[%s11995_s6 + $0x18] ss:$0 sm:$0xff] }
  0xe4   :  { %v8843_v45 = vpop.eup %8403  ;;  %8421 = vtanh.f32 %v720_v40  ;;  %v725_v46 = vmul.f32 3.0, %v7890_v43  ;;  %v722_v47 = vmul.f32 3.0, %v541_v44  ;;  %v622_v48 = vpop.f32.mrb[7].mxu0  ;;  %v7466_v39 = vld [vmem:[%s11995_s6 + $0x1a] ss:$0 sm:$0xff] }
  0xe5   :  { %v8406_v49 = vpop.eup %8405  ;;  %8423 = vtanh.f32 %v723_v42  ;;  %v724_v50 = vmul.f32 3.0, %v622_v48  ;;  %v7472_v40 = vld [vmem:[%s11995_s6 + $0x1c] ss:$0 sm:$0xff]  ;;  %v7467_v41 = vld [vmem:[%s11995_s6 + $0x1b] ss:$0 sm:$0xff] }
  0xe6   :  { %v8845_v51 = vpop.eup %8407  ;;  %8425 = vtanh.f32 %v725_v46  ;;  %7900 = vmatprep.mubr.msk.f32.mxu0 %vm750_vm1, %v8406_v49  ;;  %v7895_v52 = vpop.f32.mrb[6].mxu1  ;;  %v8361_v53 = vpack.i.bf16 %v8843_v45, %v8406_v49  ;;  %v7473_v42 = vld [vmem:[%s11995_s6 + $0x1d] ss:$0 sm:$0xff]  ;;  %v7475_v43 = vld [vmem:[%s11995_s6 + $0x1f] ss:$0 sm:$0xff] }
  0xe7   :  { %v8410_v54 = vpop.eup %8409  ;;  %8427 = vtanh.f32 %v722_v47  ;;  %v727_v55 = vmul.f32 3.0, %v7895_v52  ;;  %v703_v56 = vpop.f32.mrb[7].mxu1  ;;  %v7474_v44 = vld [vmem:[%s11995_s6 + $0x1e] ss:$0 sm:$0xff]  ;;  %v7496_v46 = vld [vmem:[%s11995_s6 + $0x24] ss:$0 sm:$0xff] }
  0xe8   :  { %v8849_v57 = vpop.eup %8411  ;;  %8429 = vtanh.f32 %v724_v50  ;;  %v726_v58 = vmul.f32 3.0, %v703_v56  ;;  %8362 = vrot.lane.b32.xlu0 %v8361_v53, %s8706_s2  ;;  %7907 = vmatprep.mubr.msk.f32.mxu1 %vm750_vm1, %v8410_v54  ;;  %v8366_v59 = vpack.i.bf16 %v8845_v51, %v8410_v54  ;;  %v7488_v47 = vld [vmem:[%s11995_s6 + $0x20] ss:$0 sm:$0xff]  ;;  %v7497_v48 = vld [vmem:[%s11995_s6 + $0x25] ss:$0 sm:$0xff] }
  0xe9   :  { %v8854_v60 = vpop.eup %8413  ;;  %8431 = vtanh.f32 %v727_v55  ;;  %v7489_v49 = vld [vmem:[%s11995_s6 + $0x21] ss:$0 sm:$0xff]  ;;  %v7490_v50 = vld [vmem:[%s11995_s6 + $0x22] ss:$0 sm:$0xff]  ;;  %v7504_v52 = vld [vmem:[%s11995_s6 + $0x28] ss:$0 sm:$0xff] }
  0xea   :  { %8433 = vtanh.f32 %v726_v58  ;;  %v8371_v61 = vpack.i.bf16 %v8849_v57, %v8854_v60  ;;  %v7505_v53 = vld [vmem:[%s11995_s6 + $0x29] ss:$0 sm:$0xff]  ;;  %v7498_v54 = vld [vmem:[%s11995_s6 + $0x26] ss:$0 sm:$0xff]  ;;  %v7499_v55 = vld [vmem:[%s11995_s6 + $0x27] ss:$0 sm:$0xff] }
  0xeb   :  { %v8858_v62 = vpop.eup %8415  ;;  %v7491_v56 = vld [vmem:[%s11995_s6 + $0x23] ss:$0 sm:$0xff]  ;;  %v7512_v58 = vld [vmem:[%s11995_s6 + $0x2c] ss:$0 sm:$0xff] }
  0xec   :  { %v8860_v63 = vpop.eup %8417  ;;  %8367 = vrot.lane.b32.xlu0 %v8366_v59, %s8706_s2  ;;  %8372 = vrot.lane.b32.xlu1 %v8371_v61, %s8706_s2  ;;  %v7506_v59 = vld [vmem:[%s11995_s6 + $0x2a] ss:$0 sm:$0xff]  ;;  %v7513_v61 = vld [vmem:[%s11995_s6 + $0x2d] ss:$0 sm:$0xff] }
  0xed   :  { %v8864_v0 = vpop.eup %8419 }
  0xee   :  { %v8866_v1 = vpop.eup %8421  ;;  %v8376_v2 = vpack.i.bf16 %v8858_v62, %v8864_v0 }
  0xef   :  { %v8870_v3 = vpop.eup %8423  ;;  %v8381_v4 = vpack.i.bf16 %v8860_v63, %v8866_v1 }
  0xf0   :  { %v8874_v5 = vpop.eup %8425  ;;  %8377 = vrot.lane.b32.xlu1 %v8376_v2, %s8706_s2  ;;  %v7507_v2 = vld [vmem:[%s11995_s6 + $0x2b] ss:$0 sm:$0xff] }
  0xf1   :  { %v8877_v6 = vpop.eup %8427  ;;  %8382 = vrot.lane.b32.xlu0 %v8381_v4, %s8706_s2  ;;  %v7515_v4 = vld [vmem:[%s11995_s6 + $0x2f] ss:$0 sm:$0xff] }
  0xf2   :  { %v8880_v7 = vpop.eup %8429  ;;  %v8386_v8 = vpack.i.bf16 %v8870_v3, %v8877_v6 }
  0xf3   :  { %v8884_v9 = vpop.eup %8431  ;;  %v8391_v10 = vpack.i.bf16 %v8874_v5, %v8880_v7 }
  0xf4   :  { %v8888_v11 = vpop.eup %8433  ;;  %8387 = vrot.lane.b32.xlu1 %v8386_v8, %s8706_s2  ;;  %v7514_v8 = vld [vmem:[%s11995_s6 + $0x2e] ss:$0 sm:$0xff] }
  0xf5   :  { %8392 = vrot.lane.b32.xlu0 %v8391_v10, %s8706_s2  ;;  %v8396_v12 = vpack.i.bf16 %v8884_v9, %v8888_v11  ;;  %v7368_v10 = vld [vmem:[%s11995_s6 + $0x38] ss:$0 sm:$0xff] }
  0xf8   :  { %8397 = vrot.lane.b32.xlu1 %v8396_v12, %s8706_s2  ;;  %v7481_v12 = vld [vmem:[%s11995_s6 + $0x3d] ss:$0 sm:$0xff] }
  0xf9   :  { %2133 = vperm.xlu0 %8401, %v7352_v13  }
  0xfc   :  { %2137 = vperm.xlu1 %8402, %v7353_v14   ;;  %v7369_v14 = vld [vmem:[%s11995_s6 + $0x39] ss:$0 sm:$0xff] }
  0xfd   :  { %2141 = vperm.xlu0 %8401, %v7354_v15  }
 0x100   :  { %2182 = vperm.xlu1 %8402, %v7360_v16  }
 0x101   :  { %2145 = vperm.xlu0 %8401, %v7355_v17  }
 0x104   :  { %2186 = vperm.xlu1 %8402, %v7361_v18  }
 0x105   :  { %2387 = vperm.xlu0 %8401, %v7384_v19   ;;  %v7570_v19 = vld [vmem:[%s11995_s6 + $0x32] ss:$0 sm:$0xff] }
 0x108   :  { %2190 = vperm.xlu1 %8402, %v7362_v20  }
 0x109   :  { %2194 = vperm.xlu0 %8401, %v7363_v21   ;;  %v7370_v21 = vld [vmem:[%s11995_s6 + $0x3a] ss:$0 sm:$0xff] }
 0x10c   :  { %2436 = vperm.xlu1 %8402, %v7392_v22  }
 0x10d   :  { %2440 = vperm.xlu0 %8401, %v7393_v23  }
 0x110   :  { %2391 = vperm.xlu1 %8402, %v7385_v24  }
 0x111   :  { %2395 = vperm.xlu0 %8401, %v7386_v25  }
 0x114   :  { %2493 = vperm.xlu1 %8402, %v7400_v26  }
 0x115   :  { %2497 = vperm.xlu0 %8401, %v7401_v27  }
 0x118   :  { %2444 = vperm.xlu1 %8402, %v7394_v28  }
 0x119   :  { %2448 = vperm.xlu0 %8401, %v7395_v29   ;;  %v7576_v29 = vld [vmem:[%s11995_s6 + $0x34] ss:$0 sm:$0xff] }
 0x11c   :  { %2399 = vperm.xlu1 %8402, %v7387_v30   ;;  %v7371_v30 = vld [vmem:[%s11995_s6 + $0x3b] ss:$0 sm:$0xff] }
 0x11d   :  { %2550 = vperm.xlu0 %8401, %v7408_v31  }
 0x120   :  { %2501 = vperm.xlu1 %8402, %v7402_v32  }
 0x121   :  { %2554 = vperm.xlu0 %8401, %v7409_v33  }
 0x124   :  { %2505 = vperm.xlu1 %8402, %v7403_v34  }
 0x125   :  { %2562 = vperm.xlu0 %8401, %v7411_v35  }
 0x128   :  { %2558 = vperm.xlu1 %8402, %v7410_v36  }
 0x129   :  { %3911 = vperm.xlu0 %8401, %v7465_v37  }
 0x12c   :  { %3907 = vperm.xlu1 %8402, %v7464_v38   ;;  %v7578_v38 = vld [vmem:[%s11995_s6 + $0x36] ss:$0 sm:$0xff] }
 0x12d   :  { %3915 = vperm.xlu0 %8401, %v7466_v39   ;;  %v7376_v39 = vld [vmem:[%s11995_s6 + $0x48] ss:$0 sm:$0xff] }
 0x130   :  { %3956 = vperm.xlu1 %8402, %v7472_v40  }
 0x131   :  { %3919 = vperm.xlu0 %8401, %v7467_v41  }
 0x134   :  { %3960 = vperm.xlu1 %8402, %v7473_v42  }
 0x135   :  { %3968 = vperm.xlu0 %8401, %v7475_v43  }
 0x138   :  { %3964 = vperm.xlu1 %8402, %v7474_v44  }
 0x139   :  { %4247 = vperm.xlu0 %8401, %v7496_v46   ;;  %v7584_v46 = vld [vmem:[%s11995_s6 + $0x40] ss:$0 sm:$0xff] }
 0x13c   :  { %4198 = vperm.xlu1 %8402, %v7488_v47  }
 0x13d   :  { %4251 = vperm.xlu0 %8401, %v7497_v48  }
 0x140   :  { %4202 = vperm.xlu1 %8402, %v7489_v49  }
 0x141   :  { %4206 = vperm.xlu0 %8401, %v7490_v50  }
 0x144   :  { %4304 = vperm.xlu1 %8402, %v7504_v52   ;;  %v7378_v52 = vld [vmem:[%s11995_s6 + $0x4a] ss:$0 sm:$0xff] }
 0x145   :  { %4308 = vperm.xlu0 %8401, %v7505_v53  }
 0x148   :  { %4255 = vperm.xlu1 %8402, %v7498_v54  }
 0x149   :  { %4259 = vperm.xlu0 %8401, %v7499_v55  }
 0x14c   :  { %4210 = vperm.xlu1 %8402, %v7491_v56  }
 0x14d   :  { %4361 = vperm.xlu0 %8401, %v7512_v58  }
 0x150   :  { %4312 = vperm.xlu1 %8402, %v7506_v59  }
 0x151   :  { %4365 = vperm.xlu0 %8401, %v7513_v61  }
 0x154   :  { %4316 = vperm.xlu1 %8402, %v7507_v2  }
 0x155   :  { %4373 = vperm.xlu0 %8401, %v7515_v4  }
 0x158   :  { %4369 = vperm.xlu1 %8402, %v7514_v8   ;;  %v7568_v8 = vld [vmem:[%s11995_s6 + $0x30] ss:$0 sm:$0xff] }
 0x159   :  { %2231 = vperm.xlu0 %8401, %v7368_v10   ;;  %v7610_v10 = vld [vmem:[%s11995_s6 + $0x52] ss:$0 sm:$0xff] }
 0x15a   :  { %v8363_v13 = vpop.permute.xlu0 %8362 }
 0x15b   :  { %v8365_v15 = vunpack.i.h.bf16 %v8363_v13  ;;  %v8364_v16 = vunpack.i.l.bf16 %v8363_v13  ;;  %v7569_v13 = vld [vmem:[%s11995_s6 + $0x31] ss:$0 sm:$0xff] }
 0x15c   :  { %4089 = vperm.xlu1 %8402, %v7481_v12  }
 0x15d   :  { %v8176_v18 = vpack.c.bf16 %v8365_v15, %v8364_v16  ;;  %2235 = vperm.xlu0 %8401, %v7369_v14   ;;  %v7571_v16 = vld [vmem:[%s11995_s6 + $0x33] ss:$0 sm:$0xff] }
 0x15e   :  { %v8368_v20 = vpop.permute.xlu0 %8367  ;;  %v8373_v22 = vpop.permute.xlu1 %8372 }
 0x15f   :  { %v8370_v23 = vunpack.i.h.bf16 %v8368_v20  ;;  %v8369_v24 = vunpack.i.l.bf16 %v8368_v20  ;;  %8178 = vmatprep.subr.msk.bf16.mxu0 %vm9050_vm2, %v8176_v18  ;;  %v8375_v25 = vunpack.i.h.bf16 %v8373_v22  ;;  %v8374_v26 = vunpack.i.l.bf16 %v8373_v22  ;;  %v7577_v20 = vld [vmem:[%s11995_s6 + $0x35] ss:$0 sm:$0xff]  ;;  %v7624_v22 = vld [vmem:[%s11995_s6 + $0x58] ss:$0 sm:$0xff] }
 0x160   :  { %8181 = vmatpush3.bf16.xpose.msk.msra.mxu0 %vm9050_vm2, %v8176_v18  ;;  %5698 = vperm.xlu1 %8402, %v7570_v19   ;;  %v7618_v18 = vld [vmem:[%s11995_s6 + $0x56] ss:$0 sm:$0xff] }
 0x161   :  { %v8182_v27 = vpack.c.bf16 %v8370_v23, %v8369_v24  ;;  %2239 = vperm.xlu0 %8401, %v7370_v21   ;;  %v8188_v28 = vpack.c.bf16 %v8375_v25, %v8374_v26  ;;  %v7579_v24 = vld [vmem:[%s11995_s6 + $0x37] ss:$0 sm:$0xff]  ;;  %v7626_v26 = vld [vmem:[%s11995_s6 + $0x5a] ss:$0 sm:$0xff] }
 0x162   :  { %v8378_v31 = vpop.permute.xlu1 %8377 }
 0x163   :  { %8184 = vmatprep.subr.msk.bf16.mxu1 %vm9050_vm2, %v8182_v27  ;;  %v8380_v32 = vunpack.i.h.bf16 %v8378_v31  ;;  %v8379_v33 = vunpack.i.l.bf16 %v8378_v31  ;;  %8190 = vmatprep.subr.msk.bf16.mxu0 %vm9050_vm2, %v8188_v28  ;;  %v8383_v34 = vpop.permute.xlu0 %8382  ;;  %v36_v31 = vld [vmem:[%s11990_s1 + $0x8] sm:$0xff] }
 0x164   :  { %8187 = vmatpush3.bf16.xpose.msk.msra.mxu1 %vm9050_vm2, %v8182_v27  ;;  %5739 = vperm.xlu1 %8402, %v7576_v29   ;;  %v8385_v35 = vunpack.i.h.bf16 %v8383_v34  ;;  %v8384_v36 = vunpack.i.l.bf16 %v8383_v34  ;;  %v40_v34 = vld [vmem:[%s11990_s1 + $0x28] sm:$0xff] }
 0x165   :  { %2243 = vperm.xlu0 %8401, %v7371_v30   ;;  %v8194_v37 = vpack.c.bf16 %v8380_v32, %v8379_v33  ;;  %v7632_v30 = vld [vmem:[%s11995_s6 + $0x5c] ss:$0 sm:$0xff]  ;;  %v7587_v33 = vld [vmem:[%s11995_s6 + $0x43] ss:$0 sm:$0xff] }
 0x166   :  { %v8200_v40 = vpack.c.bf16 %v8385_v35, %v8384_v36  ;;  %v8388_v41 = vpop.permute.xlu1 %8387  ;;  %v7634_v36 = vld [vmem:[%s11995_s6 + $0x5e] ss:$0 sm:$0xff] }
 0x167   :  { %7901 = vmatmul.mubr.msk.f32.vlgmr.msra.gmra.mrb[8].mxu0 %vm750_vm1, %v8843_v45  ;;  %8196 = vmatprep.subr.msk.bf16.mxu1 %vm9050_vm2, %v8194_v37  ;;  %v8390_v42 = vunpack.i.h.bf16 %v8388_v41  ;;  %v8389_v43 = vunpack.i.l.bf16 %v8388_v41  ;;  %v8393_v44 = vpop.permute.xlu0 %8392  ;;  %v7377_v45 = vld [vmem:[%s11995_s6 + $0x49] ss:$0 sm:$0xff] }
 0x168   :  { %5747 = vperm.xlu1 %8402, %v7578_v38   ;;  %8193 = vmatpush3.bf16.xpose.msk.msra.mxu0 %vm9050_vm2, %v8188_v28  ;;  %v8395_v48 = vunpack.i.h.bf16 %v8393_v44  ;;  %v8394_v49 = vunpack.i.l.bf16 %v8393_v44  ;;  %v7585_v28 = vld [vmem:[%s11995_s6 + $0x41] ss:$0 sm:$0xff] }
 0x169   :  { %7914 = vmatprep.mubr.msk.f32.mxu0 %vm750_vm1, %v8854_v60  ;;  %2280 = vperm.xlu0 %8401, %v7376_v39   ;;  %v8206_v47 = vpack.c.bf16 %v8390_v42, %v8389_v43  ;;  %v7586_v60 = vld [vmem:[%s11995_s6 + $0x42] ss:$0 sm:$0xff]  ;;  %v7640_v42 = vld [vmem:[%s11995_s6 + $0x60] ss:$0 sm:$0xff] }
 0x16a   :  { %8202 = vmatprep.subr.msk.bf16.mxu0 %vm9050_vm2, %v8200_v40  ;;  %v8398_v50 = vpop.permute.xlu1 %8397 }
 0x16b   :  { %7908 = vmatmul.mubr.msk.f32.vlgmr.msra.gmra.mrb[8].mxu1 %vm750_vm1, %v8845_v51  ;;  %v8212_v51 = vpack.c.bf16 %v8395_v48, %v8394_v49  ;;  %v8400_v53 = vunpack.i.h.bf16 %v8398_v50  ;;  %v8399_v54 = vunpack.i.l.bf16 %v8398_v50  ;;  %v7642_v48 = vld [vmem:[%s11995_s6 + $0x62] ss:$0 sm:$0xff] }
 0x16c   :  { %7921 = vmatprep.mubr.msk.f32.mxu1 %vm750_vm1, %v8864_v0  ;;  %5868 = vperm.xlu1 %8402, %v7584_v46   ;;  %v7592_v0 = vld [vmem:[%s11995_s6 + $0x44] ss:$0 sm:$0xff] }
 0x16d   :  { %8199 = vmatpush3.bf16.xpose.msk.msra.mxu1 %vm9050_vm2, %v8194_v37  ;;  %2284 = vperm.xlu0 %8401, %v7377_v45   ;;  %v8218_v55 = vpack.c.bf16 %v8400_v53, %v8399_v54  ;;  %v7595_v45 = vld [vmem:[%s11995_s6 + $0x47] ss:$0 sm:$0xff] }
 0x16e   :  { %8208 = vmatprep.subr.msk.bf16.mxu1 %vm9050_vm2, %v8206_v47  ;;  %v39_v54 = vld [vmem:[%s11990_s1 + $0x20] sm:$0xff] }
 0x16f   :  { %7915 = vmatmul.mubr.msk.f32.vlgmr.msra.gmra.mrb[10].mxu0 %vm750_vm1, %v8849_v57  ;;  %v7379_v57 = vld [vmem:[%s11995_s6 + $0x4b] ss:$0 sm:$0xff] }
 0x170   :  { %5876 = vperm.xlu1 %8402, %v7586_v60   ;;  %8205 = vmatpush3.bf16.xpose.msk.msra.mxu0 %vm9050_vm2, %v8200_v40  ;;  %v7593_v40 = vld [vmem:[%s11995_s6 + $0x45] ss:$0 sm:$0xff] }
 0x171   :  { %7928 = vmatprep.mubr.msk.f32.mxu0 %vm750_vm1, %v8866_v1  ;;  %2288 = vperm.xlu0 %8401, %v7378_v52   ;;  %v7594_v1 = vld [vmem:[%s11995_s6 + $0x46] ss:$0 sm:$0xff]  ;;  %v7601_v52 = vld [vmem:[%s11995_s6 + $0x4d] ss:$0 sm:$0xff] }
 0x172   :  { %8214 = vmatprep.subr.msk.bf16.mxu0 %vm9050_vm2, %v8212_v51 }
 0x174   :  { %7922 = vmatmul.mubr.msk.f32.vlgmr.msra.gmra.mrb[10].mxu1 %vm750_vm1, %v8858_v62  ;;  %5925 = vperm.xlu1 %8402, %v7592_v0   ;;  %v7480_v62 = vld [vmem:[%s11995_s6 + $0x3c] ss:$0 sm:$0xff]  ;;  %v7660_v0 = vld [vmem:[%s11995_s6 + $0x6c] ss:$0 sm:$0xff] }
 0x175   :  { %8211 = vmatpush3.bf16.xpose.msk.msra.mxu1 %vm9050_vm2, %v8206_v47  ;;  %7935 = vmatprep.mubr.msk.f32.mxu1 %vm750_vm1, %v8877_v6  ;;  %v7600_v6 = vld [vmem:[%s11995_s6 + $0x4c] ss:$0 sm:$0xff] }
 0x176   :  { %2292 = vperm.xlu0 %8401, %v7379_v57   ;;  %8220 = vmatprep.subr.msk.bf16.mxu1 %vm9050_vm2, %v8218_v55 }
 0x177   :  { %7929 = vmatmul.mubr.msk.f32.vlgmr.msra.gmra.mrb[12].mxu0 %vm750_vm1, %v8860_v63  ;;  %v7482_v63 = vld [vmem:[%s11995_s6 + $0x3e] ss:$0 sm:$0xff] }
 0x178   :  { %v9142_v56 = vpop.permute.xlu0 %2133  ;;  %5933 = vperm.xlu1 %8402, %v7594_v1   ;;  %8217 = vmatpush3.bf16.xpose.msk.msra.mxu0 %vm9050_vm2, %v8212_v51  ;;  %v35_v51 = vld [vmem:[%s11990_s1] sm:$0xff] }
 0x179   :  { %7942 = vmatprep.mubr.msk.f32.mxu0 %vm750_vm1, %v8880_v7  ;;  %v7602_v7 = vld [vmem:[%s11995_s6 + $0x4e] ss:$0 sm:$0xff]  ;;  %v2148_v1 = vmul.f32 %v9142_v56, %v35_v51 }
 0x17a   :  { %4085 = vperm.xlu0 %8401, %v7480_v62  }
 0x17b   :  { %v2138_v58 = vpop.permute.xlu1 %2137 }
 0x17c   :  { %7936 = vmatmul.mubr.msk.f32.vlgmr.msra.gmra.mrb[12].mxu1 %vm750_vm1, %v8870_v3  ;;  %v9156_v59 = vpop.permute.xlu0 %2141  ;;  %6054 = vperm.xlu1 %8402, %v7600_v6   ;;  %v7483_v3 = vld [vmem:[%s11995_s6 + $0x3f] ss:$0 sm:$0xff]  ;;  %v2149_v37 = vmul.f32 %v2138_v58, %v36_v31  ;;  %v2153_v38 = vmul.f32 %v2138_v58, %v40_v34 }
 0x17d   :  { %8223 = vmatpush3.bf16.xpose.msk.msra.mxu1 %vm9050_vm2, %v8218_v55  ;;  %7949 = vmatprep.mubr.msk.f32.mxu1 %vm750_vm1, %v8888_v11  ;;  %v7608_v11 = vld [vmem:[%s11995_s6 + $0x50] ss:$0 sm:$0xff] }
 0x17e   :  { %4093 = vperm.xlu0 %8401, %v7482_v63   ;;  %v7603_v63 = vld [vmem:[%s11995_s6 + $0x4f] ss:$0 sm:$0xff] }
 0x17f   :  { %v9165_v61 = vpop.permute.xlu1 %2182  ;;  %7943 = vmatmul.mubr.msk.f32.vlgmr.msra.gmra.mrb[14].mxu0 %vm750_vm1, %v8874_v5 }
 0x180   :  { %v9172_v2 = vpop.permute.xlu0 %2145  ;;  %6062 = vperm.xlu1 %8402, %v7602_v7   ;;  %v2152_v7 = vmul.f32 %v9142_v56, %v39_v54 }
 0x182   :  { %4097 = vperm.xlu0 %8401, %v7483_v3  }
 0x183   :  { %v2187_v4 = vpop.permute.xlu1 %2186 }
 0x184   :  { %7950 = vmatmul.mubr.msk.f32.vlgmr.msra.gmra.mrb[14].mxu1 %vm750_vm1, %v8884_v9  ;;  %v9182_v5 = vpop.permute.xlu0 %2387  ;;  %6103 = vperm.xlu1 %8402, %v7608_v11   ;;  %v7616_v9 = vld [vmem:[%s11995_s6 + $0x54] ss:$0 sm:$0xff]  ;;  %v9263_v43 = vadd.f32 %v2187_v4, %v2149_v37  ;;  %v9265_v44 = vadd.f32 %v2187_v4, %v2153_v38 }
 0x186   :  { %5690 = vperm.xlu0 %8401, %v7568_v8   ;;  %12116 = vst [vmem:[#allocation6_spill] sm:$0xff] %v9263_v43  ;;  %12117 = vst [vmem:[#allocation7_spill] sm:$0xff] %v9265_v44  ;;  %v2312_v49 = vrot.slane %v9263_v43, 7  ;;  %v2316_v50 = vrot.slane %v9265_v44, 7  ;;  %v2337_v57 = vrot.slane %v9263_v43, 1  ;;  %v2341_v6 = vrot.slane %v9265_v44, 1 }
 0x187   :  { %v9187_v12 = vpop.permute.xlu1 %2190  ;;  %v7662_v8 = vld [vmem:[%s11995_s6 + $0x6e] ss:$0 sm:$0xff] }
 0x188   :  { %v9192_v14 = vpop.permute.xlu0 %2194  ;;  %6111 = vperm.xlu1 %8402, %v7610_v10   ;;  %v2329_v55 = vsel %vm2327_vm3, 0.0, %v2312_v49  ;;  %v2333_v62 = vsel %vm2327_vm3, 0.0, %v2316_v50  ;;  %v37_v10 = vld [vmem:[%s11990_s1 + $0x10] sm:$0xff] }
 0x18a   :  { %5694 = vperm.xlu0 %8401, %v7569_v13  }
 0x18b   :  { %v9197_v15 = vpop.permute.xlu1 %2436 }
 0x18c   :  { %v9202_v17 = vpop.permute.xlu0 %2440  ;;  %6224 = vperm.xlu1 %8402, %v7616_v9   ;;  %v2354_v9 = vsel %vm12090_vm4, %v2337_v57, 0.0 }
 0x18d   :  { %v2452_v11 = vmul.f32 %v9202_v17, %v9263_v43  ;;  %v2456_v13 = vmul.f32 %v9202_v17, %v9265_v44  ;;  %v7609_v17 = vld [vmem:[%s11995_s6 + $0x51] ss:$0 sm:$0xff] }
 0x18e   :  { %5702 = vperm.xlu0 %8401, %v7571_v16   ;;  %v41_v16 = vld [vmem:[%s11990_s1 + $0x30] sm:$0xff] }
 0x18f   :  { %v9207_v19 = vpop.permute.xlu1 %2391  ;;  %v2154_v34 = vmul.f32 %v9156_v59, %v41_v16 }
 0x190   :  { %v9212_v21 = vpop.permute.xlu0 %2395  ;;  %6232 = vperm.xlu1 %8402, %v7618_v18   ;;  %v2403_v4 = vmul.f32 %v9207_v19, %v2329_v55  ;;  %v2407_v56 = vmul.f32 %v9207_v19, %v2333_v62  ;;  %v9325_v18 = vadd.f32 %v9165_v61, %v2148_v1  ;;  %v9334_v19 = vadd.f32 %v9165_v61, %v2152_v7  ;;  %v42_v61 = vld [vmem:[%s11990_s1 + $0x38] sm:$0xff] }
 0x191   :  { %v2155_v49 = vmul.f32 %v9172_v2, %v42_v61  ;;  %v9369_v51 = vadd.f32 %v9187_v12, %v2154_v34  ;;  %v7678_v34 = vld [vmem:[%s11995_s6 + $0x76] ss:$0 sm:$0xff] }
 0x192   :  { %5743 = vperm.xlu0 %8401, %v7577_v20   ;;  %12121 = vst [vmem:[#allocation11_spill] sm:$0xff] %v9325_v18  ;;  %v2358_v20 = vsel %vm12090_vm4, %v2341_v6, 0.0  ;;  %12123 = vst [vmem:[#allocation13_spill] sm:$0xff] %v9334_v19  ;;  %v2311_v38 = vrot.slane %v9325_v18, 7  ;;  %v2336_v55 = vrot.slane %v9325_v18, 1 }
 0x193   :  { %v9217_v23 = vpop.permute.xlu1 %2493  ;;  %12128 = vst [vmem:[#allocation18_spill] sm:$0xff] %v9369_v51 }
 0x194   :  { %v9222_v25 = vpop.permute.xlu0 %2497  ;;  %6273 = vperm.xlu1 %8402, %v7624_v22   ;;  %v2353_v16 = vsel %vm12090_vm4, %v2336_v55, 0.0 }
 0x195   :  { %v2509_v31 = vmul.f32 %v9222_v25, %v2354_v9  ;;  %v2513_v37 = vmul.f32 %v9222_v25, %v2358_v20  ;;  %v2455_v9 = vmul.f32 %v9197_v15, %v9334_v19 }
 0x196   :  { %5751 = vperm.xlu0 %8401, %v7579_v24  }
 0x197   :  { %v9227_v27 = vpop.permute.xlu1 %2444 }
 0x198   :  { %v9232_v29 = vpop.permute.xlu0 %2448  ;;  %6281 = vperm.xlu1 %8402, %v7626_v26   ;;  %v2150_v26 = vmul.f32 %v9156_v59, %v37_v10  ;;  %v2315_v59 = vrot.slane %v9334_v19, 7  ;;  %v2451_v10 = vmul.f32 %v9197_v15, %v9325_v18 }
 0x19a   :  { %5872 = vperm.xlu0 %8401, %v7585_v28   ;;  %v38_v28 = vld [vmem:[%s11990_s1 + $0x18] sm:$0xff]  ;;  %v9363_v25 = vadd.f32 %v9187_v12, %v2150_v26  ;;  %v2332_v1 = vsel %vm2327_vm3, 0.0, %v2315_v59  ;;  %v2340_v12 = vrot.slane %v9334_v19, 1 }
 0x19b   :  { %v9240_v32 = vpop.permute.xlu1 %2399 }
 0x19c   :  { %v9248_v35 = vpop.permute.xlu0 %2550  ;;  %6330 = vperm.xlu1 %8402, %v7632_v30   ;;  %v2460_v30 = vadd.f32 %v2452_v11, %v2403_v4  ;;  %12127 = vst [vmem:[#allocation17_spill] sm:$0xff] %v9363_v25  ;;  %v2313_v7 = vrot.slane %v9363_v25, 7  ;;  %v7676_v4 = vld [vmem:[%s11995_s6 + $0x74] ss:$0 sm:$0xff]  ;;  %v2357_v26 = vsel %vm12090_vm4, %v2340_v12, 0.0 }
 0x19e   :  { %5880 = vperm.xlu0 %8401, %v7587_v33   ;;  %v7668_v33 = vld [vmem:[%s11995_s6 + $0x70] ss:$0 sm:$0xff]  ;;  %v2517_v50 = vadd.f32 %v2509_v31, %v2460_v30  ;;  %v2342_v31 = vrot.slane %v9369_v51, 1 }
 0x19f   :  { %v9253_v39 = vpop.permute.xlu1 %2501 }
 0x1a0   :  { %v9258_v41 = vpop.permute.xlu0 %2554  ;;  %6338 = vperm.xlu1 %8402, %v7634_v36   ;;  %v2464_v36 = vadd.f32 %v2456_v13, %v2407_v56  ;;  %v2317_v13 = vrot.slane %v9369_v51, 7 }
 0x1a1   :  { %v9390_v11 = vadd.f32 %v9258_v41, %v2517_v50  ;;  %v7625_v50 = vld [vmem:[%s11995_s6 + $0x59] ss:$0 sm:$0xff] }
 0x1a2   :  { %5929 = vperm.xlu0 %8401, %v7593_v40   ;;  %v2521_v54 = vadd.f32 %v2513_v37, %v2464_v36  ;;  %v2334_v36 = vsel %vm2327_vm3, 0.0, %v2317_v13  ;;  %v2508_v37 = vmul.f32 %v9217_v23, %v2353_v16  ;;  %v2359_v13 = vsel %vm12090_vm4, %v2342_v31, 0.0 }
 0x1a3   :  { %v9267_v46 = vpop.permute.xlu1 %2505 }
 0x1a4   :  { %v9272_v47 = vpop.permute.xlu0 %2562  ;;  %6387 = vperm.xlu1 %8402, %v7640_v42   ;;  %v7611_v42 = vld [vmem:[%s11995_s6 + $0x53] ss:$0 sm:$0xff]  ;;  %v9400_v56 = vadd.f32 %v9258_v41, %v2521_v54  ;;  %v2338_v41 = vrot.slane %v9363_v25, 1  ;;  %v2453_v54 = vmul.f32 %v9227_v27, %v9363_v25 }
 0x1a6   :  { %5937 = vperm.xlu0 %8401, %v7595_v45   ;;  %v2151_v45 = vmul.f32 %v9172_v2, %v38_v28  ;;  %v7617_v2 = vld [vmem:[%s11995_s6 + $0x55] ss:$0 sm:$0xff]  ;;  %v2355_v12 = vsel %vm12090_vm4, %v2338_v41, 0.0 }
 0x1a7   :  { %v9279_v60 = vpop.permute.xlu1 %2558 }
 0x1a8   :  { %v9287_v53 = vpop.permute.xlu0 %3911  ;;  %6395 = vperm.xlu1 %8402, %v7642_v48   ;;  %v9380_v62 = vadd.f32 %v9192_v14, %v2151_v45  ;;  %v2512_v45 = vmul.f32 %v9217_v23, %v2357_v26  ;;  %v2408_v23 = vmul.f32 %v9212_v21, %v2334_v36  ;;  %v7686_v36 = vld [vmem:[%s11995_s6 + $0x7a] ss:$0 sm:$0xff] }
 0x1a9   :  { %12118 = vst [vmem:[#allocation8_spill] sm:$0xff] %v9287_v53 }
 0x1aa   :  { %6058 = vperm.xlu0 %8401, %v7601_v52   ;;  %v7670_v52 = vld [vmem:[%s11995_s6 + $0x72] ss:$0 sm:$0xff]  ;;  %12130 = vst [vmem:[#allocation20_spill] sm:$0xff] %v9380_v62  ;;  %v2314_v28 = vrot.slane %v9380_v62, 7  ;;  %v2339_v59 = vrot.slane %v9380_v62, 1 }
 0x1ab   :  { %v9300_v58 = vpop.permute.xlu1 %3907 }
 0x1ac   :  { %12119 = vst [vmem:[#allocation9_spill] sm:$0xff] %v9300_v58  ;;  %v9306_v3 = vpop.permute.xlu0 %3915  ;;  %6782 = vperm.xlu1 %8402, %v7660_v0   ;;  %v2328_v0 = vsel %vm2327_vm3, 0.0, %v2311_v38  ;;  %v2578_v38 = vmul.f32 %v9400_v56, %v9400_v56 }
 0x1ad   :  { %12120 = vst [vmem:[#allocation10_spill] sm:$0xff] %v9306_v3 }
 0x1ae   :  { %6066 = vperm.xlu0 %8401, %v7603_v63   ;;  %v9386_v63 = vadd.f32 %v9192_v14, %v2155_v49  ;;  %v2406_v14 = vmul.f32 %v9182_v5, %v2332_v1  ;;  %v2457_v1 = vmul.f32 %v9227_v27, %v9369_v51 }
 0x1af   :  { %v9328_v22 = vpop.permute.xlu1 %3956 }
 0x1b0   :  { %12122 = vst [vmem:[#allocation12_spill] sm:$0xff] %v9328_v22  ;;  %v9336_v24 = vpop.permute.xlu0 %3919  ;;  %6790 = vperm.xlu1 %8402, %v7662_v8   ;;  %12132 = vst [vmem:[#allocation22_spill] sm:$0xff] %v9386_v63  ;;  %v2402_v8 = vmul.f32 %v9182_v5, %v2328_v0  ;;  %v2330_v5 = vsel %vm2327_vm3, 0.0, %v2313_v7  ;;  %v2318_v15 = vrot.slane %v9386_v63, 7  ;;  %v2331_v0 = vsel %vm2327_vm3, 0.0, %v2314_v28 }
 0x1b1   :  { %12124 = vst [vmem:[#allocation14_spill] sm:$0xff] %v9336_v24  ;;  %v2343_v55 = vrot.slane %v9386_v63, 1  ;;  %v2458_v28 = vmul.f32 %v9232_v29, %v9386_v63  ;;  %v2405_v41 = vmul.f32 %v9240_v32, %v2331_v0  ;;  %v2465_v31 = vadd.f32 %v2457_v1, %v2408_v23  ;;  %v7648_v23 = vld [vmem:[%s11995_s6 + $0x64] ss:$0 sm:$0xff] }
 0x1b2   :  { %6107 = vperm.xlu0 %8401, %v7609_v17   ;;  %v7619_v17 = vld [vmem:[%s11995_s6 + $0x57] ss:$0 sm:$0xff]  ;;  %v2459_v61 = vadd.f32 %v2451_v10, %v2402_v8  ;;  %v2335_v8 = vsel %vm2327_vm3, 0.0, %v2318_v15 }
 0x1b3   :  { %v9352_v40 = vpop.permute.xlu1 %3960 }
 0x1b4   :  { %12125 = vst [vmem:[#allocation15_spill] sm:$0xff] %v9352_v40  ;;  %v9359_v48 = vpop.permute.xlu0 %3968  ;;  %6831 = vperm.xlu1 %8402, %v7668_v33   ;;  %v2574_v33 = vmul.f32 %v9390_v11, %v9390_v11  ;;  %v2516_v10 = vadd.f32 %v2508_v37, %v2459_v61 }
 0x1b5   :  { %12126 = vst [vmem:[#allocation16_spill] sm:$0xff] %v9359_v48 }
 0x1b6   :  { %6115 = vperm.xlu0 %8401, %v7611_v42   ;;  %v2463_v42 = vadd.f32 %v2455_v9, %v2406_v14  ;;  %v2582_v7 = vmul.f32 %v2574_v33, %v9390_v11  ;;  %v2586_v14 = vmul.f32 %v2578_v38, %v9400_v56  ;;  %v2356_v9 = vsel %vm12090_vm4, %v2339_v59, 0.0 }
 0x1b7   :  { %v9373_v57 = vpop.permute.xlu1 %3964  ;;  %v2409_v33 = vmul.f32 %v9240_v32, %v2335_v8  ;;  %v9473_v37 = vadd.f32 %v9248_v35, %v2516_v10  ;;  %v2360_v38 = vsel %vm12090_vm4, %v2343_v55, 0.0  ;;  %v7633_v32 = vld [vmem:[%s11995_s6 + $0x5d] ss:$0 sm:$0xff]  ;;  %v2511_v59 = vmul.f32 %v9267_v46, %v2356_v9 }
 0x1b8   :  { %12129 = vst [vmem:[#allocation19_spill] sm:$0xff] %v9373_v57  ;;  %v9383_v6 = vpop.permute.xlu0 %4247  ;;  %6839 = vperm.xlu1 %8402, %v7670_v52   ;;  %v2404_v52 = vmul.f32 %v9212_v21, %v2330_v5  ;;  %v2454_v21 = vmul.f32 %v9232_v29, %v9380_v62  ;;  %v2520_v27 = vadd.f32 %v2512_v45, %v2463_v42  ;;  %v2590_v61 = vmul.f32 0.044715, %v2582_v7 }
 0x1b9   :  { %12131 = vst [vmem:[#allocation21_spill] sm:$0xff] %v9383_v6  ;;  %v2510_v5 = vmul.f32 %v9253_v39, %v2355_v12  ;;  %v2594_v29 = vmul.f32 0.044715, %v2586_v14  ;;  %v2515_v55 = vmul.f32 %v9267_v46, %v2360_v38  ;;  %v2573_v1 = vmul.f32 %v9473_v37, %v9473_v37  ;;  %v7635_v46 = vld [vmem:[%s11995_s6 + $0x5f] ss:$0 sm:$0xff] }
 0x1ba   :  { %6228 = vperm.xlu0 %8401, %v7617_v2   ;;  %v2461_v26 = vadd.f32 %v2453_v54, %v2404_v52  ;;  %v9477_v42 = vadd.f32 %v9248_v35, %v2520_v27  ;;  %v2466_v54 = vadd.f32 %v2458_v28, %v2409_v33  ;;  %v2598_v0 = vadd.f32 %v2590_v61, %v9390_v11  ;;  %v7650_v27 = vld [vmem:[%s11995_s6 + $0x66] ss:$0 sm:$0xff] }
 0x1bb   :  { %v9406_v20 = vpop.permute.xlu1 %4198  ;;  %v2602_v12 = vadd.f32 %v2594_v29, %v9400_v56 }
 0x1bc   :  { %12133 = vst [vmem:[#allocation23_spill] sm:$0xff] %v9406_v20  ;;  %v9414_v30 = vpop.permute.xlu0 %4251  ;;  %6888 = vperm.xlu1 %8402, %v7676_v4   ;;  %v7684_v4 = vld [vmem:[%s11995_s6 + $0x78] ss:$0 sm:$0xff]  ;;  %v2577_v7 = vmul.f32 %v9477_v42, %v9477_v42  ;;  %v2523_v14 = vadd.f32 %v2515_v55, %v2466_v54  ;;  %v2606_v9 = vmul.f32 0.7978846, %v2598_v0  ;;  %v7690_v55 = vld [vmem:[%s11996_s7 + $0x30] sm:$0xff] }
 0x1bd   :  { %12134 = vst [vmem:[#allocation24_spill] sm:$0xff] %v9414_v30 }
 0x1be   :  { %6236 = vperm.xlu0 %8401, %v7619_v17   ;;  %v7627_v17 = vld [vmem:[%s11995_s6 + $0x5b] ss:$0 sm:$0xff]  ;;  %v2585_v28 = vmul.f32 %v2577_v7, %v9477_v42  ;;  %8435 = vtanh.f32 %v2606_v9  ;;  %v7692_v9 = vld [vmem:[%s11995_s6 + $0x7c] sm:$0x1] }
 0x1bf   :  { %v9430_v49 = vpop.permute.xlu1 %4202 }
 0x1c0   :  { %12135 = vst [vmem:[#allocation25_spill] sm:$0xff] %v9430_v49  ;;  %v9440_v2 = vpop.permute.xlu0 %4206  ;;  %6896 = vperm.xlu1 %8402, %v7678_v34   ;;  %v2514_v34 = vmul.f32 %v9253_v39, %v2359_v13  ;;  %v2462_v39 = vadd.f32 %v2454_v21, %v2405_v41  ;;  %v2593_v38 = vmul.f32 0.044715, %v2585_v28 }
 0x1c1   :  { %12136 = vst [vmem:[#allocation26_spill] sm:$0xff] %v9440_v2 }
 0x1c2   :  { %6277 = vperm.xlu0 %8401, %v7625_v50   ;;  %v2518_v50 = vadd.f32 %v2510_v5, %v2461_v26  ;;  %v2522_v35 = vadd.f32 %v2514_v34, %v2465_v31  ;;  %v2519_v8 = vadd.f32 %v2511_v59, %v2462_v39  ;;  %v2610_v26 = vmul.f32 0.7978846, %v2602_v12  ;;  %v7641_v5 = vld [vmem:[%s11995_s6 + $0x61] ss:$0 sm:$0xff]  ;;  %v7643_v39 = vld [vmem:[%s11995_s6 + $0x63] ss:$0 sm:$0xff] }
 0x1c3   :  { %v9456_v16 = vpop.permute.xlu1 %4304  ;;  %v9528_v34 = vadd.f32 %v9272_v47, %v2523_v14  ;;  %v7661_v12 = vld [vmem:[%s11995_s6 + $0x6d] ss:$0 sm:$0xff] }
 0x1c4   :  { %12137 = vst [vmem:[#allocation27_spill] sm:$0xff] %v9456_v16  ;;  %v9465_v15 = vpop.permute.xlu0 %4308  ;;  %6945 = vperm.xlu1 %8402, %v7684_v4   ;;  %v9503_v10 = vadd.f32 %v9279_v60, %v2518_v50  ;;  %v9508_v21 = vadd.f32 %v9279_v60, %v2522_v35  ;;  %v9521_v60 = vadd.f32 %v9272_v47, %v2519_v8  ;;  %8437 = vtanh.f32 %v2610_v26 }
 0x1c5   :  { %12138 = vst [vmem:[#allocation28_spill] sm:$0xff] %v9465_v15  ;;  %v2580_v54 = vmul.f32 %v9528_v34, %v9528_v34 }
 0x1c6   :  { %6285 = vperm.xlu0 %8401, %v7627_v17   ;;  %v2581_v17 = vmul.f32 %v2573_v1, %v9473_v37  ;;  %v2575_v31 = vmul.f32 %v9503_v10, %v9503_v10  ;;  %v2579_v61 = vmul.f32 %v9508_v21, %v9508_v21  ;;  %v2576_v47 = vmul.f32 %v9521_v60, %v9521_v60 }
 0x1c7   :  { %v9479_v45 = vpop.permute.xlu1 %4255  ;;  %v2588_v14 = vmul.f32 %v2580_v54, %v9528_v34 }
 0x1c8   :  { %12139 = vst [vmem:[#allocation29_spill] sm:$0xff] %v9479_v45  ;;  %v9485_v52 = vpop.permute.xlu0 %4259  ;;  %6953 = vperm.xlu1 %8402, %v7686_v36   ;;  %v7688_v36 = vld [vmem:[%s11996_s7 + $0x20] sm:$0xff]  ;;  %v2589_v29 = vmul.f32 0.044715, %v2581_v17  ;;  %v2583_v59 = vmul.f32 %v2575_v31, %v9503_v10  ;;  %v2587_v0 = vmul.f32 %v2579_v61, %v9508_v21  ;;  %v2584_v7 = vmul.f32 %v2576_v47, %v9521_v60  ;;  %v8436_v26 = vpop.eup %8435 }
 0x1c9   :  { %12140 = vst [vmem:[#allocation30_spill] sm:$0xff] %v9485_v52 }
 0x1ca   :  { %6334 = vperm.xlu0 %8401, %v7633_v32   ;;  %v2597_v35 = vadd.f32 %v2589_v29, %v9473_v37 }
 0x1cb   :  { %v9497_v4 = vpop.permute.xlu1 %4210 }
 0x1cc   :  { %12141 = vst [vmem:[#allocation31_spill] sm:$0xff] %v9497_v4  ;;  %v9505_v13 = vpop.permute.xlu0 %4361  ;;  %6452 = vperm.xlu1 %8402, %v7648_v23   ;;  %v2601_v23 = vadd.f32 %v2593_v38, %v9477_v42  ;;  %v2605_v17 = vmul.f32 0.7978846, %v2597_v35 }
 0x1cd   :  { %12142 = vst [vmem:[#allocation32_spill] sm:$0xff] %v9505_v13 }
 0x1ce   :  { %6342 = vperm.xlu0 %8401, %v7635_v46   ;;  %v2591_v46 = vmul.f32 0.044715, %v2583_v59  ;;  %v2609_v31 = vmul.f32 0.7978846, %v2601_v23  ;;  %v8438_v61 = vpop.eup %8437  ;;  %8439 = vtanh.f32 %v2605_v17  ;;  %v2622_v59 = vadd.f32 1.0, %v8436_v26 }
 0x1cf   :  { %v9515_v41 = vpop.permute.xlu1 %4312  ;;  %v2626_v54 = vadd.f32 1.0, %v8438_v61  ;;  %v7671_v17 = vld [vmem:[%s11995_s6 + $0x73] ss:$0 sm:$0xff] }
 0x1d0   :  { %12143 = vst [vmem:[#allocation33_spill] sm:$0xff] %v9515_v41  ;;  %v9525_v33 = vpop.permute.xlu0 %4365  ;;  %6460 = vperm.xlu1 %8402, %v7650_v27   ;;  %v2595_v27 = vmul.f32 0.044715, %v2587_v0  ;;  %v2599_v29 = vadd.f32 %v2591_v46, %v9503_v10  ;;  %8441 = vtanh.f32 %v2609_v31 }
 0x1d1   :  { %12144 = vst [vmem:[#allocation34_spill] sm:$0xff] %v9525_v33 }
 0x1d2   :  { %6391 = vperm.xlu0 %8401, %v7641_v5   ;;  %v7663_v5 = vld [vmem:[%s11995_s6 + $0x6f] ss:$0 sm:$0xff]  ;;  %v2603_v47 = vadd.f32 %v2595_v27, %v9508_v21  ;;  %v2634_v27 = vmul.f32 0.5, %v2626_v54 }
 0x1d3   :  { %v9535_v32 = vpop.permute.xlu1 %4316 }
 0x1d4   :  { %12145 = vst [vmem:[#allocation35_spill] sm:$0xff] %v9535_v32  ;;  %v9543_v50 = vpop.permute.xlu0 %4373  ;;  %7055 = vperm.xlu1 %8402, %v7688_v36   ;;  %v2592_v36 = vmul.f32 0.044715, %v2584_v7  ;;  %v2611_v46 = vmul.f32 0.7978846, %v2603_v47 }
 0x1d5   :  { %12146 = vst [vmem:[#allocation36_spill] sm:$0xff] %v9543_v50 }
 0x1d6   :  { %6399 = vperm.xlu0 %8401, %v7643_v39   ;;  %v2596_v39 = vmul.f32 0.044715, %v2588_v14  ;;  %v2600_v35 = vadd.f32 %v2592_v36, %v9521_v60  ;;  %v2630_v14 = vmul.f32 0.5, %v2622_v59  ;;  %v9586_v36 = vmul.f32 %v2634_v27, %v9400_v56 }
 0x1d7   :  { %v9553_v1 = vpop.permute.xlu1 %4369 }
 0x1d8   :  { %12147 = vst [vmem:[#allocation37_spill] sm:$0xff] %v9553_v1  ;;  %v9559_v8 = vpop.permute.xlu0 %2231  ;;  %7065 = vperm.xlu1 %8402, %v7690_v55   ;;  %v7669_v55 = vld [vmem:[%s11995_s6 + $0x71] ss:$0 sm:$0xff]  ;;  %v2604_v7 = vadd.f32 %v2596_v39, %v9528_v34  ;;  %v9583_v61 = vmul.f32 %v2630_v14, %v9390_v11  ;;  %12150 = vst [vmem:[#allocation40_spill] sm:$0xff] %v9586_v36  ;;  %v7677_v39 = vld [vmem:[%s11995_s6 + $0x75] ss:$0 sm:$0xff]  ;;  %v8440_v47 = vpop.eup %8439 }
 0x1d9   :  { %v2621_v14 = vadd.f32 1.0, %v8440_v47  ;;  %v7685_v47 = vld [vmem:[%s11995_s6 + $0x79] ss:$0 sm:$0xff] }
 0x1da   :  { %6786 = vperm.xlu0 %8401, %v7661_v12   ;;  %v2607_v12 = vmul.f32 0.7978846, %v2599_v29  ;;  %v2612_v31 = vmul.f32 0.7978846, %v2604_v7  ;;  %v8442_v54 = vpop.eup %8441  ;;  %v7679_v7 = vld [vmem:[%s11995_s6 + $0x77] ss:$0 sm:$0xff] }
 0x1db   :  { %v4090_v28 = vpop.permute.xlu1 %4089  ;;  %v2625_v27 = vadd.f32 1.0, %v8442_v54 }
 0x1dc   :  { %v2236_v38 = vpop.permute.xlu0 %2235  ;;  %7144 = vperm.xlu1 %8402, %v7692_v9   ;;  %8443 = vtanh.f32 %v2607_v12  ;;  %v4101_v11 = vmul.f32 %v4090_v28, %v9583_v61  ;;  %v4105_v56 = vmul.f32 %v4090_v28, %v9586_v36 }
 0x1dd   :  { %8445 = vtanh.f32 %v2611_v46 }
 0x1de   :  { %6794 = vperm.xlu0 %8401, %v7663_v5   ;;  %v2608_v5 = vmul.f32 0.7978846, %v2600_v35  ;;  %v2251_v35 = vmul.f32 %v2236_v38, %v9265_v44 }
 0x1df   :  { %v9570_v0 = vpop.permute.xlu1 %5698 }
 0x1e0   :  { %12148 = vst [vmem:[#allocation38_spill] sm:$0xff] %v9570_v0  ;;  %v2240_v23 = vpop.permute.xlu0 %2239  ;;  %8447 = vtanh.f32 %v2608_v5 }
 0x1e1   :  { %8449 = vtanh.f32 %v2612_v31  ;;  %v2252_v5 = vmul.f32 %v2240_v23, %v9369_v51 }
 0x1e2   :  { %6835 = vperm.xlu0 %8401, %v7669_v55   ;;  %v2247_v55 = vmul.f32 %v2236_v38, %v9263_v43 }
 0x1e3   :  { %v9577_v9 = vpop.permute.xlu1 %5739 }
 0x1e4   :  { %12149 = vst [vmem:[#allocation39_spill] sm:$0xff] %v9577_v9  ;;  %v2244_v26 = vpop.permute.xlu0 %2243 }
 0x1e6   :  { %6843 = vperm.xlu0 %8401, %v7671_v17   ;;  %v2248_v17 = vmul.f32 %v2240_v23, %v9363_v25  ;;  %v2633_v23 = vmul.f32 0.5, %v2625_v27  ;;  %v2250_v27 = vmul.f32 %v9559_v8, %v9334_v19 }
 0x1e7   :  { %v9588_v29 = vpop.permute.xlu1 %5747 }
 0x1e8   :  { %12151 = vst [vmem:[#allocation41_spill] sm:$0xff] %v9588_v29  ;;  %v2281_v59 = vpop.permute.xlu0 %2280 }
 0x1ea   :  { %6892 = vperm.xlu0 %8401, %v7677_v39   ;;  %v8444_v39 = vpop.eup %8443 }
 0x1eb   :  { %v9597_v12 = vpop.permute.xlu1 %5868  ;;  %v8446_v29 = vpop.eup %8445 }
 0x1ec   :  { %12152 = vst [vmem:[#allocation42_spill] sm:$0xff] %v9597_v12  ;;  %v2285_v46 = vpop.permute.xlu0 %2284  ;;  %v2629_v12 = vmul.f32 0.5, %v2621_v14  ;;  %v2246_v14 = vmul.f32 %v9559_v8, %v9325_v18  ;;  %v7649_v8 = vld [vmem:[%s11995_s6 + $0x65] ss:$0 sm:$0xff] }
 0x1ed   :  { %v2296_v38 = vadd.f32 %v2285_v46, %v2247_v55  ;;  %v2300_v31 = vadd.f32 %v2285_v46, %v2251_v35  ;;  %v2623_v55 = vadd.f32 1.0, %v8444_v39  ;;  %v8448_v35 = vpop.eup %8447 }
 0x1ee   :  { %6900 = vperm.xlu0 %8401, %v7679_v7   ;;  %v2249_v7 = vmul.f32 %v2244_v26, %v9380_v62  ;;  %v8450_v46 = vpop.eup %8449  ;;  %v2624_v39 = vadd.f32 1.0, %v8448_v35 }
 0x1ef   :  { %v9604_v0 = vadd.f32 %v4101_v11, %v2296_v38  ;;  %v9606_v28 = vadd.f32 %v4105_v56, %v2300_v31  ;;  %v9608_v9 = vpop.permute.xlu1 %5876  ;;  %v2253_v11 = vmul.f32 %v2244_v26, %v9386_v63  ;;  %v2627_v56 = vadd.f32 1.0, %v8446_v29  ;;  %v7687_v31 = vld [vmem:[%s11995_s6 + $0x7b] ss:$0 sm:$0xff] }
 0x1f0   :  { %12155 = vst [vmem:[#allocation45_spill] sm:$0xff] %v9608_v9  ;;  %v2289_v54 = vpop.permute.xlu0 %2288  ;;  %v9628_v26 = vmul.f32 %v2633_v23, %v9477_v42  ;;  %v2631_v29 = vmul.f32 0.5, %v2623_v55  ;;  %v2299_v63 = vadd.f32 %v2281_v59, %v2250_v27  ;;  %v2632_v42 = vmul.f32 0.5, %v2624_v39 }
 0x1f1   :  { %12153 = vst [vmem:[#allocation43_spill] sm:$0xff] %v9604_v0  ;;  %12154 = vst [vmem:[#allocation44_spill] sm:$0xff] %v9606_v28  ;;  %v2297_v50 = vadd.f32 %v2289_v54, %v2248_v17  ;;  %v2301_v44 = vadd.f32 %v2289_v54, %v2252_v5  ;;  %v9625_v5 = vmul.f32 %v2629_v12, %v9473_v37  ;;  %v2628_v28 = vadd.f32 1.0, %v8450_v46 }
 0x1f2   :  { %6949 = vperm.xlu0 %8401, %v7685_v47   ;;  %v2295_v0 = vadd.f32 %v2281_v59, %v2246_v14  ;;  %v9636_v12 = vmul.f32 %v2631_v29, %v9503_v10  ;;  %v7651_v59 = vld [vmem:[%s11995_s6 + $0x67] ss:$0 sm:$0xff] }
 0x1f3   :  { %v9615_v38 = vpop.permute.xlu1 %5925 }
 0x1f4   :  { %12156 = vst [vmem:[#allocation46_spill] sm:$0xff] %v9615_v38  ;;  %v2635_v38 = vmul.f32 0.5, %v2627_v56 }
 0x1f5   :  { %v2293_v17 = vpop.permute.xlu0 %2292 }
 0x1f6   :  { %v2298_v47 = vadd.f32 %v2293_v17, %v2249_v7  ;;  %v2302_v54 = vadd.f32 %v2293_v17, %v2253_v11  ;;  %6957 = vperm.xlu0 %8401, %v7687_v31   ;;  %v9641_v35 = vmul.f32 %v2635_v38, %v9508_v21  ;;  %v2636_v7 = vmul.f32 0.5, %v2628_v28 }
 0x1f7   :  { %v9630_v9 = vpop.permute.xlu1 %5933  ;;  %v9655_v21 = vmul.f32 %v2632_v42, %v9521_v60 }
 0x1f8   :  { %12157 = vst [vmem:[#allocation47_spill] sm:$0xff] %v9630_v9  ;;  %12158 = vst [vmem:[#allocation48_spill] sm:$0xff] %v9641_v35  ;;  %v9658_v28 = vmul.f32 %v2636_v7, %v9528_v34  ;;  %v7691_v34 = vld [vmem:[%s11996_s7 + $0x38] sm:$0xff] }
 0x1f9   :  { %v4086_v37 = vpop.permute.xlu0 %4085  ;;  %v6550_v7 = vld [vmem:[%s11996_s7 + $0x18] sm:$0xff] }
 0x1fa   :  { %v4100_v23 = vmul.f32 %v4086_v37, %v9625_v5  ;;  %v4104_v55 = vmul.f32 %v4086_v37, %v9628_v26  ;;  %6456 = vperm.xlu0 %8401, %v7649_v8   ;;  %12162 = vst [vmem:[#allocation52_spill] sm:$0xff] %v9658_v28 }
 0x1fb   :  { %v9643_v11 = vpop.permute.xlu1 %6054 }
 0x1fc   :  { %12159 = vst [vmem:[#allocation49_spill] sm:$0xff] %v9643_v11  ;;  %v9648_v56 = vadd.f32 %v4100_v23, %v2295_v0  ;;  %v9650_v10 = vadd.f32 %v4104_v55, %v2299_v63  ;;  %v7689_v0 = vld [vmem:[%s11996_s7 + $0x28] sm:$0xff]  ;;  %v7695_v23 = vld [vmem:[%s11995_s6 + $0x7f] sm:$0x1] }
 0x1fd   :  { %v4094_v46 = vpop.permute.xlu0 %4093 }
 0x1fe   :  { %12160 = vst [vmem:[#allocation50_spill] sm:$0xff] %v9648_v56  ;;  %12161 = vst [vmem:[#allocation51_spill] sm:$0xff] %v9650_v10  ;;  %v4102_v31 = vmul.f32 %v4094_v46, %v9636_v12  ;;  %v4106_v14 = vmul.f32 %v4094_v46, %v9641_v35  ;;  %6464 = vperm.xlu0 %8401, %v7651_v59   ;;  %v7653_v46 = vld [vmem:[%s11995_s6 + $0x69] sm:$0x1]  ;;  %v1804_v56 = vld [vmem:[%s11993_s4 + $0x18] sm:$0x3] }
 0x1ff   :  { %v9660_v38 = vpop.permute.xlu1 %6062 }
 0x200   :  { %12163 = vst [vmem:[#allocation53_spill] sm:$0xff] %v9660_v38  ;;  %v9665_v63 = vadd.f32 %v4102_v31, %v2297_v50  ;;  %v9667_v27 = vadd.f32 %v4106_v14, %v2301_v44  ;;  %v7693_v44 = vld [vmem:[%s11995_s6 + $0x7d] sm:$0x1]  ;;  %v7655_v14 = vld [vmem:[%s11995_s6 + $0x6b] sm:$0x1] }
 0x201   :  { %v4098_v17 = vpop.permute.xlu0 %4097 }
 0x202   :  { %12164 = vst [vmem:[#allocation54_spill] sm:$0xff] %v9665_v63  ;;  %12165 = vst [vmem:[#allocation55_spill] sm:$0xff] %v9667_v27  ;;  %v4103_v29 = vmul.f32 %v4098_v17, %v9655_v21  ;;  %v4107_v39 = vmul.f32 %v4098_v17, %v9658_v28  ;;  %7060 = vperm.xlu0 %8401, %v7689_v0  }
 0x203   :  { %v9671_v60 = vpop.permute.xlu1 %6103 }
 0x204   :  { %12166 = vst [vmem:[#allocation56_spill] sm:$0xff] %v9671_v60  ;;  %v9676_v8 = vadd.f32 %v4103_v29, %v2298_v47  ;;  %v9678_v37 = vadd.f32 %v4107_v39, %v2302_v54  ;;  %v6548_v47 = vld [vmem:[%s11996_s7 + $0x8] sm:$0xff] }
 0x205   :  { %v9714_v29 = vpop.permute.xlu0 %5690 }
 0x206   :  { %12167 = vst [vmem:[#allocation57_spill] sm:$0xff] %v9676_v8  ;;  %12168 = vst [vmem:[#allocation58_spill] sm:$0xff] %v9678_v37  ;;  %7070 = vperm.xlu0 %8401, %v7691_v34  }
 0x207   :  { %v9680_v50 = vpop.permute.xlu1 %6111  ;;  %12177 = vst [vmem:[#allocation67_spill] sm:$0xff] %v9714_v29 }
 0x208   :  { %12169 = vst [vmem:[#allocation59_spill] sm:$0xff] %v9680_v50 }
 0x209   :  { %v9718_v34 = vpop.permute.xlu0 %5694 }
 0x20a   :  { %7153 = vperm.xlu0 %8401, %v7693_v44   ;;  %12179 = vst [vmem:[#allocation69_spill] sm:$0xff] %v9718_v34 }
 0x20b   :  { %v9685_v42 = vpop.permute.xlu1 %6224 }
 0x20c   :  { %12170 = vst [vmem:[#allocation60_spill] sm:$0xff] %v9685_v42 }
 0x20e   :  { %7171 = vperm.xlu0 %8401, %v7695_v23   ;;  %v6694_v23 = vld [vmem:[%s11992_s3 + $0x10] sm:$0xff] }
 0x20f   :  { %v9690_v55 = vpop.permute.xlu1 %6232  ;;  %v6734_v29 = vrot.slane %v6694_v23, 1 }
 0x210   :  { %12171 = vst [vmem:[#allocation61_spill] sm:$0xff] %v9690_v55 }
 0x212   :  { %6558 = vperm.xlu0 %8401, %v6548_v47   ;;  %v6698_v47 = vld [vmem:[%s11992_s3 + $0x30] sm:$0xff] }
 0x213   :  { %v9695_v54 = vpop.permute.xlu1 %6273  ;;  %v6738_v37 = vrot.slane %v6698_v47, 1 }
 0x214   :  { %12172 = vst [vmem:[#allocation62_spill] sm:$0xff] %v9695_v54 }
 0x216   :  { %6568 = vperm.xlu0 %8401, %v6550_v7  }
 0x217   :  { %v9700_v59 = vpop.permute.xlu1 %6281 }
 0x218   :  { %12173 = vst [vmem:[#allocation63_spill] sm:$0xff] %v9700_v59 }
 0x21a   :  { %6651 = vperm.xlu0 %8401, %v7653_v46   ;;  %v9728_v46 = vpop.permute.xlu0 %5702 }
 0x21b   :  { %v9705_v31 = vpop.permute.xlu1 %6330  ;;  %12180 = vst [vmem:[#allocation70_spill] sm:$0xff] %v9728_v46 }
 0x21c   :  { %12174 = vst [vmem:[#allocation64_spill] sm:$0xff] %v9705_v31  ;;  %v9740_v31 = vld [vmem:[%s11992_s3 + $0x20] sm:$0xff] }
 0x21d   :  { %v6712_v50 = vrot.slane %v9740_v31, 7 }
 0x21e   :  { %6669 = vperm.xlu0 %8401, %v7655_v14   ;;  %v6710_v14 = vrot.slane %v6694_v23, 7  ;;  %v9744_v55 = vpop.permute.xlu0 %5743 }
 0x21f   :  { %v9710_v0 = vpop.permute.xlu1 %6338  ;;  %12181 = vst [vmem:[#allocation71_spill] sm:$0xff] %v9744_v55  ;;  %v6736_v55 = vrot.slane %v9740_v31, 1 }
 0x220   :  { %12175 = vst [vmem:[#allocation65_spill] sm:$0xff] %v9710_v0  ;;  %v6726_v59 = vsel %vm2327_vm3, 0.0, %v6710_v14 }
 0x223   :  { %v9712_v17 = vpop.permute.xlu1 %6387 }
 0x224   :  { %12176 = vst [vmem:[#allocation66_spill] sm:$0xff] %v9712_v17  ;;  %v6714_v17 = vrot.slane %v6698_v47, 7 }
 0x226   :  { %v6730_v54 = vsel %vm2327_vm3, 0.0, %v6714_v17  ;;  %v1802_v17 = vld [vmem:[%s11993_s4 + $0x8] sm:$0x3] }
 0x227   :  { %v9716_v39 = vpop.permute.xlu1 %6395 }
 0x228   :  { %12178 = vst [vmem:[#allocation68_spill] sm:$0xff] %v9716_v39  ;;  %v9735_v39 = vld [vmem:[%s11992_s3] sm:$0xff] }
 0x229   :  { %v6708_v42 = vrot.slane %v9735_v39, 7  ;;  %v6732_v60 = vrot.slane %v9735_v39, 1 }
 0x22b   :  { %v9720_v44 = vpop.permute.xlu1 %6782 }
 0x22f   :  { %v6791_v7 = vpop.permute.xlu1 %6790 }
 0x230   :  { %v6799_v11 = vmul.f32 %v6791_v7, %v6726_v59  ;;  %v6803_v9 = vmul.f32 %v6791_v7, %v6730_v54  ;;  %v12026_v54 = vmov 0.0|0.0  }
 0x231   :  { %8224 = vmatprep.subr.bf16.mxu0 %v12026_v54  ;;  %8228 = vmatprep.subr.bf16.mxu1 %v12026_v54  ;;  %v6754_v54 = vsel %vm12090_vm4, %v6738_v37, 0.0 }
 0x233   :  { %v9730_v0 = vpop.permute.xlu1 %6831 }
 0x234   :  { %v6850_v25 = vmul.f32 %v9730_v0, %v9740_v31 }
 0x237   :  { %v6840_v38 = vpop.permute.xlu1 %6839 }
 0x238   :  { %v6848_v46 = vmul.f32 %v6840_v38, %v6694_v23  ;;  %v6852_v34 = vmul.f32 %v6840_v38, %v6698_v47  ;;  %v1801_v38 = vld [vmem:[%s11993_s4] sm:$0xff] }
 0x23a   :  { %v6856_v27 = vadd.f32 %v6848_v46, %v6799_v11  ;;  %v6860_v14 = vadd.f32 %v6852_v34, %v6803_v9  ;;  %v7902_v10 = vpop.f32.mrb[8].mxu0  ;;  %v9762_v9 = vpop.permute.xlu0 %5751  ;;  %v6724_v11 = vsel %vm2327_vm3, 0.0, %v6708_v42  ;;  %v6748_v34 = vsel %vm12090_vm4, %v6732_v60, 0.0 }
 0x23b   :  { %v9753_v8 = vmul.f32 0.25, %v7902_v10  ;;  %v9755_v63 = vpop.permute.xlu1 %6888  ;;  %v825_v59 = vpop.f32.mrb[9].mxu0  ;;  %12182 = vst [vmem:[#allocation72_spill] sm:$0xff] %v9762_v9  ;;  %v6728_v10 = vsel %vm2327_vm3, 0.0, %v6712_v50  ;;  %v6750_v46 = vsel %vm12090_vm4, %v6734_v29, 0.0  ;;  %v6752_v9 = vsel %vm12090_vm4, %v6736_v55, 0.0 }
 0x23c   :  { %v9767_v23 = vmul.f32 0.25, %v825_v59  ;;  %v1905_v60 = vlaneseq }
 0x23d   :  { %v1476_v47 = vsel %vm1475_vm5, %v9753_v8, -inf  ;;  %v9772_v7 = vadd.f32 %v1802_v17, %v9753_v8  ;;  %v6846_v17 = vmul.f32 %v9730_v0, %v9735_v39 }
 0x23e   :  { %v1474_v42 = vsel %vm1473_vm6, %v9767_v23, -inf  ;;  %v9780_v50 = vadd.f32 %v1801_v38, %v9767_v23  ;;  %v7909_v59 = vpop.f32.mrb[8].mxu1  ;;  %v1803_v38 = vld [vmem:[%s11993_s4 + $0x10] sm:$0xff] }
 0x23f   :  { %v1834_v37 = vsel %vm1475_vm5, %v9772_v7, -inf  ;;  %v1477_v29 = vmax.f32 %v1474_v42, %v1476_v47  ;;  %v9789_v55 = vmul.f32 0.25, %v7909_v59  ;;  %v914_v51 = vpop.f32.mrb[9].mxu1  ;;  %v6897_v1 = vpop.permute.xlu1 %6896 }
 0x240   :  { %v1833_v32 = vsel %vm1473_vm6, %v9780_v50, -inf  ;;  %v9796_v19 = vmul.f32 0.25, %v914_v51  ;;  %v6905_v41 = vmul.f32 %v6897_v1, %v6750_v46  ;;  %v6909_v52 = vmul.f32 %v6897_v1, %v6754_v54  ;;  %v9803_v59 = vpop.permute.xlu0 %5872 }
 0x241   :  { %v1478_v4 = vrot.slane %v1477_v29, 4  ;;  %v1835_v2 = vmax.f32 %v1833_v32, %v1834_v37  ;;  %v1485_v47 = vsel %vm1475_vm5, %v9789_v55, -inf  ;;  %v9801_v42 = vadd.f32 %v1804_v56, %v9789_v55  ;;  %12183 = vst [vmem:[#allocation73_spill] sm:$0xff] %v9803_v59 }
 0x242   :  { %v1484_v45 = vsel %vm1473_vm6, %v9796_v19, -inf  ;;  %v9808_v62 = vadd.f32 %v1803_v38, %v9796_v19  ;;  %v7916_v51 = vpop.f32.mrb[10].mxu0  ;;  %v9810_v33 = vadd.f32 %v6905_v41, %v6856_v27  ;;  %v9812_v1 = vadd.f32 %v6909_v52, %v6860_v14 }
 0x243   :  { %v1479_v32 = vmax.f32 %v1477_v29, %v1478_v4  ;;  %v1836_v54 = vrot.slane %v1835_v2, 4  ;;  %v1843_v46 = vsel %vm1475_vm5, %v9801_v42, -inf  ;;  %v1486_v56 = vmax.f32 %v1484_v45, %v1485_v47  ;;  %v1003_v37 = vpop.f32.mrb[11].mxu0 }
 0x244   :  { %v6797_v59 = vmul.f32 %v9720_v44, %v6724_v11  ;;  %v1842_v38 = vsel %vm1473_vm6, %v9808_v62, -inf  ;;  %v9821_v13 = vmul.f32 0.25, %v7916_v51  ;;  %v6801_v14 = vmul.f32 %v9720_v44, %v6728_v10  ;;  %v1806_v51 = vld [vmem:[%s11993_s4 + $0x28] sm:$0x3]  ;;  %v9835_v44 = vpop.permute.xlu0 %5880 }
 0x245   :  { %v1480_v41 = vrot.slane %v1479_v32, 2  ;;  %v1837_v52 = vmax.f32 %v1835_v2, %v1836_v54  ;;  %v1487_v27 = vrot.slane %v1486_v56, 4  ;;  %v1844_v4 = vmax.f32 %v1842_v38, %v1843_v46  ;;  %v1805_v2 = vld [vmem:[%s11993_s4 + $0x20] sm:$0xff]  ;;  %12184 = vst [vmem:[#allocation74_spill] sm:$0xff] %v9835_v44 }
 0x246   :  { %v6854_v29 = vadd.f32 %v6846_v17, %v6797_v59  ;;  %v6903_v45 = vmul.f32 %v9755_v63, %v6748_v34  ;;  %v9825_v47 = vshrl.u32 %v1905_v60, 7  ;;  %v6858_v10 = vadd.f32 %v6850_v25, %v6801_v14 }
 0x247   :  { %v1481_v11 = vmax.f32 %v1479_v32, %v1480_v41  ;;  %v1838_v15 = vrot.slane %v1837_v52, 2  ;;  %v1488_v49 = vmax.f32 %v1486_v56, %v1487_v27  ;;  %v1845_v0 = vrot.slane %v1844_v4, 4  ;;  %v9833_v54 = vpop.f32.mrb[10].mxu1  ;;  %v6946_v41 = vpop.permute.xlu1 %6945 }
 0x248   :  { %v6907_v34 = vmul.f32 %v9755_v63, %v6752_v9  ;;  %v1494_v60 = vsel %vm1475_vm5, %v9821_v13, -inf  ;;  %v9840_v17 = vmul.f32 0.25, %v1003_v37  ;;  %v9842_v59 = vpop.f32.mrb[11].mxu1  ;;  %v9845_v27 = vadd.f32 %v1806_v51, %v9821_v13  ;;  %v9863_v6 = vpop.permute.xlu0 %5929 }
 0x249   :  { %v1482_v32 = vrot.slane %v1481_v11, 1  ;;  %v1839_v46 = vmax.f32 %v1837_v52, %v1838_v15  ;;  %v1489_v56 = vrot.slane %v1488_v49, 2  ;;  %v1846_v38 = vmax.f32 %v1844_v4, %v1845_v0  ;;  %12185 = vst [vmem:[#allocation75_spill] sm:$0xff] %v9863_v6 }
 0x24a   :  { %v6911_v16 = vadd.f32 %v6903_v45, %v6854_v29  ;;  %v1493_v25 = vsel %vm1473_vm6, %v9840_v17, -inf  ;;  %v9850_v63 = vadd.f32 %v1805_v2, %v9840_v17  ;;  %v9852_v9 = vpop.f32.mrb[12].mxu0  ;;  %v9857_v52 = vadd.s32 8, %v9825_v47 }
 0x24b   :  { %v1483_v37 = vmax.f32 %v1481_v11, %v1482_v32  ;;  %v1840_v14 = vrot.slane %v1839_v46, 1  ;;  %v1490_v44 = vmax.f32 %v1488_v49, %v1489_v56  ;;  %v1847_v30 = vrot.slane %v1846_v38, 2  ;;  %v9854_v15 = vpop.f32.mrb[13].mxu0 }
 0x24c   :  { %v6915_v4 = vadd.f32 %v6907_v34, %v6858_v10  ;;  %v9859_v0 = vadd.f32 %v6946_v41, %v6911_v16  ;;  %v1495_v29 = vmax.f32 %v1493_v25, %v1494_v60  ;;  %v1852_v49 = vsel %vm1475_vm5, %v9845_v27, -inf }
 0x24d   :  { %v1547_v45 = vsub.f32 %v9767_v23, %v1483_v37  ;;  %v1548_v51 = vsub.f32 %v9753_v8, %v1483_v37  ;;  %v1841_v2 = vmax.f32 %v1839_v46, %v1840_v14  ;;  %v1491_v20 = vrot.slane %v1490_v44, 1 }
 0x24e   :  { %v1848_v11 = vmax.f32 %v1846_v38, %v1847_v30  ;;  %v1496_v32 = vrot.slane %v1495_v29, 4  ;;  %v1851_v56 = vsel %vm1473_vm6, %v9850_v63, -inf }
 0x24f   :  { %v1563_v10 = vmul.f32 1.442695, %v1547_v45  ;;  %v1565_v16 = vmul.f32 1.442695, %v1548_v51  ;;  %vm1908_vm7 = vcmp.eq.f32.partialorder %v9780_v50, %v1841_v2  ;;  %vm1909_vm8 = vcmp.eq.f32.partialorder %v9772_v7, %v1841_v2  ;;  %v9871_v23 = vpop.f32.mrb[12].mxu1  ;;  %v9887_v2 = vpop.permute.xlu0 %5937 }
 0x250   :  { %v1924_v8 = vsel %vm1908_vm7, %v9825_v47, 10  ;;  %v1925_v34 = vsel %vm1909_vm8, %v9857_v52, 10  ;;  %v1492_v30 = vmax.f32 %v1490_v44, %v1491_v20  ;;  %v1849_v60 = vrot.slane %v1848_v11, 1  ;;  %v9875_v46 = vpop.f32.mrb[13].mxu1  ;;  %12186 = vst [vmem:[#allocation76_spill] sm:$0xff] %v9887_v2 }
 0x251   :  { %8451 = vpow2.f32 %v1563_v10  ;;  %v1940_v38 = vsel %vm1473_vm6, %v1924_v8, 2147483647  ;;  %v1941_v25 = vsel %vm1475_vm5, %v1925_v34, 2147483647  ;;  %v1497_v37 = vmax.f32 %v1495_v29, %v1496_v32  ;;  %v6954_v29 = vpop.permute.xlu1 %6953 }
 0x252   :  { %8453 = vpow2.f32 %v1565_v16  ;;  %vm1942_vm9 = vcmp.lt.s32.totalorder %v1940_v38, %v1941_v25  ;;  %v1549_v7 = vsub.f32 %v9796_v19, %v1492_v30  ;;  %v1550_v50 = vsub.f32 %v9789_v55, %v1492_v30  ;;  %v9881_v14 = vpop.f32.mrb[14].mxu0 }
 0x253   :  { %v9883_v45 = vsel %vm1942_vm9, %v1940_v38, %v1941_v25  ;;  %v1850_v20 = vmax.f32 %v1848_v11, %v1849_v60  ;;  %v1498_v44 = vrot.slane %v1497_v37, 2  ;;  %v9885_v51 = vpop.f32.mrb[15].mxu0  ;;  %v9889_v34 = vadd.f32 %v6946_v41, %v6915_v4 }
 0x254   :  { %v1567_v10 = vmul.f32 1.442695, %v1549_v7  ;;  %v1569_v8 = vmul.f32 1.442695, %v1550_v50  ;;  %v1853_v55 = vmax.f32 %v1851_v56, %v1852_v49  ;;  %v6968_v16 = vmul.f32 %v9859_v0, %v9859_v0  ;;  %v9917_v50 = vpop.permute.xlu0 %6058 }
 0x255   :  { %vm1910_vm10 = vcmp.eq.f32.partialorder %v9808_v62, %v1850_v20  ;;  %vm1911_vm11 = vcmp.eq.f32.partialorder %v9801_v42, %v1850_v20  ;;  %v1499_v19 = vmax.f32 %v1497_v37, %v1498_v44  ;;  %v9902_v49 = vmul.f32 0.25, %v9833_v54  ;;  %v1808_v37 = vld [vmem:[%s11993_s4 + $0x38] sm:$0x3]  ;;  %12189 = vst [vmem:[#allocation79_spill] sm:$0xff] %v9917_v50 }
 0x256   :  { %8455 = vpow2.f32 %v1567_v10  ;;  %v1926_v32 = vsel %vm1910_vm10, %v9825_v47, 10  ;;  %v1927_v11 = vsel %vm1911_vm11, %v9857_v52, 10  ;;  %v1854_v42 = vrot.slane %v1853_v55, 4 }
 0x257   :  { %8457 = vpow2.f32 %v1569_v8  ;;  %v1953_v30 = vsel %vm1473_vm6, %v1926_v32, 2147483647  ;;  %v1954_v41 = vsel %vm1475_vm5, %v1927_v11, 2147483647  ;;  %v1500_v4 = vrot.slane %v1499_v19, 1  ;;  %v9899_v62 = vpop.f32.mrb[14].mxu1 }
 0x258   :  { %vm1955_vm12 = vcmp.lt.s32.totalorder %v1953_v30, %v1954_v41  ;;  %v9905_v56 = vadd.f32 %v6954_v29, %v9810_v33  ;;  %v9907_v60 = vpop.f32.mrb[15].mxu1  ;;  %v9915_v7 = vadd.f32 %v6954_v29, %v9812_v1  ;;  %v6976_v54 = vmul.f32 %v6968_v16, %v9859_v0  ;;  %v1807_v11 = vld [vmem:[%s11993_s4 + $0x30] sm:$0xff]  ;;  %v9951_v6 = vpop.permute.xlu0 %6066 }
 0x259   :  { %v9909_v38 = vsel %vm1955_vm12, %v1953_v30, %v1954_v41  ;;  %v1501_v25 = vmax.f32 %v1499_v19, %v1500_v4  ;;  %v1855_v20 = vmax.f32 %v1853_v55, %v1854_v42  ;;  %v9921_v33 = vmul.f32 0.25, %v9842_v59  ;;  %12190 = vst [vmem:[#allocation80_spill] sm:$0xff] %v9951_v6 }
 0x25a   :  { %12187 = vst [vmem:[#allocation77_spill] sm:$0xff] %v9905_v56  ;;  %12188 = vst [vmem:[#allocation78_spill] sm:$0xff] %v9915_v7  ;;  %v6972_v10 = vmul.f32 %v9889_v34, %v9889_v34  ;;  %v1503_v55 = vsel %vm1475_vm5, %v9902_v49, -inf  ;;  %v9936_v59 = vadd.f32 %v1808_v37, %v9902_v49  ;;  %v6984_v41 = vmul.f32 0.044715, %v6976_v54 }
 0x25b   :  { %v9923_v44 = vpop.eup %8451  ;;  %v1551_v8 = vsub.f32 %v9840_v17, %v1501_v25  ;;  %v1552_v19 = vsub.f32 %v9821_v13, %v1501_v25  ;;  %v1856_v29 = vrot.slane %v1855_v20, 2  ;;  %v1502_v42 = vsel %vm1473_vm6, %v9921_v33, -inf }
 0x25c   :  { %v9929_v32 = vpop.eup %8453  ;;  %v1595_v1 = vsel %vm1473_vm6, %v9923_v44, 0.0  ;;  %v6980_v25 = vmul.f32 %v6972_v10, %v9889_v34  ;;  %v1504_v37 = vmax.f32 %v1502_v42, %v1503_v55  ;;  %v9947_v50 = vadd.f32 %v1807_v11, %v9921_v33 }
 0x25d   :  { %v1596_v17 = vsel %vm1475_vm5, %v9929_v32, 0.0  ;;  %v1571_v13 = vmul.f32 1.442695, %v1551_v8  ;;  %v1573_v16 = vmul.f32 1.442695, %v1552_v19  ;;  %v1857_v4 = vmax.f32 %v1855_v20, %v1856_v29 }
 0x25e   :  { %v1597_v30 = vadd.f32 %v1596_v17, %v1595_v1  ;;  %v1861_v54 = vsel %vm1475_vm5, %v9936_v59, -inf  ;;  %v1505_v19 = vrot.slane %v1504_v37, 4  ;;  %v1860_v1 = vsel %vm1473_vm6, %v9947_v50, -inf }
 0x25f   :  { %8459 = vpow2.f32 %v1571_v13  ;;  %v1858_v8 = vrot.slane %v1857_v4, 1  ;;  %v6992_v11 = vadd.f32 %v6984_v41, %v9859_v0  ;;  %v1862_v42 = vmax.f32 %v1860_v1, %v1861_v54 }
 0x260   :  { %v9949_v2 = vpop.eup %8455  ;;  %v1598_v43 = vrot.slane %v1597_v30, 4  ;;  %8461 = vpow2.f32 %v1573_v16  ;;  %v1506_v16 = vmax.f32 %v1504_v37, %v1505_v19  ;;  %v6988_v18 = vmul.f32 0.044715, %v6980_v25 }
 0x261   :  { %v9955_v20 = vpop.eup %8457  ;;  %v1604_v10 = vsel %vm1473_vm6, %v9949_v2, 0.0  ;;  %v1859_v17 = vmax.f32 %v1857_v4, %v1858_v8  ;;  %v7000_v3 = vmul.f32 0.7978846, %v6992_v11  ;;  %v1863_v8 = vrot.slane %v1862_v42, 4 }
 0x262   :  { %v1599_v29 = vadd.f32 %v1598_v43, %v1597_v30  ;;  %v1605_v55 = vsel %vm1475_vm5, %v9955_v20, 0.0  ;;  %v9968_v30 = vpop.permute.xlu0 %6107  ;;  %v1507_v25 = vrot.slane %v1506_v16, 2  ;;  %v6996_v54 = vadd.f32 %v6988_v18, %v9889_v34 }
 0x263   :  { %v1606_v13 = vadd.f32 %v1605_v55, %v1604_v10  ;;  %vm1912_vm13 = vcmp.eq.f32.partialorder %v9850_v63, %v1859_v17  ;;  %vm1913_vm14 = vcmp.eq.f32.partialorder %v9845_v27, %v1859_v17  ;;  %12191 = vst [vmem:[#allocation81_spill] sm:$0xff] %v9968_v30  ;;  %v1810_v27 = vld [vmem:[%s11993_s4 + $0x48] sm:$0x3]  ;;  %8463 = vtanh.f32 %v7000_v3 }
 0x264   :  { %v1600_v6 = vrot.slane %v1599_v29, 2  ;;  %v1928_v24 = vsel %vm1912_vm13, %v9825_v47, 10  ;;  %v1929_v43 = vsel %vm1913_vm14, %v9857_v52, 10  ;;  %v1508_v1 = vmax.f32 %v1506_v16, %v1507_v25 }
 0x265   :  { %v1607_v48 = vrot.slane %v1606_v13, 4  ;;  %v1966_v41 = vsel %vm1473_vm6, %v1928_v24, 2147483647  ;;  %v1967_v4 = vsel %vm1475_vm5, %v1929_v43, 2147483647  ;;  %v10010_v30 = vmul.f32 0.25, %v9871_v23 }
 0x266   :  { %v1601_v57 = vadd.f32 %v1600_v6, %v1599_v29  ;;  %vm1968_vm15 = vcmp.lt.s32.totalorder %v1966_v41, %v1967_v4  ;;  %v9979_v6 = vmul.f32 0.25, %v9852_v9  ;;  %v9984_v29 = vmul.f32 0.25, %v9854_v15  ;;  %v1809_v9 = vld [vmem:[%s11993_s4 + $0x40] sm:$0xff] }
 0x267   :  { %v1608_v37 = vadd.f32 %v1607_v48, %v1606_v13  ;;  %v9976_v10 = vsel %vm1968_vm15, %v1966_v41, %v1967_v4  ;;  %v1864_v48 = vmax.f32 %v1862_v42, %v1863_v8  ;;  %v1509_v15 = vrot.slane %v1508_v1, 1 }
 0x268   :  { %v1602_v63 = vrot.slane %v1601_v57, 1  ;;  %v9991_v17 = vadd.f32 %v1810_v27, %v9979_v6  ;;  %v1512_v42 = vsel %vm1475_vm5, %v9979_v6, -inf  ;;  %v10007_v8 = vadd.f32 %v1809_v9, %v9984_v29 }
 0x269   :  { %v9981_v19 = vpop.eup %8459  ;;  %v1609_v24 = vrot.slane %v1608_v37, 2  ;;  %v1865_v43 = vrot.slane %v1864_v48, 2  ;;  %v1510_v25 = vmax.f32 %v1508_v1, %v1509_v15 }
 0x26a   :  { %v9986_v55 = vpop.eup %8461  ;;  %v1603_v11 = vadd.f32 %v1602_v63, %v1601_v57  ;;  %v1613_v18 = vsel %vm1473_vm6, %v9981_v19, 0.0  ;;  %v10000_v57 = vpop.permute.xlu0 %6115  ;;  %v1870_v41 = vsel %vm1475_vm5, %v9991_v17, -inf  ;;  %v1869_v1 = vsel %vm1473_vm6, %v10007_v8, -inf }
 0x26b   :  { %v1610_v13 = vadd.f32 %v1609_v24, %v1608_v37  ;;  %v1614_v16 = vsel %vm1475_vm5, %v9986_v55, 0.0  ;;  %12192 = vst [vmem:[#allocation82_spill] sm:$0xff] %v10000_v57  ;;  %v1511_v37 = vsel %vm1473_vm6, %v9984_v29, -inf  ;;  %v1866_v63 = vmax.f32 %v1864_v48, %v1865_v43 }
 0x26c   :  { %8465 = vrcp.f32 %v1603_v11  ;;  %v1615_v3 = vadd.f32 %v1614_v16, %v1613_v18  ;;  %v1513_v24 = vmax.f32 %v1511_v37, %v1512_v42  ;;  %v1553_v18 = vsub.f32 %v9921_v33, %v1510_v25  ;;  %v1812_v33 = vld [vmem:[%s11993_s4 + $0x58] sm:$0x3] }
 0x26d   :  { %v1611_v4 = vrot.slane %v1610_v13, 1  ;;  %v1554_v16 = vsub.f32 %v9902_v49, %v1510_v25  ;;  %v1867_v57 = vrot.slane %v1866_v63, 1  ;;  %v1871_v53 = vmax.f32 %v1869_v1, %v1870_v41  ;;  %v10026_v41 = vpop.eup %8463 }
 0x26e   :  { %v1616_v27 = vrot.slane %v1615_v3, 4  ;;  %v1514_v40 = vrot.slane %v1513_v24, 4  ;;  %v1575_v9 = vmul.f32 1.442695, %v1553_v18  ;;  %v10016_v48 = vpop.permute.xlu0 %6228  ;;  %v1521_v49 = vsel %vm1475_vm5, %v10010_v30, -inf }
 0x26f   :  { %v1612_v11 = vadd.f32 %v1611_v4, %v1610_v13  ;;  %v1577_v22 = vmul.f32 1.442695, %v1554_v16  ;;  %12193 = vst [vmem:[#allocation83_spill] sm:$0xff] %v10016_v48  ;;  %v1868_v23 = vmax.f32 %v1866_v63, %v1867_v57  ;;  %v1872_v13 = vrot.slane %v1871_v53, 4 }
 0x270   :  { %v1617_v15 = vadd.f32 %v1616_v27, %v1615_v3  ;;  %v1515_v43 = vmax.f32 %v1513_v24, %v1514_v40  ;;  %v7004_v4 = vmul.f32 0.7978846, %v6996_v54  ;;  %v10024_v3 = vmul.f32 0.25, %v9875_v46 }
 0x271   :  { %8467 = vrcp.f32 %v1612_v11  ;;  %vm1914_vm0 = vcmp.eq.f32.partialorder %v9947_v50, %v1868_v23  ;;  %vm1915_vm1 = vcmp.eq.f32.partialorder %v9936_v59, %v1868_v23  ;;  %v1873_v37 = vmax.f32 %v1871_v53, %v1872_v13  ;;  %v1811_v53 = vld [vmem:[%s11993_s4 + $0x50] sm:$0xff] }
 0x272   :  { %v1618_v42 = vrot.slane %v1617_v15, 2  ;;  %8469 = vpow2.f32 %v1575_v9  ;;  %v1930_v40 = vsel %vm1914_vm0, %v9825_v47, 10  ;;  %v1931_v54 = vsel %vm1915_vm1, %v9857_v52, 10  ;;  %v10046_v18 = vpop.permute.xlu0 %6236 }
 0x273   :  { %8471 = vpow2.f32 %v1577_v22  ;;  %v1516_v57 = vrot.slane %v1515_v43, 2  ;;  %v1979_v24 = vsel %vm1473_vm6, %v1930_v40, 2147483647  ;;  %v1980_v46 = vsel %vm1475_vm5, %v1931_v54, 2147483647  ;;  %12194 = vst [vmem:[#allocation84_spill] sm:$0xff] %v10046_v18 }
 0x274   :  { %v1619_v25 = vadd.f32 %v1618_v42, %v1617_v15  ;;  %v10035_v11 = vadd.f32 %v1812_v33, %v10010_v30  ;;  %vm1981_vm2 = vcmp.lt.s32.totalorder %v1979_v24, %v1980_v46  ;;  %v1874_v15 = vrot.slane %v1873_v37, 2 }
 0x275   :  { %v1517_v59 = vmax.f32 %v1515_v43, %v1516_v57  ;;  %v10048_v1 = vsel %vm1981_vm2, %v1979_v24, %v1980_v46  ;;  %v1520_v9 = vsel %vm1473_vm6, %v10024_v3, -inf  ;;  %8473 = vtanh.f32 %v7004_v4 }
 0x276   :  { %v8466_v27 = vpop.eup %8465  ;;  %v1620_v63 = vrot.slane %v1619_v25, 1  ;;  %v1875_v23 = vmax.f32 %v1873_v37, %v1874_v15  ;;  %v1522_v43 = vmax.f32 %v1520_v9, %v1521_v49  ;;  %v10055_v13 = vadd.f32 %v1811_v53, %v10024_v3  ;;  %v10075_v53 = vpop.permute.xlu0 %6277 }
 0x277   :  { %v10038_v22 = vmul.f32 %v8466_v27, %v9923_v44  ;;  %v10041_v50 = vmul.f32 %v8466_v27, %v9929_v32  ;;  %v1518_v42 = vrot.slane %v1517_v59, 1  ;;  %v1879_v40 = vsel %vm1475_vm5, %v10035_v11, -inf  ;;  %12195 = vst [vmem:[#allocation85_spill] sm:$0xff] %v10075_v53 }
 0x278   :  { %v1621_v16 = vadd.f32 %v1620_v63, %v1619_v25  ;;  %v1876_v4 = vrot.slane %v1875_v23, 1  ;;  %v1523_v63 = vrot.slane %v1522_v43, 4  ;;  %v1878_v24 = vsel %vm1473_vm6, %v10055_v13, -inf }
 0x279   :  { %v1691_v44 = vadd.f32 1e-16, %v10038_v22  ;;  %v1692_v32 = vadd.f32 1e-16, %v10041_v50  ;;  %v1519_v25 = vmax.f32 %v1517_v59, %v1518_v42 }
 0x27a   :  { %8475 = vrcp.f32 %v1621_v16  ;;  %v1877_v16 = vmax.f32 %v1875_v23, %v1876_v4  ;;  %v1524_v9 = vmax.f32 %v1522_v43, %v1523_v63  ;;  %v10087_v63 = vpop.permute.xlu0 %6285 }
 0x27b   :  { %v8468_v33 = vpop.eup %8467  ;;  %8477 = vlog2.f32 %v1691_v44  ;;  %v1555_v49 = vsub.f32 %v9984_v29, %v1519_v25  ;;  %v1556_v37 = vsub.f32 %v9979_v6, %v1519_v25  ;;  %12196 = vst [vmem:[#allocation86_spill] sm:$0xff] %v10087_v63 }
 0x27c   :  { %8479 = vlog2.f32 %v1692_v32  ;;  %v10060_v54 = vmul.f32 %v8468_v33, %v9949_v2  ;;  %v10063_v57 = vmul.f32 %v8468_v33, %v9955_v20  ;;  %v10065_v27 = vpop.eup %8469  ;;  %vm1916_vm7 = vcmp.eq.f32.partialorder %v10007_v8, %v1877_v16 }
 0x27d   :  { %v10071_v46 = vpop.eup %8471  ;;  %v1622_v20 = vsel %vm1473_vm6, %v10065_v27, 0.0  ;;  %v1579_v6 = vmul.f32 1.442695, %v1555_v49  ;;  %v1581_v15 = vmul.f32 1.442695, %v1556_v37  ;;  %vm1917_vm8 = vcmp.eq.f32.partialorder %v9991_v17, %v1877_v16 }
 0x27e   :  { %v1693_v59 = vadd.f32 1e-16, %v10060_v54  ;;  %v1694_v2 = vadd.f32 1e-16, %v10063_v57  ;;  %v1623_v29 = vsel %vm1475_vm5, %v10071_v46, 0.0  ;;  %v1932_v32 = vsel %vm1916_vm7, %v9825_v47, 10  ;;  %v10104_v53 = vpop.permute.xlu0 %6334 }
 0x27f   :  { %v1624_v44 = vadd.f32 %v1623_v29, %v1622_v20  ;;  %v1933_v42 = vsel %vm1917_vm8, %v9857_v52, 10  ;;  %v1525_v33 = vrot.slane %v1524_v9, 2  ;;  %v1992_v23 = vsel %vm1473_vm6, %v1932_v32, 2147483647  ;;  %v8474_v49 = vpop.eup %8473  ;;  %12198 = vst [vmem:[#allocation88_spill] sm:$0xff] %v10104_v53 }
 0x280   :  { %8481 = vlog2.f32 %v1693_v59  ;;  %v1993_v4 = vsel %vm1475_vm5, %v1933_v42, 2147483647  ;;  %v1880_v37 = vmax.f32 %v1878_v24, %v1879_v40  ;;  %v7016_v40 = vadd.f32 1.0, %v10026_v41 }
 0x281   :  { %8483 = vlog2.f32 %v1694_v2  ;;  %v1625_v25 = vrot.slane %v1624_v44, 4  ;;  %vm1994_vm9 = vcmp.lt.s32.totalorder %v1992_v23, %v1993_v4  ;;  %v1526_v43 = vmax.f32 %v1524_v9, %v1525_v33 }
 0x282   :  { %8485 = vpow2.f32 %v1579_v6  ;;  %v10089_v59 = vsel %vm1994_vm9, %v1992_v23, %v1993_v4  ;;  %v1881_v42 = vrot.slane %v1880_v37, 4  ;;  %v7020_v4 = vadd.f32 1.0, %v8474_v49 }
 0x283   :  { %8487 = vpow2.f32 %v1581_v15  ;;  %v1626_v17 = vadd.f32 %v1625_v25, %v1624_v44  ;;  %v1527_v29 = vrot.slane %v1526_v43, 1  ;;  %vm2658_vm9 = vcmask 1041408  }
 0x284   :  { %v8476_v8 = vpop.eup %8475  ;;  %v1882_v23 = vmax.f32 %v1880_v37, %v1881_v42 }
 0x285   :  { %v8478_v2 = vpop.eup %8477  ;;  %v10092_v20 = vmul.f32 %v8476_v8, %v9981_v19  ;;  %v10095_v16 = vmul.f32 %v8476_v8, %v9986_v55  ;;  %v1627_v15 = vrot.slane %v1626_v17, 2  ;;  %v1528_v25 = vmax.f32 %v1526_v43, %v1527_v29  ;;  %v10101_v55 = vpop.permute.xlu1 %6452 }
 0x286   :  { %v8480_v6 = vpop.eup %8479  ;;  %v1708_v32 = vmul.f32 0.6931472, %v8478_v2  ;;  %12197 = vst [vmem:[#allocation87_spill] sm:$0xff] %v10101_v55 }
 0x287   :  { %v1710_v24 = vmul.f32 0.6931472, %v8480_v6  ;;  %v1695_v9 = vadd.f32 1e-16, %v10092_v20  ;;  %v1628_v33 = vadd.f32 %v1627_v15, %v1626_v17  ;;  %v1557_v41 = vsub.f32 %v10024_v3, %v1528_v25 }
 0x288   :  { %v1739_v44 = vmul.f32 %v1708_v32, %v10038_v22  ;;  %v7024_v6 = vmul.f32 0.5, %v7016_v40  ;;  %v1558_v37 = vsub.f32 %v10010_v30, %v1528_v25 }
 0x289   :  { %v1740_v19 = vmul.f32 %v1710_v24, %v10041_v50  ;;  %8489 = vlog2.f32 %v1695_v9  ;;  %v1629_v63 = vrot.slane %v1628_v33, 1  ;;  %v1883_v50 = vrot.slane %v1882_v23, 2 }
 0x28a   :  { %v8482_v8 = vpop.eup %8481  ;;  %v1755_v2 = vsel %vm1473_vm6, %v1739_v44, 0.0  ;;  %v1583_v15 = vmul.f32 1.442695, %v1557_v41  ;;  %v1585_v40 = vmul.f32 1.442695, %v1558_v37 }
 0x28b   :  { %v8484_v18 = vpop.eup %8483  ;;  %v1756_v22 = vsel %vm1475_vm5, %v1740_v19, 0.0  ;;  %v1712_v43 = vmul.f32 0.6931472, %v8482_v8  ;;  %v1630_v32 = vadd.f32 %v1629_v63, %v1628_v33  ;;  %v1884_v9 = vmax.f32 %v1882_v23, %v1883_v50  ;;  %v10120_v63 = vpop.permute.xlu1 %6460 }
 0x28c   :  { %v10109_v17 = vpop.eup %8485  ;;  %v1757_v29 = vadd.f32 %v1756_v22, %v1755_v2  ;;  %v1714_v49 = vmul.f32 0.6931472, %v8484_v18  ;;  %12200 = vst [vmem:[#allocation90_spill] sm:$0xff] %v10120_v63  ;;  %v10125_v8 = vmul.f32 0.25, %v9881_v14  ;;  %v7028_v22 = vmul.f32 0.5, %v7020_v4 }
 0x28d   :  { %v10111_v42 = vpop.eup %8487  ;;  %v1741_v24 = vmul.f32 %v1712_v43, %v10060_v54  ;;  %v1631_v3 = vsel %vm1473_vm6, %v10109_v17, 0.0  ;;  %8491 = vrcp.f32 %v1630_v32  ;;  %v1885_v33 = vrot.slane %v1884_v9, 1  ;;  %v10122_v54 = vpop.permute.xlu0 %6342 }
 0x28e   :  { %12199 = vst [vmem:[#allocation89_spill] sm:$0xff] %v10111_v42  ;;  %v1742_v44 = vmul.f32 %v1714_v49, %v10063_v57  ;;  %v1632_v30 = vsel %vm1475_vm5, %v10111_v42, 0.0  ;;  %8493 = vpow2.f32 %v1583_v15  ;;  %12201 = vst [vmem:[#allocation91_spill] sm:$0xff] %v10122_v54  ;;  %v7032_v57 = vmul.f32 %v7024_v6, %v9859_v0 }
 0x28f   :  { %v1758_v25 = vsel %vm1473_vm6, %v1741_v24, 0.0  ;;  %v1633_v18 = vadd.f32 %v1632_v30, %v1631_v3  ;;  %8495 = vpow2.f32 %v1585_v40  ;;  %v1886_v41 = vmax.f32 %v1884_v9, %v1885_v33 }
 0x290   :  { %v1759_v19 = vadd.f32 %v1758_v25, %v1757_v29  ;;  %v1760_v23 = vsel %vm1475_vm5, %v1742_v44, 0.0  ;;  %v7040_v37 = vadd.f32 %v7032_v57, %v9735_v39  ;;  %v10131_v50 = vmul.f32 0.25, %v9885_v51  ;;  %v1814_v51 = vld [vmem:[%s11993_s4 + $0x68] sm:$0x3] }
 0x291   :  { %v1634_v2 = vrot.slane %v1633_v18, 4  ;;  %vm1918_vm10 = vcmp.eq.f32.partialorder %v10055_v13, %v1886_v41  ;;  %vm1919_vm11 = vcmp.eq.f32.partialorder %v10035_v11, %v1886_v41  ;;  %v1530_v39 = vsel %vm1475_vm5, %v10125_v8, -inf  ;;  %v7056_v13 = vpop.permute.xlu1 %7055  ;;  %v10146_v3 = vpop.permute.xlu0 %6391  ;;  %v10154_v25 = vld [vmem:[%s11992_s3 + $0x8] sm:$0xff] }
 0x292   :  { %v1761_v43 = vadd.f32 %v1760_v23, %v1759_v19  ;;  %v1934_v0 = vsel %vm1918_vm10, %v9825_v47, 10  ;;  %v1935_v6 = vsel %vm1919_vm11, %v9857_v52, 10  ;;  %v7036_v15 = vmul.f32 %v7028_v22, %v9889_v34  ;;  %12202 = vst [vmem:[#allocation92_spill] sm:$0xff] %v10146_v3  ;;  %v10165_v57 = vld [vmem:[%s11992_s3 + $0x28] sm:$0xff] }
 0x293   :  { %v8490_v29 = vpop.eup %8489  ;;  %v1635_v49 = vadd.f32 %v1634_v2, %v1633_v18  ;;  %v2005_v4 = vsel %vm1473_vm6, %v1934_v0, 2147483647  ;;  %v2006_v24 = vsel %vm1475_vm5, %v1935_v6, 2147483647  ;;  %v7073_v40 = vmul.f32 %v7056_v13, %v7040_v37 }
 0x294   :  { %v1716_v14 = vmul.f32 0.6931472, %v8490_v29  ;;  %v1529_v9 = vsel %vm1473_vm6, %v10131_v50, -inf  ;;  %v1696_v44 = vadd.f32 1e-16, %v10095_v16  ;;  %vm2007_vm12 = vcmp.lt.s32.totalorder %v2005_v4, %v2006_v24 }
 0x295   :  { %v1636_v32 = vrot.slane %v1635_v49, 2  ;;  %v10157_v18 = vsel %vm2007_vm12, %v2005_v4, %v2006_v24  ;;  %v10160_v33 = vadd.f32 %v1814_v51, %v10125_v8  ;;  %v1531_v19 = vmax.f32 %v1529_v9, %v1530_v39  ;;  %v10190_v39 = vpop.permute.xlu0 %6399  ;;  %v10206_v9 = vld [vmem:[%s11992_s3 + $0x18] sm:$0xff]  ;;  %v10263_v42 = vpop.permute.xlu1 %7065 }
 0x296   :  { %v1743_v11 = vmul.f32 %v1716_v14, %v10092_v20  ;;  %v7044_v14 = vadd.f32 %v7036_v15, %v9740_v31  ;;  %v7081_v0 = vsel %vm1473_vm6, %v7073_v40, 0.0  ;;  %8497 = vlog2.f32 %v1696_v44  ;;  %12205 = vst [vmem:[#allocation95_spill] sm:$0xff] %v10190_v39  ;;  %v1816_v40 = vld [vmem:[%s11993_s4 + $0x78] sm:$0x3] }
 0x297   :  { %v1637_v30 = vadd.f32 %v1636_v32, %v1635_v49  ;;  %v8492_v34 = vpop.eup %8491  ;;  %v6713_v32 = vrot.slane %v10165_v57, 7  ;;  %v10193_v31 = vmul.f32 0.25, %v9899_v62  ;;  %v1888_v51 = vsel %vm1475_vm5, %v10160_v33, -inf }
 0x298   :  { %v1762_v20 = vsel %vm1473_vm6, %v1743_v11, 0.0  ;;  %v10167_v23 = vpop.eup %8493  ;;  %v10172_v41 = vmul.f32 %v8492_v34, %v10065_v27  ;;  %v10175_v22 = vmul.f32 %v8492_v34, %v10071_v46  ;;  %v6709_v27 = vrot.slane %v10154_v25, 7 }
 0x299   :  { %v10169_v2 = vadd.f32 %v1762_v20, %v1761_v43  ;;  %v1638_v37 = vrot.slane %v1637_v30, 1  ;;  %v10177_v29 = vpop.eup %8495  ;;  %v1640_v49 = vsel %vm1473_vm6, %v10167_v23, 0.0  ;;  %v1813_v43 = vld [vmem:[%s11993_s4 + $0x60] sm:$0xff]  ;;  %v7082_v15 = vrot.slane %v7081_v0, 4 }
 0x29a   :  { %12204 = vst [vmem:[#allocation94_spill] sm:$0xff] %v10177_v29  ;;  %v1641_v46 = vsel %vm1475_vm5, %v10177_v29, 0.0  ;;  %v1532_v11 = vrot.slane %v1531_v19, 4  ;;  %v10198_v24 = vadd.f32 %v1813_v43, %v10131_v50  ;;  %v1697_v62 = vadd.f32 1e-16, %v10172_v41 }
 0x29b   :  { %12203 = vst [vmem:[#allocation93_spill] sm:$0xff] %v10169_v2  ;;  %v1639_v6 = vadd.f32 %v1638_v37, %v1637_v30  ;;  %v1642_v4 = vadd.f32 %v1641_v46, %v1640_v49  ;;  %v7077_v30 = vmul.f32 %v7056_v13, %v7044_v14  ;;  %v10210_v34 = vsel %vm2327_vm3, 0.0, %v6709_v27  ;;  %v1815_v13 = vld [vmem:[%s11993_s4 + $0x70] sm:$0xff]  ;;  %v10226_v14 = vld [vmem:[%s11992_s3 + $0x38] sm:$0xff] }
 0x29c   :  { %v1533_v20 = vmax.f32 %v1531_v19, %v1532_v11  ;;  %v1887_v37 = vsel %vm1473_vm6, %v10198_v24, -inf  ;;  %v10215_v49 = vsel %vm2327_vm3, 0.0, %v6713_v32  ;;  %v10218_v63 = vadd.f32 %v1816_v40, %v10193_v31 }
 0x29d   :  { %v1643_v44 = vrot.slane %v1642_v4, 4  ;;  %8499 = vrcp.f32 %v1639_v6  ;;  %v1889_v46 = vmax.f32 %v1887_v37, %v1888_v51  ;;  %v6711_v19 = vrot.slane %v10206_v9, 7 }
 0x29e   :  { %v7083_v27 = vadd.f32 %v7082_v15, %v7081_v0  ;;  %v1534_v6 = vrot.slane %v1533_v20, 2  ;;  %v1539_v32 = vsel %vm1475_vm5, %v10193_v31, -inf  ;;  %8501 = vlog2.f32 %v1697_v62 }
 0x29f   :  { %v1644_v43 = vadd.f32 %v1643_v44, %v1642_v4  ;;  %v10232_v4 = vmul.f32 0.25, %v9907_v60  ;;  %v7109_v11 = vsel %vm1473_vm6, %v7077_v30, 0.0  ;;  %v1890_v40 = vrot.slane %v1889_v46, 4  ;;  %v10235_v44 = vpop.permute.xlu0 %6786 }
 0x2a0   :  { %v1535_v37 = vmax.f32 %v1533_v20, %v1534_v6  ;;  %v6715_v15 = vrot.slane %v10226_v14, 7  ;;  %v1897_v60 = vsel %vm1475_vm5, %v10218_v63, -inf  ;;  %v8498_v54 = vpop.eup %8497  ;;  %v7084_v30 = vrot.slane %v7083_v27, 2 }
 0x2a1   :  { %v1645_v51 = vrot.slane %v1644_v43, 2  ;;  %v1538_v55 = vsel %vm1473_vm6, %v10232_v4, -inf  ;;  %v10240_v0 = vadd.f32 %v1815_v13, %v10232_v4  ;;  %v1891_v3 = vmax.f32 %v1889_v46, %v1890_v40 }
 0x2a2   :  { %v1540_v62 = vmax.f32 %v1538_v55, %v1539_v32  ;;  %v7110_v53 = vrot.slane %v7109_v11, 4  ;;  %v1536_v48 = vrot.slane %v1535_v37, 1  ;;  %v10248_v13 = vsub.s32 0, %v9825_v47 }
 0x2a3   :  { %v1646_v39 = vadd.f32 %v1645_v51, %v1644_v43  ;;  %v1896_v20 = vsel %vm1473_vm6, %v10240_v0, -inf  ;;  %v1892_v58 = vrot.slane %v1891_v3, 2  ;;  %v10251_v7 = vsel %vm2327_vm3, 0.0, %v6711_v19  ;;  %v10257_v28 = vpop.permute.xlu0 %6794 }
 0x2a4   :  { %12206 = vst [vmem:[#allocation96_spill] sm:$0xff] %v10248_v13  ;;  %v1944_v43 = vrot.slane %v9883_v45, 4  ;;  %v1537_v46 = vmax.f32 %v1535_v37, %v1536_v48  ;;  %v1898_v51 = vmax.f32 %v1896_v20, %v1897_v60  ;;  %v10255_v55 = vsel %vm2327_vm3, 0.0, %v6715_v15 }
 0x2a5   :  { %v1647_v6 = vrot.slane %v1646_v39, 1  ;;  %v1718_v32 = vmul.f32 0.6931472, %v8498_v54  ;;  %v1893_v56 = vmax.f32 %v1891_v3, %v1892_v58  ;;  %v1541_v2 = vrot.slane %v1540_v62, 4 }
 0x2a6   :  { %v7111_v29 = vadd.f32 %v7110_v53, %v7109_v11  ;;  %v1559_v36 = vsub.f32 %v10131_v50, %v1537_v46  ;;  %v1560_v19 = vsub.f32 %v10125_v8, %v1537_v46  ;;  %v7085_v48 = vadd.f32 %v7084_v30, %v7083_v27 }
 0x2a7   :  { %v1648_v40 = vadd.f32 %v1647_v6, %v1646_v39  ;;  %v10259_v35 = vpop.eup %8499  ;;  %v1957_v37 = vrot.slane %v9909_v38, 4  ;;  %v1894_v58 = vrot.slane %v1893_v56, 1  ;;  %v12087_v3 = vrot.slane %v9976_v10, 4  ;;  %v6836_v46 = vpop.permute.xlu0 %6835 }
 0x2a8   :  { %v10268_v54 = vmul.f32 %v10259_v35, %v10109_v17  ;;  %v12086_v39 = vrot.slane %v10048_v1, 4  ;;  %v1587_v53 = vmul.f32 1.442695, %v1559_v36  ;;  %v1589_v11 = vmul.f32 1.442695, %v1560_v19  ;;  %v8502_v50 = vpop.eup %8501 }
 0x2a9   :  { %8503 = vrcp.f32 %v1648_v40  ;;  %v10273_v8 = vmul.f32 %v1718_v32, %v10095_v16  ;;  %v1895_v15 = vmax.f32 %v1893_v56, %v1894_v58  ;;  %v1542_v60 = vmax.f32 %v1540_v62, %v1541_v2  ;;  %v7145_v56 = vpop.permute.xlu1 %7144 }
 0x2aa   :  { %v7112_v30 = vrot.slane %v7111_v29, 2  ;;  %8505 = vpow2.f32 %v1587_v53  ;;  %v1899_v17 = vrot.slane %v1898_v51, 4  ;;  %v7086_v20 = vrot.slane %v7085_v48, 1 }
 0x2ab   :  { %v1698_v6 = vadd.f32 1e-16, %v10175_v22  ;;  %vm1920_vm13 = vcmp.eq.f32.partialorder %v10198_v24, %v1895_v15  ;;  %vm1921_vm14 = vcmp.eq.f32.partialorder %v10160_v33, %v1895_v15  ;;  %v1543_v36 = vrot.slane %v1542_v60, 2 }
 0x2ac   :  { %v1720_v40 = vmul.f32 0.6931472, %v8502_v50  ;;  %8507 = vpow2.f32 %v1589_v11  ;;  %v1936_v16 = vsel %vm1920_vm13, %v9825_v47, 10  ;;  %v1937_v32 = vsel %vm1921_vm14, %v9857_v52, 10 }
 0x2ad   :  { %v2018_v2 = vsel %vm1473_vm6, %v1936_v16, 2147483647  ;;  %v2019_v62 = vsel %vm1475_vm5, %v1937_v32, 2147483647  ;;  %v1544_v19 = vmax.f32 %v1542_v60, %v1543_v36  ;;  %v1900_v58 = vmax.f32 %v1898_v51, %v1899_v17  ;;  %v6844_v32 = vpop.permute.xlu0 %6843 }
 0x2ae   :  { %v1699_v53 = vadd.f32 1e-16, %v10268_v54  ;;  %vm2020_vm15 = vcmp.lt.s32.totalorder %v2018_v2, %v2019_v62  ;;  %v7087_v24 = vadd.f32 %v7086_v20, %v7085_v48  ;;  %v7113_v33 = vadd.f32 %v7112_v30, %v7111_v29 }
 0x2af   :  { %v10284_v15 = vsel %vm2020_vm15, %v2018_v2, %v2019_v62  ;;  %v1545_v50 = vrot.slane %v1544_v19, 1  ;;  %v1901_v11 = vrot.slane %v1900_v58, 2  ;;  %v7150_v27 = vrot.slane %v7145_v56, %v10248_v13 }
 0x2b0   :  { %vm10290_vm0 = vcmp.lt.s32.totalorder %v9883_v45, %v1944_v43  ;;  %8509 = vlog2.f32 %v1698_v6  ;;  %v6798_v48 = vmul.f32 %v10235_v44, %v10210_v34  ;;  %v7114_v29 = vrot.slane %v7113_v33, 1 }
 0x2b1   :  { %v1546_v30 = vmax.f32 %v1544_v19, %v1545_v50  ;;  %v1902_v17 = vmax.f32 %v1900_v58, %v1901_v11  ;;  %v6802_v20 = vmul.f32 %v10235_v44, %v10215_v49  ;;  %v7178_v36 = vadd.f32 %v7150_v27, %v7087_v24 }
 0x2b2   :  { %v10302_v56 = vmul.f32 %v1720_v40, %v10172_v41  ;;  %8511 = vlog2.f32 %v1699_v53  ;;  %v7115_v2 = vadd.f32 %v7114_v29, %v7113_v33  ;;  %vm10311_vm1 = vcmp.lt.s32.totalorder %v9909_v38, %v1957_v37 }
 0x2b3   :  { %v10297_v60 = vpop.eup %8503  ;;  %v1561_v44 = vsub.f32 %v10232_v4, %v1546_v30  ;;  %v1562_v41 = vsub.f32 %v10193_v31, %v1546_v30  ;;  %v1903_v40 = vrot.slane %v1902_v17, 1  ;;  %v6800_v58 = vmul.f32 %v10257_v28, %v10251_v7 }
 0x2b4   :  { %v10306_v6 = vmul.f32 %v10297_v60, %v10167_v23  ;;  %v10318_v62 = vpop.eup %8505  ;;  %v7182_v19 = vadd.f32 %v7150_v27, %v7115_v2  ;;  %v7696_v23 = vmul.f32 -1.442695, %v7178_v36  ;;  %v6804_v53 = vmul.f32 %v10257_v28, %v10255_v55  ;;  %v6893_v28 = vpop.permute.xlu0 %6892 }
 0x2b5   :  { %v1649_v24 = vsel %vm1473_vm6, %v10318_v62, 0.0  ;;  %v1591_v33 = vmul.f32 1.442695, %v1561_v44  ;;  %v1593_v50 = vmul.f32 1.442695, %v1562_v41  ;;  %v1904_v11 = vmax.f32 %v1902_v17, %v1903_v40 }
 0x2b6   :  { %v10326_v4 = vpop.eup %8507  ;;  %v7700_v31 = vmul.f32 -1.442695, %v7182_v19  ;;  %v6847_v29 = vmul.f32 %v6836_v46, %v10154_v25  ;;  %v6851_v27 = vmul.f32 %v6836_v46, %v10165_v57  ;;  %v6849_v30 = vmul.f32 %v6844_v32, %v10206_v9 }
 0x2b7   :  { %v1650_v7 = vsel %vm1475_vm5, %v10326_v4, 0.0  ;;  %8513 = vpow2.f32 %v1591_v33  ;;  %vm1922_vm2 = vcmp.eq.f32.partialorder %v10240_v0, %v1904_v11  ;;  %vm1923_vm7 = vcmp.eq.f32.partialorder %v10218_v63, %v1904_v11 }
 0x2b8   :  { %v10336_v55 = vadd.f32 1e-16, %v10306_v6  ;;  %v1651_v17 = vadd.f32 %v1650_v7, %v1649_v24  ;;  %8515 = vpow2.f32 %v1593_v50  ;;  %v1938_v36 = vsel %vm1922_vm2, %v9825_v47, 10 }
 0x2b9   :  { %v1939_v46 = vsel %vm1923_vm7, %v9857_v52, 10  ;;  %v2031_v2 = vsel %vm1473_vm6, %v1938_v36, 2147483647  ;;  %8517 = vpow2.f32 %v7696_v23  ;;  %v6853_v44 = vmul.f32 %v6844_v32, %v10226_v14 }
 0x2ba   :  { %v10342_v41 = vpop.eup %8509  ;;  %v1652_v0 = vrot.slane %v1651_v17, 4  ;;  %v2032_v63 = vsel %vm1475_vm5, %v1939_v46, 2147483647  ;;  %8519 = vpow2.f32 %v7700_v31  ;;  %v10345_v40 = vadd.f32 %v6847_v29, %v6798_v48  ;;  %v10363_v31 = vpop.permute.xlu0 %6900 }
 0x2bb   :  { %vm2033_vm8 = vcmp.lt.s32.totalorder %v2031_v2, %v2032_v63  ;;  %v10347_v19 = vadd.f32 %v6851_v27, %v6802_v20  ;;  %v10349_v24 = vadd.f32 %v6849_v30, %v6800_v58  ;;  %v1946_v23 = vsel %vm10290_vm0, %v9883_v45, %v1944_v43 }
 0x2bc   :  { %v10356_v32 = vpop.eup %8511  ;;  %v1653_v33 = vadd.f32 %v1652_v0, %v1651_v17  ;;  %v10358_v50 = vsel %vm2033_vm8, %v2031_v2, %v2032_v63  ;;  %v10360_v11 = vadd.f32 %v6853_v44, %v6804_v53  ;;  %v1947_v48 = vrot.slane %v1946_v23, 2 }
 0x2bd   :  { %v6733_v20 = vrot.slane %v10154_v25, 1  ;;  %vm10368_vm10 = vcmp.lt.s32.totalorder %v9976_v10, %v12087_v3  ;;  %vm8708_vm12 = vmmov 0   ;;  %v12092_v43 = vmov 0.0  }
 0x2be   :  { %v1654_v45 = vrot.slane %v1653_v33, 2  ;;  %vm1948_vm11 = vcmp.lt.s32.totalorder %v1946_v23, %v1947_v48  ;;  %7956 = vmatprep.mubr.msk.f32.mxu0 %vm8708_vm12, %v12092_v43  ;;  %v6737_v16 = vrot.slane %v10165_v57, 1  ;;  %v1959_v53 = vsel %vm10311_vm1, %v9909_v38, %v1957_v37  ;;  %7963 = vmatprep.mubr.msk.f32.mxu1 %vm8708_vm12, %v12092_v43 }
 0x2bf   :  { %v1949_v27 = vsel %vm1948_vm11, %v1946_v23, %v1947_v48  ;;  %v6749_v30 = vsel %vm12090_vm4, %v6733_v20, 0.0  ;;  %v1960_v7 = vrot.slane %v1959_v53, 2  ;;  %vm10387_vm13 = vcmp.lt.s32.totalorder %v10048_v1, %v12086_v39 }
 0x2c0   :  { %v12215_v36 = vrot.slane %v10089_v59, 4  ;;  %v10398_v37 = vadd.f32 %v1654_v45, %v1653_v33  ;;  %v1950_v34 = vrot.slane %v1949_v27, 1  ;;  %v6753_v46 = vsel %vm12090_vm4, %v6737_v16, 0.0 }
 0x2c1   :  { %v10401_v2 = vpop.eup %8513  ;;  %v6904_v44 = vmul.f32 %v6893_v28, %v6749_v30  ;;  %v6908_v0 = vmul.f32 %v6893_v28, %v6753_v46  ;;  %vm1961_vm15 = vcmp.lt.s32.totalorder %v1959_v53, %v1960_v7  ;;  %v6735_v63 = vrot.slane %v10206_v9, 1  ;;  %v6950_v46 = vpop.permute.xlu0 %6949 }
 0x2c2   :  { %vm10394_vm14 = vcmp.lt.s32.totalorder %v10089_v59, %v12215_v36  ;;  %v10404_v23 = vpop.eup %8515  ;;  %v1658_v48 = vsel %vm1473_vm6, %v10401_v2, 0.0  ;;  %vm1951_vm0 = vcmp.lt.s32.totalorder %v1949_v27, %v1950_v34  ;;  %v1962_v20 = vsel %vm1961_vm15, %v1959_v53, %v1960_v7 }
 0x2c3   :  { %v6739_v33 = vrot.slane %v10226_v14, 1  ;;  %v8518_v45 = vpop.eup %8517  ;;  %v1659_v16 = vsel %vm1475_vm5, %v10404_v23, 0.0  ;;  %v1952_v30 = vsel %vm1951_vm0, %v1949_v27, %v1950_v34  ;;  %v1963_v28 = vrot.slane %v1962_v20, 1 }
 0x2c4   :  { %v8520_v29 = vpop.eup %8519  ;;  %v1660_v49 = vadd.f32 %v1659_v16, %v1658_v48  ;;  %v7210_v51 = vadd.f32 1.0, %v8518_v45  ;;  %vm2044_vm1 = vcmp.eq.s32.totalorder %v9825_v47, %v1952_v30  ;;  %v6751_v39 = vsel %vm12090_vm4, %v6735_v63, 0.0 }
 0x2c5   :  { %v7214_v3 = vadd.f32 1.0, %v8520_v29  ;;  %vm2045_vm2 = vcmp.eq.s32.totalorder %v9857_v52, %v1952_v30  ;;  %v7336_v53 = vsel %vm2044_vm1, 1.0, %v12092_v43  ;;  %vm1964_vm7 = vcmp.lt.s32.totalorder %v1962_v20, %v1963_v28  ;;  %vm10435_vm0 = vmpackc.low %vm2658_vm9, %vm2044_vm1 }
 0x2c6   :  { %v1661_v7 = vrot.slane %v1660_v49, 4  ;;  %vm7234_vm8 = vcmask 73728   ;;  %8521 = vrcp.f32 %v7210_v51  ;;  %v7337_v27 = vsel %vm2045_vm2, 1.0, %v12092_v43  ;;  %2092 = vst.msk [vmem:[%s11997_s8] sm:$0xff] %vm1473_vm6, %v7336_v53  ;;  %v6958_v53 = vpop.permute.xlu0 %6957 }
 0x2c7   :  { %v1965_v34 = vsel %vm1964_vm7, %v1962_v20, %v1963_v28  ;;  %8523 = vrcp.f32 %v7214_v3  ;;  %2093 = vst.msk [vmem:[%s11997_s8 + $0x8] sm:$0x3] %vm1475_vm5, %v7337_v27  ;;  %v12088_v29 = vmov 1.0   ;;  %v12218_v48 = vmov 0 }
 0x2c8   :  { %v10428_v63 = vpack.c.bf16 %v7337_v27, %v12088_v29  ;;  %vm2046_vm11 = vcmp.eq.s32.totalorder %v9825_v47, %v1965_v34  ;;  %vm2047_vm15 = vcmp.eq.s32.totalorder %v9857_v52, %v1965_v34  ;;  %v1662_v51 = vadd.f32 %v1661_v7, %v1660_v49 }
 0x2c9   :  { %v12219_v48 = vsel %vm10435_vm0, 4294967295, %v12218_v48  ;;  %v7338_v3 = vsel %vm2046_vm11, 1.0, %v12092_v43  ;;  %v7339_v20 = vsel %vm2047_vm15, 1.0, %v12092_v43  ;;  %v6755_v45 = vsel %vm12090_vm4, %v6739_v33, 0.0  ;;  %vm10468_vm1 = vmpackc.low %vm2658_vm9, %vm2046_vm11 }
 0x2ca   :  { %12220 = vst [vmem:[#allocation97_spill] sm:$0xff] %v12219_v48  ;;  %8227 = vmatpush3.bf16.msk.msra.mxu0 %vm10435_vm0, %v10428_v63  ;;  %2094 = vst.msk [vmem:[%s11997_s8 + $0x10] sm:$0xff] %vm1473_vm6, %v7338_v3  ;;  %v10456_v49 = vpack.c.bf16 %v7339_v20, %v12088_v29  ;;  %v6906_v16 = vmul.f32 %v10363_v31, %v6751_v39  ;;  %v6910_v33 = vmul.f32 %v10363_v31, %v6755_v45  ;;  %v12223_v27 = vmov 0 }
 0x2cb   :  { %2095 = vst.msk [vmem:[%s11997_s8 + $0x18] sm:$0x3] %vm1475_vm5, %v7339_v20  ;;  %v12222_v30 = vrot.slane %v9976_v10, 4  ;;  %v1663_v7 = vrot.slane %v1662_v51, 2  ;;  %v12224_v27 = vsel %vm10468_vm1, 4294967295, %v12223_v27  ;;  %v12226_v3 = vmov 0.0|0.0  }
 0x2cc   :  { %12221 = vst [vmem:[#allocation98_spill] sm:$0xff] %v10456_v49  ;;  %12225 = vst [vmem:[#allocation99_spill] sm:$0xff] %v12224_v27  ;;  %8232 = vmatprep.subr.bf16.mxu0 %v12226_v3  ;;  %v6912_v31 = vadd.f32 %v6904_v44, %v10345_v40  ;;  %v6916_v20 = vadd.f32 %v6908_v0, %v10347_v19  ;;  %8231 = vmatpush3.bf16.msk.msra.mxu1 %vm10468_vm1, %v10456_v49  ;;  %v12229_v19 = vrot.slane %v10157_v18, 4 }
 0x2cd   :  { %v1972_v28 = vsel %vm10368_vm10, %v9976_v10, %v12222_v30  ;;  %v12227_v10 = vrot.slane %v10048_v1, 4  ;;  %v6914_v34 = vadd.f32 %v6906_v16, %v10349_v24  ;;  %v6918_v45 = vadd.f32 %v6910_v33, %v10360_v11  ;;  %7957 = vmatmul.mubr.msk.f32.vlgmr.msra.gmra.mrb[16].mxu0 %vm1473_vm6, %v9625_v5  ;;  %8236 = vmatprep.subr.bf16.mxu1 %v12226_v3 }
 0x2ce   :  { %v1973_v39 = vrot.slane %v1972_v28, 2  ;;  %v12228_v30 = vmov %v12215_v36  ;;  %vm10495_vm10 = vcmp.lt.s32.totalorder %v10157_v18, %v12229_v19  ;;  %v10499_v17 = vadd.f32 %v1663_v7, %v1662_v51  ;;  %7970 = vmatprep.mubr.msk.f32.mxu0 %vm8708_vm12, %v12092_v43 }
 0x2cf   :  { %v1985_v58 = vsel %vm10387_vm13, %v10048_v1, %v12227_v10  ;;  %v10490_v40 = vsel %vm10394_vm14, %v10089_v59, %v12228_v30  ;;  %v10504_v1 = vadd.f32 %v6950_v46, %v6912_v31  ;;  %v12232_v59 = vrot.slane %v10284_v15, 4  ;;  %7964 = vmatmul.mubr.msk.f32.vlgmr.msra.gmra.mrb[16].mxu1 %vm1473_vm6, %v9583_v61 }
 0x2d0   :  { %vm1974_vm13 = vcmp.lt.s32.totalorder %v1972_v28, %v1973_v39  ;;  %v1986_v24 = vrot.slane %v1985_v58, 2  ;;  %v10515_v0 = vadd.f32 %v6950_v46, %v6916_v20  ;;  %v10517_v51 = vadd.f32 %v6958_v53, %v6914_v34  ;;  %7977 = vmatprep.mubr.msk.f32.mxu1 %vm8708_vm12, %v12092_v43  ;;  %v10541_v34 = vpop.permute.xlu0 %6456 }
 0x2d1   :  { %vm10509_vm14 = vcmp.lt.s32.totalorder %v10284_v15, %v12232_v59  ;;  %v1975_v38 = vsel %vm1974_vm13, %v1972_v28, %v1973_v39  ;;  %v10519_v16 = vadd.f32 %v6958_v53, %v6918_v45  ;;  %v6969_v7 = vmul.f32 %v10504_v1, %v10504_v1  ;;  %12238 = vst [vmem:[#allocation100_spill] sm:$0xff] %v10541_v34  ;;  %v10543_v45 = vpop.eup %8521 }
 0x2d2   :  { %v1976_v33 = vrot.slane %v1975_v38, 1  ;;  %vm1987_vm2 = vcmp.lt.s32.totalorder %v1985_v58, %v1986_v24  ;;  %v1999_v31 = vrot.slane %v10490_v40, 2  ;;  %v12235_v28 = vrot.slane %v10358_v50, 4  ;;  %12239 = vst [vmem:[#allocation101_spill] sm:$0xff] %v10543_v45  ;;  %7243 = vst.msk [vmem:[%s11998_s9 + $0x1] sm:$0x1] %vm7234_vm8, %v10543_v45 }
 0x2d3   :  { %v6973_v53 = vmul.f32 %v10515_v0, %v10515_v0  ;;  %v1988_v39 = vsel %vm1987_vm2, %v1985_v58, %v1986_v24  ;;  %v6971_v20 = vmul.f32 %v10517_v51, %v10517_v51  ;;  %v6975_v10 = vmul.f32 %v10519_v16, %v10519_v16  ;;  %v10551_v24 = vpop.eup %8523 }
 0x2d4   :  { %vm10529_vm7 = vcmp.lt.s32.totalorder %v10358_v50, %v12235_v28  ;;  %vm1977_vm11 = vcmp.lt.s32.totalorder %v1975_v38, %v1976_v33  ;;  %v6977_v30 = vmul.f32 %v6969_v7, %v10504_v1  ;;  %v1989_v19 = vrot.slane %v1988_v39, 1  ;;  %12242 = vst [vmem:[#allocation102_spill] sm:$0xff] %v10551_v24  ;;  %7247 = vst.msk [vmem:[%s11998_s9 + $0x11] sm:$0x1] %vm7234_vm8, %v10551_v24  ;;  %v10594_v24 = vpop.permute.xlu0 %6464 }
 0x2d5   :  { %vm10547_vm15 = vcmp.lt.s32.totalorder %v10490_v40, %v1999_v31  ;;  %v1978_v59 = vsel %vm1977_vm11, %v1975_v38, %v1976_v33  ;;  %v6981_v28 = vmul.f32 %v6973_v53, %v10515_v0  ;;  %v6979_v36 = vmul.f32 %v6971_v20, %v10517_v51  ;;  %12246 = vst [vmem:[#allocation103_spill] sm:$0xff] %v10594_v24 }
 0x2d6   :  { %v6983_v7 = vmul.f32 %v6975_v10, %v10519_v16  ;;  %vm2048_vm13 = vcmp.eq.s32.totalorder %v9825_v47, %v1978_v59  ;;  %vm2049_vm2 = vcmp.eq.s32.totalorder %v9857_v52, %v1978_v59  ;;  %v6985_v29 = vmul.f32 0.044715, %v6977_v30 }
 0x2d7   :  { %vm1990_vm4 = vcmp.lt.s32.totalorder %v1988_v39, %v1989_v19  ;;  %v7340_v38 = vsel %vm2048_vm13, 1.0, %v12092_v43  ;;  %v7341_v33 = vsel %vm2049_vm2, 1.0, %v12092_v43  ;;  %v6989_v53 = vmul.f32 0.044715, %v6981_v28 }
 0x2d8   :  { %v1991_v20 = vsel %vm1990_vm4, %v1988_v39, %v1989_v19  ;;  %2096 = vst.msk [vmem:[%s11997_s8 + $0x20] sm:$0xff] %vm1473_vm6, %v7340_v38  ;;  %v12243_v10 = vmov 1.0   ;;  %v6993_v30 = vadd.f32 %v6985_v29, %v10504_v1  ;;  %vm10585_vm4 = vmpackc.low %vm2658_vm9, %vm2048_vm13 }
 0x2d9   :  { %2097 = vst.msk [vmem:[%s11997_s8 + $0x28] sm:$0x3] %vm1475_vm5, %v7341_v33  ;;  %v10579_v59 = vpack.c.bf16 %v7341_v33, %v12243_v10  ;;  %vm2050_vm11 = vcmp.eq.s32.totalorder %v9825_v47, %v1991_v20  ;;  %vm2051_vm2 = vcmp.eq.s32.totalorder %v9857_v52, %v1991_v20  ;;  %v6997_v19 = vadd.f32 %v6989_v53, %v10515_v0 }
 0x2da   :  { %v7342_v28 = vsel %vm2050_vm11, 1.0, %v12092_v43  ;;  %v7343_v38 = vsel %vm2051_vm2, 1.0, %v12092_v43  ;;  %v6987_v33 = vmul.f32 0.044715, %v6979_v36  ;;  %v7001_v29 = vmul.f32 0.7978846, %v6993_v30  ;;  %vm10616_vm13 = vmpackc.low %vm2658_vm9, %vm2050_vm11 }
 0x2db   :  { %8235 = vmatpush3.bf16.msk.msra.mxu0 %vm10585_vm4, %v10579_v59  ;;  %2098 = vst.msk [vmem:[%s11997_s8 + $0x30] sm:$0xff] %vm1473_vm6, %v7342_v28  ;;  %v10608_v53 = vpack.c.bf16 %v7343_v38, %v12243_v10  ;;  %v6991_v36 = vmul.f32 0.044715, %v6983_v7  ;;  %v2001_v43 = vsel %vm10547_vm15, %v10490_v40, %v1999_v31  ;;  %v7005_v45 = vmul.f32 0.7978846, %v6997_v19 }
 0x2dc   :  { %2099 = vst.msk [vmem:[%s11997_s8 + $0x38] sm:$0x3] %vm1475_vm5, %v7343_v38  ;;  %v6995_v28 = vadd.f32 %v6987_v33, %v10517_v51  ;;  %8240 = vmatprep.subr.bf16.mxu0 %v12226_v3  ;;  %v2002_v24 = vrot.slane %v2001_v43, 1  ;;  %v12249_v38 = vrot.slane %v10157_v18, 4  ;;  %8525 = vtanh.f32 %v7001_v29 }
 0x2dd   :  { %8239 = vmatpush3.bf16.msk.msra.mxu1 %vm10616_vm13, %v10608_v53  ;;  %v6999_v40 = vadd.f32 %v6991_v36, %v10519_v16  ;;  %v12250_v7 = vrot.slane %v10284_v15, 4  ;;  %8527 = vtanh.f32 %v7005_v45  ;;  %v12251_v29 = vmov 0.0  }
 0x2de   :  { %v2011_v58 = vsel %vm10495_vm10, %v10157_v18, %v12249_v38  ;;  %7971 = vmatmul.mubr.msk.f32.vlgmr.msra.gmra.mrb[18].mxu0 %vm1473_vm6, %v9636_v12  ;;  %v7003_v44 = vmul.f32 0.7978846, %v6995_v28  ;;  %vm2003_vm10 = vcmp.lt.s32.totalorder %v2001_v43, %v2002_v24  ;;  %8244 = vmatprep.subr.bf16.mxu1 %v12226_v3  ;;  %v12252_v36 = vrot.slane %v10358_v50, 4 }
 0x2df   :  { %v2012_v31 = vrot.slane %v2011_v58, 2  ;;  %v2024_v20 = vsel %vm10509_vm14, %v10284_v15, %v12250_v7  ;;  %v7007_v19 = vmul.f32 0.7978846, %v6999_v40  ;;  %v2004_v33 = vsel %vm2003_vm10, %v2001_v43, %v2002_v24  ;;  %7984 = vmatprep.mubr.msk.f32.mxu0 %vm8708_vm12, %v12251_v29  ;;  %v10650_v43 = vpop.permute.xlu0 %7060 }
 0x2e0   :  { %v2025_v18 = vrot.slane %v2024_v20, 2  ;;  %v2037_v15 = vsel %vm10529_vm7, %v10358_v50, %v12252_v36  ;;  %8529 = vtanh.f32 %v7003_v44  ;;  %7978 = vmatmul.mubr.msk.f32.vlgmr.msra.gmra.mrb[18].mxu1 %vm1473_vm6, %v9655_v21  ;;  %vm2052_vm14 = vcmp.eq.s32.totalorder %v9825_v47, %v2004_v33 }
 0x2e1   :  { %vm2013_vm15 = vcmp.lt.s32.totalorder %v2011_v58, %v2012_v31  ;;  %vm2053_vm11 = vcmp.eq.s32.totalorder %v9857_v52, %v2004_v33  ;;  %8531 = vtanh.f32 %v7007_v19  ;;  %v7344_v45 = vsel %vm2052_vm14, 1.0, %v12251_v29  ;;  %7991 = vmatprep.mubr.msk.f32.mxu1 %vm8708_vm12, %v12251_v29  ;;  %vm10680_vm2 = vmpackc.low %vm2658_vm9, %vm2052_vm14 }
 0x2e2   :  { %v2014_v11 = vsel %vm2013_vm15, %v2011_v58, %v2012_v31  ;;  %v7345_v24 = vsel %vm2053_vm11, 1.0, %v12251_v29  ;;  %v10660_v50 = vsel %vm1473_vm6, %v10302_v56, 0.0  ;;  %2100 = vst.msk [vmem:[%s11997_s8 + $0x40] sm:$0xff] %vm1473_vm6, %v7344_v45  ;;  %vm2026_vm7 = vcmp.lt.s32.totalorder %v2024_v20, %v2025_v18 }
 0x2e3   :  { %v2015_v46 = vrot.slane %v2014_v11, 1  ;;  %2101 = vst.msk [vmem:[%s11997_s8 + $0x48] sm:$0x3] %vm1475_vm5, %v7345_v24  ;;  %v10671_v28 = vpack.c.bf16 %v7345_v24, %v12243_v10  ;;  %v2038_v38 = vrot.slane %v2037_v15, 2  ;;  %v10674_v58 = vmul.f32 0.6931472, %v10356_v32  ;;  %v10700_v33 = vpop.permute.xlu0 %7070 }
 0x2e4   :  { %8533 = vlog2.f32 %v10336_v55  ;;  %v2027_v40 = vsel %vm2026_vm7, %v2024_v20, %v2025_v18  ;;  %v12255_v31 = vrot.slane %v10398_v37, 1  ;;  %v1665_v20 = vrot.slane %v10499_v17, 1  ;;  %v12256_v24 = vld [vmem:[#allocation89_spill] sm:$0xff] }
 0x2e5   :  { %vm2016_vm10 = vcmp.lt.s32.totalorder %v2014_v11, %v2015_v46  ;;  %8243 = vmatpush3.bf16.msk.msra.mxu0 %vm10680_vm2, %v10671_v28  ;;  %v2028_v55 = vrot.slane %v2027_v40, 1  ;;  %vm2039_vm15 = vcmp.lt.s32.totalorder %v2037_v15, %v2038_v38 }
 0x2e6   :  { %v10687_v7 = vadd.f32 %v12255_v31, %v10398_v37  ;;  %v2017_v32 = vsel %vm2016_vm10, %v2014_v11, %v2015_v46  ;;  %8248 = vmatprep.subr.bf16.mxu0 %v12226_v3  ;;  %v2040_v44 = vsel %vm2039_vm15, %v2037_v15, %v2038_v38  ;;  %v8526_v36 = vpop.eup %8525  ;;  %v1666_v45 = vadd.f32 %v1665_v20, %v10499_v17 }
 0x2e7   :  { %vm2054_vm11 = vcmp.eq.s32.totalorder %v9825_v47, %v2017_v32  ;;  %vm2055_vm14 = vcmp.eq.s32.totalorder %v9857_v52, %v2017_v32  ;;  %vm2029_vm7 = vcmp.lt.s32.totalorder %v2027_v40, %v2028_v55  ;;  %v2041_v19 = vrot.slane %v2040_v44, 1  ;;  %v8528_v38 = vpop.eup %8527 }
 0x2e8   :  { %v7346_v37 = vsel %vm2054_vm11, 1.0, %v12251_v29  ;;  %v7347_v18 = vsel %vm2055_vm14, 1.0, %v12251_v29  ;;  %7985 = vmatmul.mubr.msk.f32.vlgmr.msra.gmra.mrb[20].mxu0 %vm1473_vm6, %v9628_v26  ;;  %v2030_v11 = vsel %vm2029_vm7, %v2027_v40, %v2028_v55  ;;  %v10718_v46 = vmul.f32 %v10259_v35, %v12256_v24  ;;  %vm10723_vm10 = vmpackc.low %vm2658_vm9, %vm2054_vm11 }
 0x2e9   :  { %2102 = vst.msk [vmem:[%s11997_s8 + $0x50] sm:$0xff] %vm1473_vm6, %v7346_v37  ;;  %v10713_v15 = vpack.c.bf16 %v7347_v18, %v12243_v10  ;;  %vm2056_vm15 = vcmp.eq.s32.totalorder %v9825_v47, %v2030_v11  ;;  %vm2057_vm14 = vcmp.eq.s32.totalorder %v9857_v52, %v2030_v11  ;;  %7998 = vmatprep.mubr.msk.f32.mxu0 %vm8708_vm12, %v12251_v29  ;;  %v7017_v17 = vadd.f32 1.0, %v8526_v36 }
 0x2ea   :  { %2103 = vst.msk [vmem:[%s11997_s8 + $0x58] sm:$0x3] %vm1475_vm5, %v7347_v18  ;;  %vm2042_vm7 = vcmp.lt.s32.totalorder %v2040_v44, %v2041_v19  ;;  %v7348_v35 = vsel %vm2056_vm15, 1.0, %v12251_v29  ;;  %v7349_v40 = vsel %vm2057_vm14, 1.0, %v12251_v29  ;;  %v7021_v32 = vadd.f32 1.0, %v8528_v38  ;;  %v8530_v20 = vpop.eup %8529 }
 0x2eb   :  { %8247 = vmatpush3.bf16.msk.msra.mxu1 %vm10723_vm10, %v10713_v15  ;;  %v2043_v55 = vsel %vm2042_vm7, %v2040_v44, %v2041_v19  ;;  %2104 = vst.msk [vmem:[%s11997_s8 + $0x60] sm:$0xff] %vm1473_vm6, %v7348_v35  ;;  %v10747_v37 = vpack.c.bf16 %v7349_v40, %v12243_v10  ;;  %v7025_v18 = vmul.f32 0.5, %v7017_v17  ;;  %v8532_v44 = vpop.eup %8531  ;;  %vm10755_vm7 = vmpackc.low %vm2658_vm9, %vm2056_vm15  ;;  %v7019_v17 = vadd.f32 1.0, %v8530_v20  ;;  %v12261_v35 = vld [vmem:[#allocation40_spill] sm:$0xff]  ;;  %v12262_v20 = vld [vmem:[#allocation94_spill] sm:$0xff] }
 0x2ec   :  { %2105 = vst.msk [vmem:[%s11997_s8 + $0x68] sm:$0x3] %vm1475_vm5, %v7349_v40  ;;  %8252 = vmatprep.subr.bf16.mxu1 %v12226_v3  ;;  %vm2058_vm11 = vcmp.eq.s32.totalorder %v9825_v47, %v2043_v55  ;;  %vm2059_vm14 = vcmp.eq.s32.totalorder %v9857_v52, %v2043_v55  ;;  %v7029_v36 = vmul.f32 0.5, %v7021_v32  ;;  %v7023_v40 = vadd.f32 1.0, %v8532_v44  ;;  %v7154_v32 = vpop.permute.xlu0 %7153 }
 0x2ed   :  { %v7350_v24 = vsel %vm2058_vm11, 1.0, %v12251_v29  ;;  %v7351_v38 = vsel %vm2059_vm14, 1.0, %v12251_v29  ;;  %8251 = vmatpush3.bf16.msk.msra.mxu0 %vm10755_vm7, %v10747_v37  ;;  %v7033_v52 = vmul.f32 %v7025_v18, %v10504_v1  ;;  %v10782_v34 = vmul.f32 %v10297_v60, %v12262_v20  ;;  %vm10789_vm15 = vmpackc.low %vm2658_vm9, %vm2058_vm11 }
 0x2ee   :  { %7992 = vmatmul.mubr.msk.f32.vlgmr.msra.gmra.mrb[20].mxu1 %vm1473_vm6, %v12261_v35  ;;  %2106 = vst.msk [vmem:[%s11997_s8 + $0x70] sm:$0xff] %vm1473_vm6, %v7350_v24  ;;  %v10778_v11 = vpack.c.bf16 %v7351_v38, %v12243_v10  ;;  %v8534_v1 = vpop.eup %8533  ;;  %v7037_v18 = vmul.f32 %v7029_v36, %v10515_v0  ;;  %8256 = vmatprep.subr.bf16.mxu0 %v12226_v3  ;;  %v7027_v10 = vmul.f32 0.5, %v7019_v17  ;;  %8535 = vrcp.f32 %v10687_v7  ;;  %v12265_v36 = vld [vmem:[#allocation48_spill] sm:$0xff] }
 0x2ef   :  { %2107 = vst.msk [vmem:[%s11997_s8 + $0x78] sm:$0x3] %vm1475_vm5, %v7351_v38  ;;  %8005 = vmatprep.mubr.msk.f32.mxu1 %vm8708_vm12, %v12251_v29  ;;  %v1700_v60 = vadd.f32 1e-16, %v10718_v46  ;;  %v7041_v44 = vadd.f32 %v7033_v52, %v10154_v25  ;;  %v7031_v47 = vmul.f32 0.5, %v7023_v40  ;;  %8537 = vrcp.f32 %v1666_v45  ;;  %v12266_v52 = vld [vmem:[#allocation52_spill] sm:$0xff] }
 0x2f0   :  { %8255 = vmatpush3.bf16.msk.msra.mxu1 %vm10789_vm15, %v10778_v11  ;;  %v1702_v0 = vadd.f32 1e-16, %v10782_v34  ;;  %v7045_v55 = vadd.f32 %v7037_v18, %v10165_v57  ;;  %7999 = vmatmul.mubr.msk.f32.vlgmr.msra.gmra.mrb[22].mxu0 %vm1473_vm6, %v12265_v36  ;;  %v7035_v38 = vmul.f32 %v7027_v10, %v10517_v51  ;;  %v1722_v7 = vmul.f32 0.6931472, %v10342_v41 }
 0x2f1   :  { %8260 = vmatprep.subr.bf16.mxu1 %v12226_v3  ;;  %8539 = vlog2.f32 %v1700_v60  ;;  %v7074_v25 = vmul.f32 %v10650_v43, %v7041_v44  ;;  %8259 = vmatpush3.bf16.msk.msra.mxu0 %vm10435_vm0, %v10428_v63  ;;  %v7039_v45 = vmul.f32 %v7031_v47, %v10519_v16  ;;  %v1728_v17 = vmul.f32 0.6931472, %v8534_v1 }
 0x2f2   :  { %8541 = vlog2.f32 %v1702_v0  ;;  %8012 = vmatprep.mubr.msk.f32.mxu0 %vm8708_vm12, %v12251_v29  ;;  %v7078_v57 = vmul.f32 %v10650_v43, %v7045_v55  ;;  %v7043_v51 = vadd.f32 %v7035_v38, %v10206_v9  ;;  %v1746_v41 = vmul.f32 %v1722_v7, %v10175_v22  ;;  %8264 = vmatprep.subr.bf16.mxu0 %v12226_v3  ;;  %v7172_v9 = vpop.permute.xlu0 %7171  ;;  %v12267_v43 = vld [vmem:[#allocation93_spill] sm:$0xff] }
 0x2f3   :  { %8006 = vmatmul.mubr.msk.f32.vlgmr.msra.gmra.mrb[22].mxu1 %vm1473_vm6, %v12266_v52  ;;  %v1764_v40 = vsel %vm1475_vm5, %v10273_v8, 0.0  ;;  %v1747_v16 = vmul.f32 %v10674_v58, %v10268_v54  ;;  %v7088_v20 = vsel %vm1473_vm6, %v7074_v25, 0.0  ;;  %v7047_v1 = vadd.f32 %v7039_v45, %v10226_v14 }
 0x2f4   :  { %8263 = vmatpush3.bf16.msk.msra.mxu1 %vm10468_vm1, %v10456_v49  ;;  %v1765_v18 = vadd.f32 %v1764_v40, %v12267_v43  ;;  %8019 = vmatprep.mubr.msk.f32.mxu1 %vm8708_vm12, %v12251_v29  ;;  %v7089_v22 = vrot.slane %v7088_v20, 4  ;;  %v7116_v8 = vsel %vm1473_vm6, %v7078_v57, 0.0  ;;  %v7076_v10 = vmul.f32 %v10700_v33, %v7043_v51 }
 0x2f5   :  { %v1749_v54 = vmul.f32 %v1728_v17, %v10306_v6  ;;  %8268 = vmatprep.subr.bf16.mxu1 %v12226_v3  ;;  %v7117_v14 = vrot.slane %v7116_v8, 4  ;;  %v7080_v58 = vmul.f32 %v10700_v33, %v7047_v1  ;;  %v7159_v60 = vrot.slane %v7154_v32, %v10248_v13 }
 0x2f6   :  { %v1767_v44 = vadd.f32 %v10660_v50, %v1765_v18  ;;  %v7090_v47 = vadd.f32 %v7089_v22, %v7088_v20  ;;  %v7102_v0 = vsel %vm1473_vm6, %v7076_v10, 0.0  ;;  %v7177_v55 = vrot.slane %v7172_v9, %v10248_v13 }
 0x2f7   :  { %v1768_v38 = vsel %vm1475_vm5, %v1746_v41, 0.0  ;;  %v7118_v7 = vadd.f32 %v7117_v14, %v7116_v8  ;;  %v7103_v25 = vrot.slane %v7102_v0, 4  ;;  %v7130_v6 = vsel %vm1473_vm6, %v7080_v58, 0.0 }
 0x2f8   :  { %v1769_v45 = vadd.f32 %v1768_v38, %v1767_v44  ;;  %v8536_v17 = vpop.eup %8535  ;;  %v7091_v57 = vrot.slane %v7090_v47, 2  ;;  %v7131_v51 = vrot.slane %v7130_v6, 4  ;;  %v1770_v33 = vsel %vm1473_vm6, %v1747_v16, 0.0 }
 0x2f9   :  { %v1774_v32 = vsel %vm1473_vm6, %v1749_v54, 0.0  ;;  %v8538_v50 = vpop.eup %8537  ;;  %v7119_v40 = vrot.slane %v7118_v7, 2  ;;  %v7104_v20 = vadd.f32 %v7103_v25, %v7102_v0  ;;  %v1686_v1 = vmul.f32 %v8536_v17, %v10318_v62 }
 0x2fa   :  { %v1687_v9 = vmul.f32 %v8536_v17, %v10326_v4  ;;  %v7132_v43 = vadd.f32 %v7131_v51, %v7130_v6  ;;  %v7092_v18 = vadd.f32 %v7091_v57, %v7090_v47  ;;  %v1689_v22 = vmul.f32 %v8538_v50, %v10401_v2 }
 0x2fb   :  { %v8540_v41 = vpop.eup %8539  ;;  %v1690_v8 = vmul.f32 %v8538_v50, %v10404_v23  ;;  %v7105_v14 = vrot.slane %v7104_v20, 2  ;;  %v7120_v58 = vadd.f32 %v7119_v40, %v7118_v7  ;;  %v1703_v16 = vadd.f32 1e-16, %v1686_v1 }
 0x2fc   :  { %v8542_v10 = vpop.eup %8541  ;;  %v1704_v44 = vadd.f32 1e-16, %v1687_v9  ;;  %v7133_v54 = vrot.slane %v7132_v43, 2  ;;  %v7093_v38 = vrot.slane %v7092_v18, 1  ;;  %v1705_v27 = vadd.f32 1e-16, %v1689_v22 }
 0x2fd   :  { %v1706_v0 = vadd.f32 1e-16, %v1690_v8  ;;  %v7121_v25 = vrot.slane %v7120_v58, 1  ;;  %v7106_v62 = vadd.f32 %v7105_v14, %v7104_v20  ;;  %v1726_v49 = vmul.f32 0.6931472, %v8540_v41 }
 0x2fe   :  { %v1730_v4 = vmul.f32 0.6931472, %v8542_v10  ;;  %v7094_v17 = vadd.f32 %v7093_v38, %v7092_v18  ;;  %v7134_v6 = vadd.f32 %v7133_v54, %v7132_v43  ;;  %8543 = vlog2.f32 %v1703_v16 }
 0x2ff   :  { %v1771_v47 = vadd.f32 %v1770_v33, %v1769_v45  ;;  %v7122_v2 = vadd.f32 %v7121_v25, %v7120_v58  ;;  %v7107_v57 = vrot.slane %v7106_v62, 1  ;;  %8545 = vlog2.f32 %v1704_v44 }
 0x300   :  { %v1748_v23 = vmul.f32 %v1726_v49, %v10718_v46  ;;  %v7179_v7 = vadd.f32 %v7159_v60, %v7094_v17  ;;  %v7135_v51 = vrot.slane %v7134_v6, 1  ;;  %8547 = vlog2.f32 %v1705_v27 }
 0x301   :  { %v1750_v50 = vmul.f32 %v1730_v4, %v10782_v34  ;;  %v7183_v40 = vadd.f32 %v7159_v60, %v7122_v2  ;;  %v7108_v48 = vadd.f32 %v7107_v57, %v7106_v62  ;;  %8549 = vlog2.f32 %v1706_v0 }
 0x302   :  { %v1772_v20 = vsel %vm1475_vm5, %v1748_v23, 0.0  ;;  %v7697_v41 = vmul.f32 -1.442695, %v7179_v7  ;;  %v7136_v18 = vadd.f32 %v7135_v51, %v7134_v6 }
 0x303   :  { %v1773_v43 = vadd.f32 %v1772_v20, %v1771_v47  ;;  %v7701_v10 = vmul.f32 -1.442695, %v7183_v40  ;;  %v7181_v45 = vadd.f32 %v7177_v55, %v7108_v48  ;;  %v1776_v46 = vsel %vm1475_vm5, %v1750_v50, 0.0 }
 0x304   :  { %8551 = vpow2.f32 %v7697_v41  ;;  %v7185_v33 = vadd.f32 %v7177_v55, %v7136_v18 }
 0x305   :  { %v1775_v14 = vadd.f32 %v1774_v32, %v1773_v43  ;;  %8553 = vpow2.f32 %v7701_v10  ;;  %v7699_v49 = vmul.f32 -1.442695, %v7181_v45  ;;  %v7694_v45 = vld [vmem:[%s11995_s6 + $0x7e] sm:$0x1] }
 0x306   :  { %v7703_v27 = vmul.f32 -1.442695, %v7185_v33  ;;  %v6547_v33 = vld [vmem:[%s11996_s7] sm:$0xff] }
 0x307   :  { %v1777_v58 = vadd.f32 %v1776_v46, %v1775_v14  ;;  %8555 = vpow2.f32 %v7699_v49  ;;  %v6549_v14 = vld [vmem:[%s11996_s7 + $0x10] sm:$0xff]  ;;  %v7652_v49 = vld [vmem:[%s11995_s6 + $0x68] sm:$0x1]  ;;  %v7654_v46 = vld [vmem:[%s11995_s6 + $0x6a] sm:$0x1] }
 0x308   :  { %v8544_v34 = vpop.eup %8543  ;;  %8557 = vpow2.f32 %v7703_v27  ;;  %v12272_v27 = vld [vmem:[#allocation77_spill] sm:$0xff] }
 0x309   :  { %v8546_v60 = vpop.eup %8545  ;;  %v1732_v16 = vmul.f32 0.6931472, %v8544_v34  ;;  %v12273_v34 = vld [vmem:[#allocation78_spill] sm:$0xff] }
 0x30a   :  { %v8548_v44 = vpop.eup %8547  ;;  %v1734_v54 = vmul.f32 0.6931472, %v8546_v60  ;;  %v6974_v60 = vmul.f32 %v12273_v34, %v12273_v34 }
 0x30b   :  { %v8550_v38 = vpop.eup %8549  ;;  %v1736_v0 = vmul.f32 0.6931472, %v8548_v44  ;;  %v1751_v25 = vmul.f32 %v1732_v16, %v1686_v1 }
 0x30c   :  { %v1738_v48 = vmul.f32 0.6931472, %v8550_v38  ;;  %v1752_v62 = vmul.f32 %v1734_v54, %v1687_v9  ;;  %v6982_v44 = vmul.f32 %v6974_v60, %v12273_v34 }
 0x30d   :  { %v1753_v55 = vmul.f32 %v1736_v0, %v1689_v22  ;;  %v1778_v32 = vsel %vm1473_vm6, %v1751_v25, 0.0 }
 0x30e   :  { %v8552_v4 = vpop.eup %8551  ;;  %v1779_v17 = vadd.f32 %v1778_v32, %v1777_v58  ;;  %v1754_v2 = vmul.f32 %v1738_v48, %v1690_v8  ;;  %v1780_v57 = vsel %vm1475_vm5, %v1752_v62, 0.0  ;;  %v6970_v58 = vmul.f32 %v12272_v27, %v12272_v27 }
 0x30f   :  { %v8554_v6 = vpop.eup %8553  ;;  %v7211_v47 = vadd.f32 1.0, %v8552_v4  ;;  %v1782_v23 = vsel %vm1473_vm6, %v1753_v55, 0.0  ;;  %v6990_v38 = vmul.f32 0.044715, %v6982_v44  ;;  %v10929_v44 = vstv %s11989_s0 }
 0x310   :  { %v7215_v7 = vadd.f32 1.0, %v8554_v6  ;;  %v1781_v51 = vadd.f32 %v1780_v57, %v1779_v17  ;;  %v1784_v20 = vsel %vm1475_vm5, %v1754_v2, 0.0  ;;  %v6978_v16 = vmul.f32 %v6970_v58, %v12272_v27 }
 0x311   :  { %v8556_v50 = vpop.eup %8555  ;;  %8559 = vrcp.f32 %v7211_v47  ;;  %v6998_v25 = vadd.f32 %v6990_v38, %v12273_v34  ;;  %vm12291_vm5 = vcmask 1046528  }
 0x312   :  { %v8558_v40 = vpop.eup %8557  ;;  %8561 = vrcp.f32 %v7215_v7  ;;  %v7213_v1 = vadd.f32 1.0, %v8556_v50  ;;  %v1783_v9 = vadd.f32 %v1782_v23, %v1781_v51  ;;  %v6986_v54 = vmul.f32 0.044715, %v6978_v16  ;;  %v8691_v23 = vld [vmem:[%s11992_s3 + $0x10] sm:$0xff]  ;;  %vm12293_vm9 = vmmov %vm12291_vm5 }
 0x313   :  { %v7217_v22 = vadd.f32 1.0, %v8558_v40  ;;  %v7006_v62 = vmul.f32 0.7978846, %v6998_v25  ;;  %v8692_v51 = vld [vmem:[%s11992_s3 + $0x30] sm:$0xff]  ;;  %vm12304_vm11 = vmmov %vm12291_vm5 }
 0x314   :  { %8563 = vrcp.f32 %v7213_v1  ;;  %v1785_v41 = vadd.f32 %v1784_v20, %v1783_v9  ;;  %v6994_v0 = vadd.f32 %v6986_v54, %v12272_v27  ;;  %vm12310_vm14 = vmmov %vm12291_vm5 }
 0x315   :  { %8565 = vrcp.f32 %v7217_v22 }
 0x316   :  { %1786 = vadd.xlane.f32.xlu1 %v1785_v41  ;;  %v7002_v48 = vmul.f32 0.7978846, %v6994_v0  ;;  %v10933_v0 = vmul.f32 %v10929_v44, %v9625_v5 }
 0x318   :  { %8567 = vtanh.f32 %v7002_v48 }
 0x319   :  { %8569 = vtanh.f32 %v7006_v62 }
 0x31b   :  { %v10858_v8 = vpop.eup %8559 }
 0x31c   :  { %12268 = vst [vmem:[#allocation89_spill] sm:$0xff] %v10858_v8  ;;  %v10860_v18 = vpop.eup %8561  ;;  %7244 = vst.msk [vmem:[%s11998_s9 + $0x5] sm:$0x1] %vm7234_vm8, %v10858_v8  ;;  %v12311_v8 = vld [vmem:[#allocation13_spill] sm:$0xff] }
 0x31d   :  { %12269 = vst [vmem:[#allocation40_spill] sm:$0xff] %v10860_v18  ;;  %7248 = vst.msk [vmem:[%s11998_s9 + $0x15] sm:$0x1] %vm7234_vm8, %v10860_v18 }
 0x31e   :  { %v10872_v43 = vpop.eup %8563 }
 0x31f   :  { %12270 = vst [vmem:[#allocation94_spill] sm:$0xff] %v10872_v43  ;;  %v10874_v10 = vpop.eup %8565  ;;  %7246 = vst.msk [vmem:[%s11998_s9 + $0xd] sm:$0x1] %vm7234_vm8, %v10872_v43 }
 0x320   :  { %12271 = vst [vmem:[#allocation48_spill] sm:$0xff] %v10874_v10  ;;  %7250 = vst.msk [vmem:[%s11998_s9 + $0x1d] sm:$0x1] %vm7234_vm8, %v10874_v10 }
 0x322   :  { %v8568_v55 = vpop.eup %8567 }
 0x323   :  { %v8570_v32 = vpop.eup %8569  ;;  %v7018_v4 = vadd.f32 1.0, %v8568_v55 }
 0x324   :  { %v7022_v17 = vadd.f32 1.0, %v8570_v32 }
 0x325   :  { %v7026_v6 = vmul.f32 0.5, %v7018_v4  ;;  %v10938_v4 = vmul.f32 %v10929_v44, %v9583_v61 }
 0x326   :  { %v7030_v47 = vmul.f32 0.5, %v7022_v17 }
 0x327   :  { %7162 = vperm.xlu1 %8402, %v7694_v45   ;;  %v7034_v2 = vmul.f32 %v7026_v6, %v12272_v27 }
 0x328   :  { %v7038_v57 = vmul.f32 %v7030_v47, %v12273_v34  ;;  %v10924_v34 = vstv %s2654_s11 }
 0x329   :  { %v7042_v7 = vadd.f32 %v8691_v23, %v7034_v2 }
 0x32a   :  { %v7046_v50 = vadd.f32 %v8692_v51, %v7038_v57 }
 0x32b   :  { %6553 = vperm.xlu1 %8402, %v6547_v33   ;;  %v7075_v40 = vmul.f32 %v10263_v42, %v7042_v7 }
 0x32c   :  { %v7079_v1 = vmul.f32 %v10263_v42, %v7046_v50 }
 0x32d   :  { %v7095_v9 = vsel %vm1473_vm6, %v7075_v40, 0.0 }
 0x32e   :  { %v7123_v22 = vsel %vm1473_vm6, %v7079_v1, 0.0  ;;  %v7096_v20 = vrot.slane %v7095_v9, 4 }
 0x32f   :  { %6563 = vperm.xlu1 %8402, %v6549_v14   ;;  %v7124_v41 = vrot.slane %v7123_v22, 4 }
 0x330   :  { %v7097_v45 = vadd.f32 %v7096_v20, %v7095_v9  ;;  %v10960_v20 = vmul.f32 %v10929_v44, %v9636_v12 }
 0x331   :  { %v7125_v33 = vadd.f32 %v7124_v41, %v7123_v22 }
 0x332   :  { %v7098_v14 = vrot.slane %v7097_v45, 2 }
 0x333   :  { %6642 = vperm.xlu1 %8402, %v7652_v49   ;;  %v7126_v49 = vrot.slane %v7125_v33, 2 }
 0x335   :  { %v7127_v27 = vadd.f32 %v7126_v49, %v7125_v33  ;;  %v10966_v49 = vmul.f32 %v10929_v44, %v9655_v21 }
 0x337   :  { %6660 = vperm.xlu1 %8402, %v7654_v46   ;;  %v7099_v46 = vadd.f32 %v7098_v14, %v7097_v45  ;;  %v7128_v60 = vrot.slane %v7127_v27, 1 }
 0x339   :  { %v7100_v42 = vrot.slane %v7099_v46, 1  ;;  %v7129_v55 = vadd.f32 %v7128_v60, %v7127_v27 }
 0x33b   :  { %v7101_v62 = vadd.f32 %v7100_v42, %v7099_v46 }
 0x3a0   :  { %v2728_v54 = vpop.f32.mrb[16].mxu0 }
 0x3a1   :  { %v3265_v25 = vmul.f32 %v10924_v34, %v2728_v54  ;;  %v7958_v48 = vpop.f32.mrb[17].mxu0  ;;  %v10986_v54 = vmul.f32 %v10929_v44, %v9628_v26 }
 0x3a2   :  { %v2804_v17 = vpop.f32.mrb[16].mxu1 }
 0x3a3   :  { %v1787_v58 = vpop.xlane.xlu1 %1786  ;;  %v3273_v47 = vadd.f32 %v3265_v25, %v10933_v0  ;;  %v3266_v57 = vmul.f32 %v10924_v34, %v2804_v17  ;;  %v7965_v5 = vpop.f32.mrb[17].mxu1 }
 0x3a4   :  { %v1788_v16 = vrot.slane %v1787_v58, 4 }
 0x3a5   :  { %v3274_v51 = vadd.f32 %v3266_v57, %v10938_v4  ;;  %8013 = vmatmul.mubr.msk.f32.vlgmr.msra.gmra.mrb[24].mxu0 %vm1473_vm6, %v3273_v47  ;;  %v11005_v47 = vmul.f32 %v10929_v44, %v12265_v36  ;;  %v11024_v36 = vmul.f32 %v10929_v44, %v12266_v52 }
 0x3a6   :  { %v1789_v38 = vadd.f32 %v1788_v16, %v1787_v58  ;;  %8267 = vmatpush3.bf16.msk.msra.mxu0 %vm10585_vm4, %v10579_v59  ;;  %8026 = vmatprep.mubr.msk.f32.mxu0 %vm8708_vm12, %v12251_v29 }
 0x3a7   :  { %v7163_v32 = vpop.permute.xlu1 %7162  ;;  %8020 = vmatmul.mubr.msk.f32.vlgmr.msra.gmra.mrb[24].mxu1 %vm1473_vm6, %v3274_v51  ;;  %8272 = vmatprep.subr.bf16.mxu0 %v12226_v3 }
 0x3a8   :  { %v1790_v6 = vrot.slane %v1789_v38, 2  ;;  %v7168_v2 = vrot.slane %v7163_v32, %v10248_v13  ;;  %8271 = vmatpush3.bf16.msk.msra.mxu1 %vm10616_vm13, %v10608_v53  ;;  %8033 = vmatprep.mubr.msk.f32.mxu1 %vm8708_vm12, %v12251_v29 }
 0x3a9   :  { %8276 = vmatprep.subr.bf16.mxu1 %v12226_v3 }
 0x3aa   :  { %v7180_v23 = vadd.f32 %v7168_v2, %v7101_v62  ;;  %v7184_v7 = vadd.f32 %v7168_v2, %v7129_v55  ;;  %v1791_v50 = vadd.f32 %v1790_v6, %v1789_v38  ;;  %v10993_v55 = vmul.f32 %v10929_v44, %v12261_v35 }
 0x3ac   :  { %v7698_v61 = vmul.f32 -1.442695, %v7180_v23  ;;  %v7702_v40 = vmul.f32 -1.442695, %v7184_v7  ;;  %v1792_v1 = vrot.slane %v1791_v50, 1 }
 0x3ae   :  { %8571 = vpow2.f32 %v7698_v61  ;;  %v1793_v9 = vadd.f32 %v1792_v1, %v1791_v50 }
 0x3af   :  { %8573 = vpow2.f32 %v7702_v40  ;;  %v12277_v40 = vld [vmem:[#allocation98_spill] sm:$0xff] }
 0x3b0   :  { %8352 = vpush %v1793_v9 }
 0x3b1   :  { %v2880_v22 = vpop.f32.mrb[18].mxu0 }
 0x3b2   :  { %v3267_v41 = vmul.f32 %v10924_v34, %v2880_v22  ;;  %v7972_v45 = vpop.f32.mrb[19].mxu0 }
 0x3b3   :  { %v2956_v33 = vpop.f32.mrb[18].mxu1 }
 0x3b4   :  { %v3275_v14 = vadd.f32 %v3267_v41, %v10960_v20  ;;  %v3268_v46 = vmul.f32 %v10924_v34, %v2956_v33  ;;  %v7979_v27 = vpop.f32.mrb[19].mxu1 }
 0x3b5   :  { %v12279_v27 = vld [vmem:[#allocation9_spill] sm:$0xff] }
 0x3b6   :  { %v3276_v58 = vadd.f32 %v3268_v46, %v10966_v49  ;;  %8027 = vmatmul.mubr.msk.f32.vlgmr.msra.gmra.mrb[26].mxu0 %vm1473_vm6, %v3275_v14 }
 0x3b7   :  { %8275 = vmatpush3.bf16.msk.msra.mxu0 %vm10680_vm2, %v10671_v28  ;;  %8040 = vmatprep.mubr.msk.f32.mxu0 %vm8708_vm12, %v12251_v29 }
 0x3b8   :  { %v8572_v42 = vpop.eup %8571  ;;  %8034 = vmatmul.mubr.msk.f32.vlgmr.msra.gmra.mrb[26].mxu1 %vm1473_vm6, %v3276_v58  ;;  %8280 = vmatprep.subr.bf16.mxu0 %v12226_v3 }
 0x3b9   :  { %v8574_v12 = vpop.eup %8573  ;;  %v7212_v60 = vadd.f32 1.0, %v8572_v42  ;;  %8279 = vmatpush3.bf16.msk.msra.mxu1 %vm10723_vm10, %v10713_v15  ;;  %8047 = vmatprep.mubr.msk.f32.mxu1 %vm8708_vm12, %v12251_v29 }
 0x3ba   :  { %v7216_v21 = vadd.f32 1.0, %v8574_v12  ;;  %8284 = vmatprep.subr.bf16.mxu1 %v12226_v3  ;;  %v12280_v12 = vld [vmem:[#allocation12_spill] sm:$0xff] }
 0x3bb   :  { %8575 = vrcp.f32 %v7212_v60  ;;  %v3032_v16 = vpop.f32.mrb[20].mxu0 }
 0x3bc   :  { %8577 = vrcp.f32 %v7216_v21  ;;  %v3269_v38 = vmul.f32 %v10924_v34, %v3032_v16  ;;  %v7986_v25 = vpop.f32.mrb[21].mxu0  ;;  %v12281_v21 = vld [vmem:[#allocation8_spill] sm:$0xff] }
 0x3bd   :  { %v12282_v25 = vld [vmem:[#allocation15_spill] sm:$0xff] }
 0x3be   :  { %v3277_v48 = vadd.f32 %v3269_v38, %v10986_v54 }
 0x3c0   :  { %8041 = vmatmul.mubr.msk.f32.vlgmr.msra.gmra.mrb[28].mxu0 %vm1473_vm6, %v3277_v48 }
 0x3c1   :  { %v3108_v62 = vpop.f32.mrb[20].mxu1  ;;  %8283 = vmatpush3.bf16.msk.msra.mxu0 %vm10755_vm7, %v10747_v37  ;;  %8054 = vmatprep.mubr.msk.f32.mxu0 %vm8708_vm12, %v12251_v29 }
 0x3c2   :  { %v3270_v32 = vmul.f32 %v10924_v34, %v3108_v62  ;;  %v7993_v17 = vpop.f32.mrb[21].mxu1  ;;  %8288 = vmatprep.subr.bf16.mxu0 %v12226_v3 }
 0x3c3   :  { %v3184_v6 = vpop.f32.mrb[22].mxu0 }
 0x3c4   :  { %v3278_v26 = vadd.f32 %v3270_v32, %v10993_v55  ;;  %v3271_v35 = vmul.f32 %v10924_v34, %v3184_v6  ;;  %v8000_v2 = vpop.f32.mrb[23].mxu0 }
 0x3c5   :  { %v11008_v57 = vpop.eup %8575 }
 0x3c6   :  { %12274 = vst [vmem:[#allocation52_spill] sm:$0xff] %v11008_v57  ;;  %8048 = vmatmul.mubr.msk.f32.vlgmr.msra.gmra.mrb[28].mxu1 %vm1473_vm6, %v3278_v26  ;;  %v3260_v5 = vpop.f32.mrb[22].mxu1  ;;  %v11011_v23 = vpop.eup %8577  ;;  %7245 = vst.msk [vmem:[%s11998_s9 + $0x9] sm:$0x1] %vm7234_vm8, %v11008_v57  ;;  %v3279_v7 = vadd.f32 %v3271_v35, %v11005_v47 }
 0x3c7   :  { %12275 = vst [vmem:[#allocation93_spill] sm:$0xff] %v11011_v23  ;;  %8287 = vmatpush3.bf16.msk.msra.mxu1 %vm10789_vm15, %v10778_v11  ;;  %v3272_v51 = vmul.f32 %v10924_v34, %v3260_v5  ;;  %v8007_v50 = vpop.f32.mrb[23].mxu1  ;;  %8061 = vmatprep.mubr.msk.f32.mxu1 %vm8708_vm12, %v12251_v29  ;;  %7249 = vst.msk [vmem:[%s11998_s9 + $0x19] sm:$0x1] %vm7234_vm8, %v11011_v23 }
 0x3c8   :  { %8292 = vmatprep.subr.bf16.mxu1 %v12226_v3  ;;  %8055 = vmatmul.mubr.msk.f32.vlgmr.msra.gmra.mrb[30].mxu0 %vm1473_vm6, %v3279_v7 }
 0x3c9   :  { %v3280_v61 = vadd.f32 %v3272_v51, %v11024_v36  ;;  %8291 = vmatpush3.bf16.msk.msra.mxu0 %vm10435_vm0, %v10428_v63  ;;  %8068 = vmatprep.mubr.msk.f32.mxu0 %vm8708_vm12, %v12251_v29 }
 0x3ca   :  { %8296 = vmatprep.subr.bf16.mxu0 %v12226_v3 }
 0x3cb   :  { %8062 = vmatmul.mubr.msk.f32.vlgmr.msra.gmra.mrb[30].mxu1 %vm1473_vm6, %v3280_v61 }
 0x3cc   :  { %8295 = vmatpush3.bf16.msk.msra.mxu1 %vm10468_vm1, %v12277_v40  ;;  %8075 = vmatprep.mubr.msk.f32.mxu1 %vm8708_vm12, %v12251_v29 }
 0x3cd   :  { %8300 = vmatprep.subr.bf16.mxu1 %v12226_v3 }
 0x3e1   :  { %s8353_s14 = spop %8352 }
 0x3e2   :  { %s1795_s15 = ssub.f32 0.0, %s8353_s14 }
 0x3e4   :  { %s1798_s16 = smul.f32 0.05, %s1795_s15 }
 0x3e6   :  { %1800 = sst [smem:[#allocation3]] %s1798_s16 }
 0x478   :  { %v3350_v9 = vpop.f32.mrb[24].mxu0 }
 0x479   :  { %v3865_v22 = vmul.f32 %v3350_v9, %v10924_v34  ;;  %v8014_v41 = vpop.f32.mrb[25].mxu0 }
 0x47a   :  { %v3423_v45 = vpop.f32.mrb[24].mxu1 }
 0x47b   :  { %v3873_v33 = vadd.f32 %v3865_v22, %v10933_v0  ;;  %v3866_v14 = vmul.f32 %v3423_v45, %v10924_v34  ;;  %v8021_v46 = vpop.f32.mrb[25].mxu1  ;;  %v12283_v22 = vld [vmem:[#allocation10_spill] sm:$0xff] }
 0x47d   :  { %v3922_v58 = vmul.f32 %v12279_v27, %v3873_v33  ;;  %v3874_v42 = vadd.f32 %v3866_v14, %v10938_v4  ;;  %v12284_v14 = vld [vmem:[#allocation19_spill] sm:$0xff] }
 0x47f   :  { %v11056_v60 = vadd.f32 %v12280_v12, %v3922_v58  ;;  %v3923_v16 = vmul.f32 %v12281_v21, %v3874_v42  ;;  %v12285_v58 = vld [vmem:[#allocation14_spill] sm:$0xff] }
 0x481   :  { %v3979_v38 = vmul.f32 %v11056_v60, %v11056_v60  ;;  %v11062_v48 = vadd.f32 %v12282_v25, %v3923_v16  ;;  %v12286_v16 = vld [vmem:[#allocation16_spill] sm:$0xff] }
 0x483   :  { %v3987_v0 = vmul.f32 %v3979_v38, %v11056_v60  ;;  %v3980_v62 = vmul.f32 %v11062_v48, %v11062_v48 }
 0x485   :  { %v3995_v32 = vmul.f32 0.044715, %v3987_v0  ;;  %v3988_v17 = vmul.f32 %v3980_v62, %v11062_v48 }
 0x487   :  { %v4003_v35 = vadd.f32 %v3995_v32, %v11056_v60  ;;  %v3996_v2 = vmul.f32 0.044715, %v3988_v17 }
 0x489   :  { %v3496_v4 = vpop.f32.mrb[26].mxu0  ;;  %v4011_v61 = vmul.f32 0.7978846, %v4003_v35  ;;  %v4004_v9 = vadd.f32 %v3996_v2, %v11062_v48 }
 0x48a   :  { %v3867_v26 = vmul.f32 %v3496_v4, %v10924_v34  ;;  %v8028_v6 = vpop.f32.mrb[27].mxu0 }
 0x48b   :  { %v3569_v5 = vpop.f32.mrb[26].mxu1  ;;  %8579 = vtanh.f32 %v4011_v61  ;;  %v4012_v33 = vmul.f32 0.7978846, %v4004_v9 }
 0x48c   :  { %v3875_v7 = vadd.f32 %v3867_v26, %v10960_v20  ;;  %v3868_v51 = vmul.f32 %v3569_v5, %v10924_v34  ;;  %v8035_v50 = vpop.f32.mrb[27].mxu1 }
 0x48d   :  { %8581 = vtanh.f32 %v4012_v33 }
 0x48e   :  { %v3924_v41 = vmul.f32 %v12283_v22, %v3875_v7  ;;  %v3876_v45 = vadd.f32 %v3868_v51, %v10966_v49 }
 0x490   :  { %v11076_v46 = vadd.f32 %v12284_v14, %v3924_v41  ;;  %v3925_v42 = vmul.f32 %v12285_v58, %v3876_v45 }
 0x492   :  { %v3981_v20 = vmul.f32 %v11076_v46, %v11076_v46  ;;  %v11082_v38 = vadd.f32 %v12286_v16, %v3925_v42 }
 0x493   :  { %v3642_v0 = vpop.f32.mrb[28].mxu0 }
 0x494   :  { %v3869_v62 = vmul.f32 %v3642_v0, %v10924_v34  ;;  %v8042_v32 = vpop.f32.mrb[29].mxu0  ;;  %v3989_v49 = vmul.f32 %v3981_v20, %v11076_v46  ;;  %v3982_v17 = vmul.f32 %v11082_v38, %v11082_v38 }
 0x495   :  { %v8580_v61 = vpop.eup %8579 }
 0x496   :  { %v3877_v4 = vadd.f32 %v3869_v62, %v10986_v54  ;;  %v3997_v26 = vmul.f32 0.044715, %v3989_v49  ;;  %v3990_v6 = vmul.f32 %v3982_v17, %v11082_v38  ;;  %v4027_v41 = vadd.f32 1.0, %v8580_v61 }
 0x497   :  { %v8582_v20 = vpop.eup %8581 }
 0x498   :  { %v3926_v35 = vmul.f32 %v12279_v27, %v3877_v4  ;;  %v4005_v5 = vadd.f32 %v3997_v26, %v11076_v46  ;;  %v3998_v7 = vmul.f32 0.044715, %v3990_v6  ;;  %v4035_v32 = vmul.f32 0.5, %v4027_v41  ;;  %v12287_v41 = vld [vmem:[#allocation11_spill] sm:$0xff] }
 0x499   :  { %v3715_v2 = vpop.f32.mrb[28].mxu1  ;;  %v4028_v49 = vadd.f32 1.0, %v8582_v20 }
 0x49a   :  { %v3870_v51 = vmul.f32 %v3715_v2, %v10924_v34  ;;  %v8049_v50 = vpop.f32.mrb[29].mxu1  ;;  %v11094_v9 = vadd.f32 %v12280_v12, %v3926_v35  ;;  %v4013_v45 = vmul.f32 0.7978846, %v4005_v5  ;;  %v4006_v54 = vadd.f32 %v3998_v7, %v11082_v38 }
 0x49b   :  { %v3788_v42 = vpop.f32.mrb[30].mxu0  ;;  %v4043_v2 = vmul.f32 %v4035_v32, %v11056_v60  ;;  %v4036_v5 = vmul.f32 0.5, %v4028_v49 }
 0x49c   :  { %v3878_v33 = vadd.f32 %v3870_v51, %v10993_v55  ;;  %v3983_v27 = vmul.f32 %v11094_v9, %v11094_v9  ;;  %v3871_v0 = vmul.f32 %v3788_v42, %v10924_v34  ;;  %v8056_v62 = vpop.f32.mrb[31].mxu0  ;;  %8583 = vtanh.f32 %v4013_v45 }
 0x49d   :  { %v4014_v17 = vmul.f32 0.7978846, %v4006_v54  ;;  %v11112_v45 = vadd.f32 %v4043_v2, %v12287_v41 }
 0x49e   :  { %v3861_v12 = vpop.f32.mrb[30].mxu1  ;;  %v3991_v4 = vmul.f32 %v3983_v27, %v11094_v9  ;;  %v3927_v26 = vmul.f32 %v12281_v21, %v3878_v33  ;;  %v3879_v6 = vadd.f32 %v3871_v0, %v11005_v47  ;;  %v4044_v47 = vmul.f32 %v4036_v5, %v11062_v48 }
 0x49f   :  { %v3872_v55 = vmul.f32 %v3861_v12, %v10924_v34  ;;  %v8063_v35 = vpop.f32.mrb[31].mxu1  ;;  %8585 = vtanh.f32 %v4014_v17  ;;  %v4124_v33 = vrot.slane %v11112_v45, 7 }
 0x4a0   :  { %v3999_v7 = vmul.f32 0.044715, %v3991_v4  ;;  %v11107_v51 = vadd.f32 %v12282_v25, %v3927_v26  ;;  %v3928_v50 = vmul.f32 %v12283_v22, %v3879_v6  ;;  %v4148_v22 = vrot.slane %v11112_v45, 1 }
 0x4a1   :  { %v3880_v61 = vadd.f32 %v3872_v55, %v11024_v36  ;;  %v12288_v36 = vld [vmem:[#allocation6_spill] sm:$0xff]  ;;  %v12292_v55 = vld [vmem:[#allocation23_spill] sm:$0xff] }
 0x4a2   :  { %v4007_v21 = vadd.f32 %v3999_v7, %v11094_v9  ;;  %v3984_v60 = vmul.f32 %v11107_v51, %v11107_v51  ;;  %v11119_v54 = vadd.f32 %v12284_v14, %v3928_v50  ;;  %v11125_v42 = vadd.f32 %v4044_v47, %v12288_v36  ;;  %v12294_v47 = vld [vmem:[#allocation24_spill] sm:$0xff]  ;;  %v12296_v36 = vld [vmem:[#allocation25_spill] sm:$0xff] }
 0x4a3   :  { %v3929_v25 = vmul.f32 %v12285_v58, %v3880_v61  ;;  %v4140_v14 = vsel %vm2327_vm3, 0.0, %v4124_v33  ;;  %v12290_v58 = vld [vmem:[#allocation21_spill] sm:$0xff]  ;;  %v4164_v6 = vsel %vm12291_vm5, %v4148_v22, 0.0 }
 0x4a4   :  { %12289 = vst [vmem:[#allocation77_spill] sm:$0xff] %v11125_v42  ;;  %v4015_v20 = vmul.f32 0.7978846, %v4007_v21  ;;  %v3992_v48 = vmul.f32 %v3984_v60, %v11107_v51  ;;  %v3985_v27 = vmul.f32 %v11119_v54, %v11119_v54  ;;  %v4262_v62 = vmul.f32 %v12290_v58, %v11112_v45 }
 0x4a5   :  { %v11131_v0 = vadd.f32 %v12286_v16, %v3929_v25  ;;  %v4125_v32 = vrot.slane %v11125_v42, 7  ;;  %v4149_v49 = vrot.slane %v11125_v42, 1  ;;  %v4213_v35 = vmul.f32 %v12292_v55, %v4140_v14  ;;  %v12295_v25 = vld [vmem:[#allocation27_spill] sm:$0xff] }
 0x4a6   :  { %8587 = vtanh.f32 %v4015_v20  ;;  %v4000_v17 = vmul.f32 0.044715, %v3992_v48  ;;  %v3993_v12 = vmul.f32 %v3985_v27, %v11119_v54  ;;  %v8584_v26 = vpop.eup %8583  ;;  %v4263_v21 = vmul.f32 %v12294_v47, %v11125_v42  ;;  %v12313_v42 = vld [vmem:[#allocation37_spill] sm:$0xff] }
 0x4a7   :  { %v3986_v4 = vmul.f32 %v11131_v0, %v11131_v0  ;;  %v4141_v16 = vsel %vm2327_vm3, 0.0, %v4125_v32  ;;  %v4165_v2 = vsel %vm12293_vm9, %v4149_v49, 0.0  ;;  %v4029_v5 = vadd.f32 1.0, %v8584_v26  ;;  %vm12317_vm9 = vmmov %vm12291_vm5 }
 0x4a8   :  { %v4008_v7 = vadd.f32 %v4000_v17, %v11107_v51  ;;  %v4001_v50 = vmul.f32 0.044715, %v3993_v12  ;;  %v4270_v60 = vadd.f32 %v4262_v62, %v4213_v35  ;;  %v4319_v33 = vmul.f32 %v12295_v25, %v4164_v6  ;;  %v12297_v12 = vld [vmem:[#allocation28_spill] sm:$0xff] }
 0x4a9   :  { %v3994_v61 = vmul.f32 %v3986_v4, %v11131_v0  ;;  %v8586_v41 = vpop.eup %8585  ;;  %v4214_v20 = vmul.f32 %v12296_v36, %v4141_v16  ;;  %v4037_v22 = vmul.f32 0.5, %v4029_v5  ;;  %v4320_v26 = vmul.f32 %v12297_v12, %v4165_v2  ;;  %v12298_v6 = vld [vmem:[#allocation32_spill] sm:$0xff]  ;;  %v12299_v5 = vld [vmem:[#allocation17_spill] sm:$0xff] }
 0x4aa   :  { %v4030_v48 = vadd.f32 1.0, %v8586_v41  ;;  %v4016_v27 = vmul.f32 0.7978846, %v4008_v7  ;;  %v4009_v14 = vadd.f32 %v4001_v50, %v11119_v54  ;;  %v4327_v49 = vadd.f32 %v4319_v33, %v4270_v60 }
 0x4ab   :  { %v4002_v32 = vmul.f32 0.044715, %v3994_v61  ;;  %v4271_v17 = vadd.f32 %v4263_v21, %v4214_v20  ;;  %v4045_v4 = vmul.f32 %v4037_v22, %v11076_v46  ;;  %v12301_v46 = vld [vmem:[#allocation34_spill] sm:$0xff]  ;;  %v12302_v20 = vld [vmem:[#allocation20_spill] sm:$0xff] }
 0x4ac   :  { %v4038_v10 = vmul.f32 0.5, %v4030_v48  ;;  %8589 = vtanh.f32 %v4016_v27  ;;  %v4017_v23 = vmul.f32 0.7978846, %v4009_v14  ;;  %v11156_v35 = vadd.f32 %v12298_v6, %v4327_v49 }
 0x4ad   :  { %v4010_v62 = vadd.f32 %v4002_v32, %v11131_v0  ;;  %v4328_v16 = vadd.f32 %v4320_v26, %v4271_v17  ;;  %v11159_v7 = vadd.f32 %v4045_v4, %v12299_v5  ;;  %v12305_v4 = vld [vmem:[#allocation29_spill] sm:$0xff]  ;;  %v12306_v5 = vld [vmem:[#allocation26_spill] sm:$0xff] }
 0x4ae   :  { %v4046_v50 = vmul.f32 %v4038_v10, %v11082_v38  ;;  %8591 = vtanh.f32 %v4017_v23  ;;  %v4384_v2 = vmul.f32 %v11156_v35, %v11156_v35 }
 0x4af   :  { %12300 = vst [vmem:[#allocation78_spill] sm:$0xff] %v11159_v7  ;;  %v4018_v61 = vmul.f32 0.7978846, %v4010_v62  ;;  %v11165_v41 = vadd.f32 %v12301_v46, %v4328_v16  ;;  %v4126_v60 = vrot.slane %v11159_v7, 7  ;;  %v4150_v33 = vrot.slane %v11159_v7, 1 }
 0x4b0   :  { %v8588_v21 = vpop.eup %8587  ;;  %v11170_v22 = vadd.f32 %v4046_v50, %v12302_v20  ;;  %v4392_v10 = vmul.f32 %v4384_v2, %v11156_v35  ;;  %v4264_v62 = vmul.f32 %v12305_v4, %v11159_v7 }
 0x4b1   :  { %v4031_v48 = vadd.f32 1.0, %v8588_v21  ;;  %8593 = vtanh.f32 %v4018_v61  ;;  %v4385_v23 = vmul.f32 %v11165_v41, %v11165_v41  ;;  %v4142_v38 = vsel %vm2327_vm3, 0.0, %v4126_v60  ;;  %v12307_v60 = vld [vmem:[#allocation31_spill] sm:$0xff] }
 0x4b2   :  { %12303 = vst [vmem:[#allocation97_spill] sm:$0xff] %v11170_v22  ;;  %v4127_v27 = vrot.slane %v11170_v22, 7  ;;  %v4151_v14 = vrot.slane %v11170_v22, 1  ;;  %v4400_v49 = vmul.f32 0.044715, %v4392_v10  ;;  %v4166_v26 = vsel %vm12304_vm11, %v4150_v33, 0.0  ;;  %vm12319_vm11 = vmmov %vm12291_vm5 }
 0x4b3   :  { %v4039_v32 = vmul.f32 0.5, %v4031_v48  ;;  %v4393_v17 = vmul.f32 %v4385_v23, %v11165_v41  ;;  %v4215_v50 = vmul.f32 %v12306_v5, %v4142_v38  ;;  %v12308_v10 = vld [vmem:[#allocation30_spill] sm:$0xff]  ;;  %v12309_v33 = vld [vmem:[#allocation33_spill] sm:$0xff] }
 0x4b4   :  { %v4143_v16 = vsel %vm2327_vm3, 0.0, %v4127_v27  ;;  %v4408_v2 = vadd.f32 %v4400_v49, %v11156_v35  ;;  %v4265_v23 = vmul.f32 %v12308_v10, %v11170_v22  ;;  %v4321_v43 = vmul.f32 %v12309_v33, %v4166_v26 }
 0x4b5   :  { %v4047_v61 = vmul.f32 %v4039_v32, %v11094_v9  ;;  %v4401_v21 = vmul.f32 0.044715, %v4393_v17  ;;  %v4216_v20 = vmul.f32 %v12307_v60, %v4143_v16  ;;  %v4272_v18 = vadd.f32 %v4264_v62, %v4215_v50  ;;  %v12312_v62 = vld [vmem:[#allocation35_spill] sm:$0xff] }
 0x4b6   :  { %v8590_v48 = vpop.eup %8589  ;;  %v4167_v57 = vsel %vm12310_vm14, %v4151_v14, 0.0  ;;  %v4416_v13 = vmul.f32 0.7978846, %v4408_v2 }
 0x4b7   :  { %v11192_v27 = vadd.f32 %v4047_v61, %v12311_v8  ;;  %v4032_v38 = vadd.f32 1.0, %v8590_v48  ;;  %v4409_v9 = vadd.f32 %v4401_v21, %v11165_v41  ;;  %v4329_v49 = vadd.f32 %v4321_v43, %v4272_v18 }
 0x4b8   :  { %v8592_v32 = vpop.eup %8591  ;;  %v4273_v17 = vadd.f32 %v4265_v23, %v4216_v20  ;;  %v4322_v50 = vmul.f32 %v12312_v62, %v4167_v57  ;;  %8595 = vtanh.f32 %v4416_v13  ;;  %v12314_v23 = vld [vmem:[#allocation7_spill] sm:$0xff] }
 0x4b9   :  { %v4128_v16 = vrot.slane %v11192_v27, 7  ;;  %v4152_v7 = vrot.slane %v11192_v27, 1  ;;  %v4040_v22 = vmul.f32 0.5, %v4032_v38  ;;  %v4033_v26 = vadd.f32 1.0, %v8592_v32  ;;  %v12315_v38 = vld [vmem:[#allocation36_spill] sm:$0xff] }
 0x4ba   :  { %v4417_v14 = vmul.f32 0.7978846, %v4409_v9  ;;  %v11199_v8 = vadd.f32 %v12313_v42, %v4329_v49  ;;  %v4330_v18 = vadd.f32 %v4322_v50, %v4273_v17 }
 0x4bb   :  { %v8594_v61 = vpop.eup %8593  ;;  %v4144_v2 = vsel %vm2327_vm3, 0.0, %v4128_v16  ;;  %v4048_v21 = vmul.f32 %v4040_v22, %v11107_v51  ;;  %v4168_v43 = vsel %vm12291_vm5, %v4152_v7, 0.0  ;;  %v4041_v20 = vmul.f32 0.5, %v4033_v26 }
 0x4bc   :  { %v4034_v48 = vadd.f32 1.0, %v8594_v61  ;;  %8597 = vtanh.f32 %v4417_v14  ;;  %v4386_v57 = vmul.f32 %v11199_v8, %v11199_v8  ;;  %v11210_v9 = vadd.f32 %v12315_v38, %v4330_v18  ;;  %v12316_v14 = vld [vmem:[#allocation18_spill] sm:$0xff] }
 0x4bd   :  { %v11207_v13 = vadd.f32 %v4048_v21, %v12314_v23  ;;  %v4217_v32 = vmul.f32 %v12292_v55, %v4144_v2  ;;  %v4266_v51 = vmul.f32 %v12290_v58, %v11192_v27  ;;  %v4049_v22 = vmul.f32 %v4041_v20, %v11119_v54 }
 0x4be   :  { %v4042_v7 = vmul.f32 0.5, %v4034_v48  ;;  %v4394_v49 = vmul.f32 %v4386_v57, %v11199_v8  ;;  %v4387_v50 = vmul.f32 %v11210_v9, %v11210_v9  ;;  %v4323_v26 = vmul.f32 %v12295_v25, %v4168_v43  ;;  %v12318_v57 = vld [vmem:[#allocation22_spill] sm:$0xff] }
 0x4bf   :  { %v4129_v17 = vrot.slane %v11207_v13, 7  ;;  %v4153_v16 = vrot.slane %v11207_v13, 1  ;;  %v11223_v61 = vadd.f32 %v4049_v22, %v12316_v14  ;;  %v4274_v2 = vadd.f32 %v4266_v51, %v4217_v32 }
 0x4c0   :  { %v4050_v55 = vmul.f32 %v4042_v7, %v11131_v0  ;;  %v4402_v58 = vmul.f32 0.044715, %v4394_v49  ;;  %v4267_v21 = vmul.f32 %v12294_v47, %v11207_v13  ;;  %v4395_v18 = vmul.f32 %v4387_v50, %v11210_v9 }
 0x4c1   :  { %v4145_v54 = vsel %vm2327_vm3, 0.0, %v4129_v17  ;;  %v4169_v20 = vsel %vm12317_vm9, %v4153_v16, 0.0  ;;  %v4130_v48 = vrot.slane %v11223_v61, 7  ;;  %v4154_v25 = vrot.slane %v11223_v61, 1 }
 0x4c2   :  { %v4268_v43 = vmul.f32 %v12305_v4, %v11223_v61  ;;  %v11236_v0 = vadd.f32 %v4050_v55, %v12318_v57  ;;  %v4410_v23 = vadd.f32 %v4402_v58, %v11199_v8  ;;  %v4403_v32 = vmul.f32 0.044715, %v4395_v18  ;;  %v8596_v22 = vpop.eup %8595 }
 0x4c3   :  { %v4331_v51 = vadd.f32 %v4323_v26, %v4274_v2  ;;  %v4218_v47 = vmul.f32 %v12296_v36, %v4145_v54  ;;  %v4146_v7 = vsel %vm2327_vm3, 0.0, %v4130_v48  ;;  %v4432_v4 = vadd.f32 1.0, %v8596_v22 }
 0x4c4   :  { %v4131_v49 = vrot.slane %v11236_v0, 7  ;;  %v4155_v17 = vrot.slane %v11236_v0, 1  ;;  %v4269_v16 = vmul.f32 %v12308_v10, %v11236_v0  ;;  %v4418_v50 = vmul.f32 0.7978846, %v4410_v23 }
 0x4c5   :  { %v4411_v14 = vadd.f32 %v4403_v32, %v11210_v9  ;;  %v11247_v55 = vadd.f32 %v12298_v6, %v4331_v51  ;;  %v4275_v58 = vadd.f32 %v4267_v21, %v4218_v47  ;;  %v4324_v2 = vmul.f32 %v12297_v12, %v4169_v20 }
 0x4c6   :  { %v8598_v26 = vpop.eup %8597  ;;  %v4147_v36 = vsel %vm2327_vm3, 0.0, %v4131_v49  ;;  %v4170_v54 = vsel %vm12319_vm11, %v4154_v25, 0.0  ;;  %v4440_v18 = vmul.f32 0.5, %v4432_v4  ;;  %8599 = vtanh.f32 %v4418_v50  ;;  %vm12320_vm3 = vmmov %vm12291_vm5  ;;  %v12322_v49 = vld [vmem:[#allocation50_spill] sm:$0xff] }
 0x4c7   :  { %v4433_v48 = vadd.f32 1.0, %v8598_v26  ;;  %v4419_v57 = vmul.f32 0.7978846, %v4411_v14  ;;  %v4388_v10 = vmul.f32 %v11247_v55, %v11247_v55  ;;  %v4332_v23 = vadd.f32 %v4324_v2, %v4275_v58 }
 0x4c8   :  { %v4219_v32 = vmul.f32 %v12306_v5, %v4146_v7  ;;  %v4325_v6 = vmul.f32 %v12309_v33, %v4170_v54  ;;  %v11257_v51 = vmul.f32 %v4440_v18, %v11156_v35  ;;  %v4171_v12 = vsel %vm12320_vm3, %v4155_v17, 0.0  ;;  %v12321_v5 = vld [vmem:[#allocation42_spill] sm:$0xff] }
 0x4c9   :  { %v4441_v21 = vmul.f32 0.5, %v4433_v48  ;;  %8601 = vtanh.f32 %v4419_v57  ;;  %v4396_v20 = vmul.f32 %v4388_v10, %v11247_v55  ;;  %v11262_v25 = vadd.f32 %v12301_v46, %v4332_v23 }
 0x4ca   :  { %v4276_v47 = vadd.f32 %v4268_v43, %v4219_v32  ;;  %v4220_v22 = vmul.f32 %v12307_v60, %v4147_v36  ;;  %8069 = vmatmul.mubr.msk.f32.vlgmr.msra.gmra.mrb[32].mxu0 %vm1473_vm6, %v11257_v51  ;;  %v5883_v33 = vmul.f32 %v12321_v5, %v11257_v51  ;;  %v4326_v50 = vmul.f32 %v12312_v62, %v4171_v12  ;;  %v12324_v36 = vld [vmem:[#allocation43_spill] sm:$0xff] }
 0x4cb   :  { %v11270_v35 = vmul.f32 %v4441_v21, %v11165_v41  ;;  %8299 = vmatpush3.bf16.msk.msra.mxu0 %vm10585_vm4, %v10579_v59  ;;  %8082 = vmatprep.mubr.msk.f32.mxu0 %vm8708_vm12, %v12251_v29  ;;  %v4404_v46 = vmul.f32 0.044715, %v4396_v20  ;;  %v4389_v60 = vmul.f32 %v11262_v25, %v11262_v25  ;;  %v12323_v41 = vld [vmem:[#allocation73_spill] sm:$0xff] }
 0x4cc   :  { %v4333_v43 = vadd.f32 %v4325_v6, %v4276_v47  ;;  %v4277_v7 = vadd.f32 %v4269_v16, %v4220_v22  ;;  %v11280_v17 = vadd.f32 %v5883_v33, %v12322_v49  ;;  %8304 = vmatprep.subr.bf16.mxu0 %v12226_v3 }
 0x4cd   :  { %8076 = vmatmul.mubr.msk.f32.vlgmr.msra.gmra.mrb[32].mxu1 %vm1473_vm6, %v11270_v35  ;;  %v5884_v4 = vmul.f32 %v12323_v41, %v11270_v35  ;;  %v4412_v16 = vadd.f32 %v4404_v46, %v11247_v55  ;;  %v4397_v14 = vmul.f32 %v4389_v60, %v11262_v25 }
 0x4ce   :  { %8303 = vmatpush3.bf16.msk.msra.mxu1 %vm10616_vm13, %v10608_v53  ;;  %8089 = vmatprep.mubr.msk.f32.mxu1 %vm8708_vm12, %v12251_v29  ;;  %v11296_v26 = vadd.f32 %v12313_v42, %v4333_v43  ;;  %v4334_v62 = vadd.f32 %v4326_v50, %v4277_v7  ;;  %v12325_v43 = vld [vmem:[#allocation45_spill] sm:$0xff]  ;;  %v12326_v50 = vld [vmem:[#allocation54_spill] sm:$0xff] }
 0x4cf   :  { %v11299_v58 = vadd.f32 %v5884_v4, %v12324_v36  ;;  %8308 = vmatprep.subr.bf16.mxu1 %v12226_v3  ;;  %v4420_v2 = vmul.f32 0.7978846, %v4412_v16  ;;  %v4405_v54 = vmul.f32 0.044715, %v4397_v14  ;;  %v12327_v14 = vld [vmem:[#allocation74_spill] sm:$0xff] }
 0x4d0   :  { %v4390_v18 = vmul.f32 %v11296_v26, %v11296_v26  ;;  %v8600_v48 = vpop.eup %8599  ;;  %v11305_v57 = vadd.f32 %v12315_v38, %v4334_v62 }
 0x4d1   :  { %v4434_v10 = vadd.f32 1.0, %v8600_v48  ;;  %8603 = vtanh.f32 %v4420_v2  ;;  %v4413_v42 = vadd.f32 %v4405_v54, %v11262_v25  ;;  %v12328_v2 = vld [vmem:[#allocation57_spill] sm:$0xff] }
 0x4d2   :  { %v4398_v23 = vmul.f32 %v4390_v18, %v11296_v26  ;;  %v4391_v6 = vmul.f32 %v11305_v57, %v11305_v57 }
 0x4d3   :  { %v8602_v32 = vpop.eup %8601  ;;  %v4442_v21 = vmul.f32 0.5, %v4434_v10  ;;  %v4421_v20 = vmul.f32 0.7978846, %v4413_v42 }
 0x4d4   :  { %v4435_v12 = vadd.f32 1.0, %v8602_v32  ;;  %v4406_v47 = vmul.f32 0.044715, %v4398_v23  ;;  %v4399_v22 = vmul.f32 %v4391_v6, %v11305_v57 }
 0x4d5   :  { %v11313_v33 = vmul.f32 %v4442_v21, %v11199_v8  ;;  %8605 = vtanh.f32 %v4421_v20 }
 0x4d6   :  { %v4443_v38 = vmul.f32 0.5, %v4435_v12  ;;  %v4414_v46 = vadd.f32 %v4406_v47, %v11296_v26  ;;  %v4407_v60 = vmul.f32 0.044715, %v4399_v22  ;;  %v12329_v12 = vld [vmem:[#allocation51_spill] sm:$0xff] }
 0x4d7   :  { %8083 = vmatmul.mubr.msk.f32.vlgmr.msra.gmra.mrb[34].mxu0 %vm1473_vm6, %v11313_v33  ;;  %v5885_v7 = vmul.f32 %v12325_v43, %v11313_v33 }
 0x4d8   :  { %v11321_v49 = vmul.f32 %v4443_v38, %v11210_v9  ;;  %v4422_v4 = vmul.f32 0.7978846, %v4414_v46  ;;  %8307 = vmatpush3.bf16.msk.msra.mxu0 %vm10680_vm2, %v10671_v28  ;;  %8096 = vmatprep.mubr.msk.f32.mxu0 %vm8708_vm12, %v12251_v29  ;;  %v4415_v8 = vadd.f32 %v4407_v60, %v11305_v57  ;;  %v12330_v46 = vld [vmem:[#allocation44_spill] sm:$0xff] }
 0x4d9   :  { %v11330_v16 = vadd.f32 %v5885_v7, %v12326_v50  ;;  %8312 = vmatprep.subr.bf16.mxu0 %v12226_v3 }
 0x4da   :  { %8090 = vmatmul.mubr.msk.f32.vlgmr.msra.gmra.mrb[34].mxu1 %vm1473_vm6, %v11321_v49  ;;  %v5886_v9 = vmul.f32 %v12327_v14, %v11321_v49  ;;  %8607 = vtanh.f32 %v4422_v4  ;;  %v4423_v36 = vmul.f32 0.7978846, %v4415_v8  ;;  %v11444_v30 = vmul.f32 %v11321_v49, %v10929_v44 }
 0x4db   :  { %8311 = vmatpush3.bf16.msk.msra.mxu1 %vm10723_vm10, %v10713_v15  ;;  %8103 = vmatprep.mubr.msk.f32.mxu1 %vm8708_vm12, %v12251_v29  ;;  %v8604_v62 = vpop.eup %8603 }
 0x4dc   :  { %v11343_v54 = vadd.f32 %v5886_v9, %v12328_v2  ;;  %8316 = vmatprep.subr.bf16.mxu1 %v12226_v3  ;;  %v4436_v18 = vadd.f32 1.0, %v8604_v62  ;;  %8609 = vtanh.f32 %v4423_v36  ;;  %v11412_v9 = vmul.f32 %v11257_v51, %v10929_v44 }
 0x4de   :  { %v4444_v48 = vmul.f32 0.5, %v4436_v18 }
 0x4df   :  { %v8606_v10 = vpop.eup %8605 }
 0x4e0   :  { %v11347_v42 = vmul.f32 %v4444_v48, %v11247_v55  ;;  %v4437_v23 = vadd.f32 1.0, %v8606_v10 }
 0x4e2   :  { %8097 = vmatmul.mubr.msk.f32.vlgmr.msra.gmra.mrb[36].mxu0 %vm1473_vm6, %v11347_v42  ;;  %v5887_v32 = vmul.f32 %v12321_v5, %v11347_v42  ;;  %v4445_v6 = vmul.f32 0.5, %v4437_v23 }
 0x4e3   :  { %8315 = vmatpush3.bf16.msk.msra.mxu0 %vm10755_vm7, %v10747_v37  ;;  %8110 = vmatprep.mubr.msk.f32.mxu0 %vm8708_vm12, %v12251_v29 }
 0x4e4   :  { %v8608_v21 = vpop.eup %8607  ;;  %v11359_v20 = vadd.f32 %v5887_v32, %v12329_v12  ;;  %v11362_v55 = vmul.f32 %v4445_v6, %v11262_v25  ;;  %8320 = vmatprep.subr.bf16.mxu0 %v12226_v3 }
 0x4e5   :  { %v4438_v47 = vadd.f32 1.0, %v8608_v21 }
 0x4e6   :  { %v8610_v22 = vpop.eup %8609  ;;  %8104 = vmatmul.mubr.msk.f32.vlgmr.msra.gmra.mrb[36].mxu1 %vm1473_vm6, %v11362_v55  ;;  %v5888_v5 = vmul.f32 %v12323_v41, %v11362_v55  ;;  %v11470_v31 = vmul.f32 %v11362_v55, %v10929_v44 }
 0x4e7   :  { %v4446_v38 = vmul.f32 0.5, %v4438_v47  ;;  %8319 = vmatpush3.bf16.msk.msra.mxu1 %vm10789_vm15, %v10778_v11  ;;  %8117 = vmatprep.mubr.msk.f32.mxu1 %vm8708_vm12, %v12251_v29  ;;  %v4439_v25 = vadd.f32 1.0, %v8610_v22 }
 0x4e8   :  { %v11375_v60 = vadd.f32 %v5888_v5, %v12330_v46  ;;  %8324 = vmatprep.subr.bf16.mxu1 %v12226_v3 }
 0x4e9   :  { %v11378_v7 = vmul.f32 %v4446_v38, %v11296_v26  ;;  %v4447_v4 = vmul.f32 0.5, %v4439_v25  ;;  %v12331_v26 = vld [vmem:[#allocation55_spill] sm:$0xff] }
 0x4eb   :  { %8111 = vmatmul.mubr.msk.f32.vlgmr.msra.gmra.mrb[38].mxu0 %vm1473_vm6, %v11378_v7  ;;  %v5889_v41 = vmul.f32 %v12325_v43, %v11378_v7  ;;  %v11389_v8 = vmul.f32 %v4447_v4, %v11305_v57  ;;  %v11482_v22 = vmul.f32 %v11378_v7, %v10929_v44 }
 0x4ec   :  { %8323 = vmatpush3.bf16.msk.msra.mxu0 %vm10435_vm0, %v10428_v63  ;;  %8124 = vmatprep.mubr.msk.f32.mxu0 %vm8708_vm12, %v12251_v29  ;;  %v12332_v63 = vld [vmem:[#allocation58_spill] sm:$0xff] }
 0x4ed   :  { %v11394_v50 = vadd.f32 %v5889_v41, %v12331_v26  ;;  %8328 = vmatprep.subr.bf16.mxu0 %v12226_v3  ;;  %8118 = vmatmul.mubr.msk.f32.vlgmr.msra.gmra.mrb[38].mxu1 %vm1473_vm6, %v11389_v8  ;;  %v5890_v43 = vmul.f32 %v12327_v14, %v11389_v8  ;;  %v11494_v38 = vmul.f32 %v11389_v8, %v10929_v44  ;;  %v12333_v8 = vld [vmem:[#allocation67_spill] sm:$0xff] }
 0x4ee   :  { %8327 = vmatpush3.bf16.msk.msra.mxu1 %vm10468_vm1, %v12277_v40  ;;  %8131 = vmatprep.mubr.msk.f32.mxu1 %vm8708_vm12, %v12251_v29  ;;  %v11418_v40 = vmul.f32 %v11270_v35, %v10929_v44 }
 0x4ef   :  { %v11407_v52 = vadd.f32 %v5890_v43, %v12332_v63  ;;  %8332 = vmatprep.subr.bf16.mxu1 %v12226_v3 }
 0x59d   :  { %v4533_v57 = vpop.f32.mrb[32].mxu0 }
 0x59e   :  { %v5048_v36 = vmul.f32 %v4533_v57, %v10924_v34  ;;  %v8070_v14 = vpop.f32.mrb[33].mxu0  ;;  %v12334_v57 = vld [vmem:[#allocation39_spill] sm:$0xff] }
 0x59f   :  { %v12335_v14 = vld [vmem:[#allocation69_spill] sm:$0xff] }
 0x5a0   :  { %v4606_v62 = vpop.f32.mrb[32].mxu1  ;;  %v5056_v1 = vadd.f32 %v5048_v36, %v11412_v9 }
 0x5a1   :  { %v5049_v2 = vmul.f32 %v4606_v62, %v10924_v34  ;;  %v8077_v18 = vpop.f32.mrb[33].mxu1 }
 0x5a2   :  { %8125 = vmatmul.mubr.msk.f32.vlgmr.msra.gmra.mrb[40].mxu0 %vm1473_vm6, %v5056_v1 }
 0x5a3   :  { %v5057_v48 = vadd.f32 %v5049_v2, %v11418_v40  ;;  %8331 = vmatpush3.bf16.msk.msra.mxu0 %vm10585_vm4, %v10579_v59  ;;  %8138 = vmatprep.mubr.msk.f32.mxu0 %vm8708_vm12, %v12251_v29  ;;  %v11438_v59 = vmul.f32 %v11313_v33, %v10929_v44  ;;  %v12336_v2 = vld [vmem:[#allocation71_spill] sm:$0xff] }
 0x5a4   :  { %8336 = vmatprep.subr.bf16.mxu0 %v12226_v3 }
 0x5a5   :  { %8132 = vmatmul.mubr.msk.f32.vlgmr.msra.gmra.mrb[40].mxu1 %vm1473_vm6, %v5057_v48 }
 0x5a6   :  { %8335 = vmatpush3.bf16.msk.msra.mxu1 %vm10616_vm13, %v10608_v53  ;;  %8145 = vmatprep.mubr.msk.f32.mxu1 %vm8708_vm12, %v12251_v29 }
 0x5a7   :  { %8340 = vmatprep.subr.bf16.mxu1 %v12226_v3 }
 0x5aa   :  { %v4679_v51 = vpop.f32.mrb[34].mxu0 }
 0x5ab   :  { %v5050_v39 = vmul.f32 %v4679_v51, %v10924_v34  ;;  %v8084_v35 = vpop.f32.mrb[35].mxu0 }
 0x5ad   :  { %v4752_v10 = vpop.f32.mrb[34].mxu1  ;;  %v5058_v23 = vadd.f32 %v5050_v39, %v11438_v59 }
 0x5ae   :  { %v5051_v53 = vmul.f32 %v4752_v10, %v10924_v34  ;;  %v8091_v32 = vpop.f32.mrb[35].mxu1 }
 0x5af   :  { %8139 = vmatmul.mubr.msk.f32.vlgmr.msra.gmra.mrb[42].mxu0 %vm1473_vm6, %v5058_v23 }
 0x5b0   :  { %v5059_v6 = vadd.f32 %v5051_v53, %v11444_v30  ;;  %8339 = vmatpush3.bf16.msk.msra.mxu0 %vm10680_vm2, %v10671_v28  ;;  %8152 = vmatprep.mubr.msk.f32.mxu0 %vm8708_vm12, %v12251_v29  ;;  %v11464_v28 = vmul.f32 %v11347_v42, %v10929_v44 }
 0x5b1   :  { %8344 = vmatprep.subr.bf16.mxu0 %v12226_v3 }
 0x5b2   :  { %8146 = vmatmul.mubr.msk.f32.vlgmr.msra.gmra.mrb[42].mxu1 %vm1473_vm6, %v5059_v6 }
 0x5b3   :  { %8343 = vmatpush3.bf16.msk.msra.mxu1 %vm10723_vm10, %v10713_v15  ;;  %8159 = vmatprep.mubr.msk.f32.mxu1 %vm8708_vm12, %v12251_v29 }
 0x5b4   :  { %8348 = vmatprep.subr.bf16.mxu1 %v12226_v3 }
 0x5b5   :  { %v4825_v33 = vpop.f32.mrb[36].mxu0 }
 0x5b6   :  { %v5052_v56 = vmul.f32 %v4825_v33, %v10924_v34  ;;  %v8098_v49 = vpop.f32.mrb[37].mxu0 }
 0x5b8   :  { %v5060_v21 = vadd.f32 %v5052_v56, %v11464_v28 }
 0x5b9   :  { %v4898_v12 = vpop.f32.mrb[36].mxu1 }
 0x5ba   :  { %v5053_v15 = vmul.f32 %v4898_v12, %v10924_v34  ;;  %v8105_v47 = vpop.f32.mrb[37].mxu1  ;;  %8153 = vmatmul.mubr.msk.f32.vlgmr.msra.gmra.mrb[44].mxu0 %vm1473_vm6, %v5060_v21  ;;  %v12337_v12 = vld [vmem:[#allocation38_spill] sm:$0xff] }
 0x5bb   :  { %8347 = vmatpush3.bf16.msk.msra.mxu0 %vm10755_vm7, %v10747_v37  ;;  %8166 = vmatprep.mubr.msk.f32.mxu0 %vm8708_vm12, %v12251_v29 }
 0x5bc   :  { %v5061_v3 = vadd.f32 %v5053_v15, %v11470_v31 }
 0x5be   :  { %v4971_v42 = vpop.f32.mrb[38].mxu0  ;;  %8160 = vmatmul.mubr.msk.f32.vlgmr.msra.gmra.mrb[44].mxu1 %vm1473_vm6, %v5061_v3 }
 0x5bf   :  { %v5054_v55 = vmul.f32 %v4971_v42, %v10924_v34  ;;  %v8112_v5 = vpop.f32.mrb[39].mxu0  ;;  %8351 = vmatpush3.bf16.msk.msra.mxu1 %vm10789_vm15, %v10778_v11  ;;  %8173 = vmatprep.mubr.msk.f32.mxu1 %vm8708_vm12, %v12251_v29  ;;  %v12338_v42 = vld [vmem:[#allocation41_spill] sm:$0xff] }
 0x5c0   :  { %v5044_v19 = vpop.f32.mrb[38].mxu1  ;;  %v12339_v5 = vld [vmem:[#allocation70_spill] sm:$0xff] }
 0x5c1   :  { %v5062_v37 = vadd.f32 %v5054_v55, %v11482_v22  ;;  %v5055_v25 = vmul.f32 %v5044_v19, %v10924_v34  ;;  %v8119_v46 = vpop.f32.mrb[39].mxu1  ;;  %v12340_v19 = vld [vmem:[#allocation72_spill] sm:$0xff] }
 0x5c3   :  { %8167 = vmatmul.mubr.msk.f32.vlgmr.msra.gmra.mrb[46].mxu0 %vm1473_vm6, %v5062_v37  ;;  %v5063_v7 = vadd.f32 %v5055_v25, %v11494_v38 }
 0x5c5   :  { %8174 = vmatmul.mubr.msk.f32.vlgmr.msra.gmra.mrb[46].mxu1 %vm1473_vm6, %v5063_v7 }
 0x675   :  { %v5133_v11 = vpop.f32.mrb[40].mxu0 }
 0x676   :  { %v5648_v24 = vmul.f32 %v5133_v11, %v10924_v34  ;;  %v8126_v29 = vpop.f32.mrb[41].mxu0 }
 0x678   :  { %v5206_v4 = vpop.f32.mrb[40].mxu1  ;;  %v5656_v41 = vadd.f32 %v5648_v24, %v11412_v9 }
 0x679   :  { %v5649_v26 = vmul.f32 %v5206_v4, %v10924_v34  ;;  %v8133_v44 = vpop.f32.mrb[41].mxu1 }
 0x67a   :  { %v5705_v43 = vmul.f32 %v12333_v8, %v5656_v41 }
 0x67b   :  { %v5657_v63 = vadd.f32 %v5649_v26, %v11418_v40 }
 0x67c   :  { %v5754_v36 = vadd.f32 %v12334_v57, %v5705_v43 }
 0x67d   :  { %v5706_v62 = vmul.f32 %v12335_v14, %v5657_v63 }
 0x67e   :  { %v5762_v1 = vmul.f32 %v5754_v36, %v5754_v36 }
 0x67f   :  { %v11508_v18 = vadd.f32 %v12336_v2, %v5706_v62 }
 0x680   :  { %v5770_v48 = vmul.f32 %v5762_v1, %v5754_v36 }
 0x681   :  { %v5763_v51 = vmul.f32 %v11508_v18, %v11508_v18 }
 0x682   :  { %v5778_v9 = vmul.f32 0.044715, %v5770_v48  ;;  %v5279_v35 = vpop.f32.mrb[42].mxu0 }
 0x683   :  { %v5771_v39 = vmul.f32 %v5763_v51, %v11508_v18  ;;  %v5650_v10 = vmul.f32 %v5279_v35, %v10924_v34  ;;  %v8140_v23 = vpop.f32.mrb[43].mxu0 }
 0x684   :  { %v5786_v40 = vadd.f32 %v5778_v9, %v5754_v36 }
 0x685   :  { %v5779_v53 = vmul.f32 0.044715, %v5771_v39  ;;  %v5352_v32 = vpop.f32.mrb[42].mxu1  ;;  %v5658_v6 = vadd.f32 %v5650_v10, %v11438_v59 }
 0x686   :  { %v5651_v33 = vmul.f32 %v5352_v32, %v10924_v34  ;;  %v8147_v56 = vpop.f32.mrb[43].mxu1  ;;  %v5794_v49 = vmul.f32 0.7978846, %v5786_v40 }
 0x687   :  { %v5787_v21 = vadd.f32 %v5779_v53, %v11508_v18  ;;  %v5707_v15 = vmul.f32 %v12337_v12, %v5658_v6 }
 0x688   :  { %v5659_v47 = vadd.f32 %v5651_v33, %v11444_v30  ;;  %8611 = vtanh.f32 %v5794_v49 }
 0x689   :  { %v5795_v3 = vmul.f32 0.7978846, %v5787_v21  ;;  %v11520_v55 = vadd.f32 %v12338_v42, %v5707_v15 }
 0x68a   :  { %v5708_v37 = vmul.f32 %v12339_v5, %v5659_v47 }
 0x68b   :  { %8613 = vtanh.f32 %v5795_v3  ;;  %v5764_v59 = vmul.f32 %v11520_v55, %v11520_v55 }
 0x68c   :  { %v11526_v25 = vadd.f32 %v12340_v19, %v5708_v37 }
 0x68d   :  { %v5772_v46 = vmul.f32 %v5764_v59, %v11520_v55  ;;  %v5425_v30 = vpop.f32.mrb[44].mxu0 }
 0x68e   :  { %v5765_v7 = vmul.f32 %v11526_v25, %v11526_v25  ;;  %v5652_v11 = vmul.f32 %v5425_v30, %v10924_v34  ;;  %v8154_v24 = vpop.f32.mrb[45].mxu0  ;;  %v12341_v30 = vld [vmem:[#allocation46_spill] sm:$0xff] }
 0x68f   :  { %v5780_v29 = vmul.f32 0.044715, %v5772_v46 }
 0x690   :  { %v5773_v4 = vmul.f32 %v5765_v7, %v11526_v25  ;;  %v5660_v41 = vadd.f32 %v5652_v11, %v11464_v28 }
 0x691   :  { %v5788_v26 = vadd.f32 %v5780_v29, %v11520_v55  ;;  %v5498_v43 = vpop.f32.mrb[44].mxu1 }
 0x692   :  { %v5781_v44 = vmul.f32 0.044715, %v5773_v4  ;;  %v8612_v63 = vpop.eup %8611  ;;  %v5709_v62 = vmul.f32 %v12333_v8, %v5660_v41  ;;  %v5653_v1 = vmul.f32 %v5498_v43, %v10924_v34  ;;  %v8161_v48 = vpop.f32.mrb[45].mxu1  ;;  %v12343_v4 = vld [vmem:[#allocation75_spill] sm:$0xff] }
 0x693   :  { %v5810_v51 = vadd.f32 1.0, %v8612_v63  ;;  %v5796_v9 = vmul.f32 0.7978846, %v5788_v26 }
 0x694   :  { %v5789_v39 = vadd.f32 %v5781_v44, %v11526_v25  ;;  %v11539_v10 = vadd.f32 %v12334_v57, %v5709_v62  ;;  %v5661_v28 = vadd.f32 %v5653_v1, %v11470_v31 }
 0x695   :  { %v8614_v35 = vpop.eup %8613  ;;  %v5818_v23 = vmul.f32 0.5, %v5810_v51  ;;  %8615 = vtanh.f32 %v5796_v9 }
 0x696   :  { %v5811_v40 = vadd.f32 1.0, %v8614_v35  ;;  %v5797_v53 = vmul.f32 0.7978846, %v5789_v39  ;;  %v5571_v32 = vpop.f32.mrb[46].mxu0  ;;  %v5766_v8 = vmul.f32 %v11539_v10, %v11539_v10  ;;  %v5710_v6 = vmul.f32 %v12335_v14, %v5661_v28 }
 0x697   :  { %v5654_v33 = vmul.f32 %v5571_v32, %v10924_v34  ;;  %v8168_v56 = vpop.f32.mrb[47].mxu0  ;;  %v5826_v49 = vmul.f32 %v5818_v23, %v5754_v36 }
 0x698   :  { %v5819_v21 = vmul.f32 0.5, %v5811_v40  ;;  %8617 = vtanh.f32 %v5797_v53  ;;  %v5774_v57 = vmul.f32 %v5766_v8, %v11539_v10  ;;  %v11548_v31 = vadd.f32 %v12336_v2, %v5710_v6  ;;  %v5644_v47 = vpop.f32.mrb[46].mxu1  ;;  %v12342_v2 = vld [vmem:[#allocation77_spill] sm:$0xff] }
 0x699   :  { %v5662_v15 = vadd.f32 %v5654_v33, %v11482_v22  ;;  %v5834_v3 = vadd.f32 %v5826_v49, %v11112_v45  ;;  %v5655_v14 = vmul.f32 %v5644_v47, %v10924_v34  ;;  %v8175_v59 = vpop.f32.mrb[47].mxu1 }
 0x69a   :  { %v5827_v37 = vmul.f32 %v5819_v21, %v11508_v18  ;;  %v5782_v46 = vmul.f32 0.044715, %v5774_v57  ;;  %v5767_v36 = vmul.f32 %v11548_v31, %v11548_v31  ;;  %v12344_v21 = vld [vmem:[#allocation78_spill] sm:$0xff]  ;;  %v12345_v59 = vld [vmem:[#allocation47_spill] sm:$0xff] }
 0x69b   :  { %v5711_v7 = vmul.f32 %v12337_v12, %v5662_v15  ;;  %v5940_v11 = vmul.f32 %v12341_v30, %v5834_v3  ;;  %v5663_v22 = vadd.f32 %v5655_v14, %v11494_v38 }
 0x69c   :  { %v5835_v24 = vadd.f32 %v5827_v37, %v12342_v2  ;;  %v5790_v29 = vadd.f32 %v5782_v46, %v11539_v10  ;;  %v5775_v45 = vmul.f32 %v5767_v36, %v11548_v31  ;;  %v12346_v46 = vld [vmem:[#allocation97_spill] sm:$0xff] }
 0x69d   :  { %v11563_v18 = vadd.f32 %v12338_v42, %v5711_v7  ;;  %v11566_v34 = vadd.f32 %v5940_v11, %v11280_v17  ;;  %v5712_v12 = vmul.f32 %v12339_v5, %v5663_v22  ;;  %v12347_v22 = vld [vmem:[#allocation76_spill] sm:$0xff] }
 0x69e   :  { %v5941_v41 = vmul.f32 %v12343_v4, %v5835_v24  ;;  %v5798_v26 = vmul.f32 0.7978846, %v5790_v29  ;;  %v5783_v44 = vmul.f32 0.044715, %v5775_v45 }
 0x69f   :  { %v5768_v43 = vmul.f32 %v11563_v18, %v11563_v18  ;;  %v8616_v38 = vpop.eup %8615  ;;  %v5956_v63 = vmul.f32 %v11566_v34, %v11566_v34  ;;  %v11578_v42 = vadd.f32 %v12340_v19, %v5712_v12 }
 0x6a0   :  { %v11575_v62 = vadd.f32 %v5941_v41, %v11299_v58  ;;  %v5812_v17 = vadd.f32 1.0, %v8616_v38  ;;  %8619 = vtanh.f32 %v5798_v26  ;;  %v5791_v1 = vadd.f32 %v5783_v44, %v11548_v31 }
 0x6a1   :  { %v5776_v5 = vmul.f32 %v5768_v43, %v11563_v18  ;;  %v5964_v51 = vmul.f32 %v5956_v63, %v11566_v34  ;;  %v5769_v39 = vmul.f32 %v11578_v42, %v11578_v42 }
 0x6a2   :  { %v8618_v48 = vpop.eup %8617  ;;  %v5957_v9 = vmul.f32 %v11575_v62, %v11575_v62  ;;  %v5820_v58 = vmul.f32 0.5, %v5812_v17  ;;  %v5799_v28 = vmul.f32 0.7978846, %v5791_v1 }
 0x6a3   :  { %v5813_v35 = vadd.f32 1.0, %v8618_v48  ;;  %v5784_v19 = vmul.f32 0.044715, %v5776_v5  ;;  %v5972_v23 = vmul.f32 0.044715, %v5964_v51  ;;  %v5777_v53 = vmul.f32 %v5769_v39, %v11578_v42 }
 0x6a4   :  { %v5965_v40 = vmul.f32 %v5957_v9, %v11575_v62  ;;  %v5828_v32 = vmul.f32 %v5820_v58, %v11520_v55  ;;  %8621 = vtanh.f32 %v5799_v28 }
 0x6a5   :  { %v5821_v8 = vmul.f32 0.5, %v5813_v35  ;;  %v5792_v6 = vadd.f32 %v5784_v19, %v11563_v18  ;;  %v5980_v33 = vadd.f32 %v5972_v23, %v11566_v34  ;;  %v5785_v49 = vmul.f32 0.044715, %v5777_v53 }
 0x6a6   :  { %v5973_v56 = vmul.f32 0.044715, %v5965_v40  ;;  %v5836_v57 = vadd.f32 %v5828_v32, %v12344_v21 }
 0x6a7   :  { %v5829_v15 = vmul.f32 %v5821_v8, %v11526_v25  ;;  %v5800_v47 = vmul.f32 0.7978846, %v5792_v6  ;;  %v5988_v3 = vmul.f32 0.7978846, %v5980_v33  ;;  %v5793_v14 = vadd.f32 %v5785_v49, %v11578_v42 }
 0x6a8   :  { %v5981_v37 = vadd.f32 %v5973_v56, %v11575_v62  ;;  %v5942_v55 = vmul.f32 %v12345_v59, %v5836_v57 }
 0x6a9   :  { %v5837_v36 = vadd.f32 %v5829_v15, %v12346_v46  ;;  %8623 = vtanh.f32 %v5800_v47  ;;  %v5801_v11 = vmul.f32 0.7978846, %v5793_v14  ;;  %v12349_v46 = vld [vmem:[#allocation56_spill] sm:$0xff] }
 0x6aa   :  { %8625 = vtanh.f32 %v5988_v3  ;;  %v5989_v7 = vmul.f32 0.7978846, %v5981_v37  ;;  %v8620_v2 = vpop.eup %8619  ;;  %v11599_v24 = vadd.f32 %v5942_v55, %v11330_v16  ;;  %v12348_v3 = vld [vmem:[#allocation49_spill] sm:$0xff] }
 0x6ab   :  { %v5943_v25 = vmul.f32 %v12347_v22, %v5837_v36  ;;  %v5814_v29 = vadd.f32 1.0, %v8620_v2 }
 0x6ac   :  { %8627 = vtanh.f32 %v5989_v7  ;;  %v5958_v45 = vmul.f32 %v11599_v24, %v11599_v24 }
 0x6ad   :  { %v11605_v41 = vadd.f32 %v5943_v25, %v11343_v54  ;;  %8629 = vtanh.f32 %v5801_v11  ;;  %v5822_v12 = vmul.f32 0.5, %v5814_v29  ;;  %v12351_v25 = vld [vmem:[#allocation81_spill] sm:$0xff] }
 0x6ae   :  { %v8622_v26 = vpop.eup %8621  ;;  %v5966_v44 = vmul.f32 %v5958_v45, %v11599_v24 }
 0x6af   :  { %v5959_v43 = vmul.f32 %v11605_v41, %v11605_v41  ;;  %v5830_v16 = vmul.f32 %v5822_v12, %v11539_v10  ;;  %v5815_v38 = vadd.f32 1.0, %v8622_v26 }
 0x6b0   :  { %v5974_v63 = vmul.f32 0.044715, %v5966_v44 }
 0x6b1   :  { %v5967_v17 = vmul.f32 %v5959_v43, %v11605_v41  ;;  %v5838_v1 = vadd.f32 %v5830_v16, %v11192_v27  ;;  %v5823_v5 = vmul.f32 0.5, %v5815_v38 }
 0x6b2   :  { %v5982_v54 = vadd.f32 %v5974_v63, %v11599_v24 }
 0x6b3   :  { %v8624_v48 = vpop.eup %8623  ;;  %v5975_v51 = vmul.f32 0.044715, %v5967_v17  ;;  %v5944_v39 = vmul.f32 %v12341_v30, %v5838_v1  ;;  %v5831_v58 = vmul.f32 %v5823_v5, %v11548_v31 }
 0x6b4   :  { %v8626_v9 = vpop.eup %8625  ;;  %v5816_v35 = vadd.f32 1.0, %v8624_v48  ;;  %v5990_v19 = vmul.f32 0.7978846, %v5982_v54 }
 0x6b5   :  { %v6004_v28 = vadd.f32 1.0, %v8626_v9  ;;  %v5983_v10 = vadd.f32 %v5975_v51, %v11605_v41  ;;  %v11618_v40 = vadd.f32 %v5944_v39, %v11359_v20  ;;  %v5839_v27 = vadd.f32 %v5831_v58, %v11207_v13 }
 0x6b6   :  { %v8628_v23 = vpop.eup %8627  ;;  %v5824_v53 = vmul.f32 0.5, %v5816_v35  ;;  %8631 = vtanh.f32 %v5990_v19 }
 0x6b7   :  { %v8630_v32 = vpop.eup %8629  ;;  %v6012_v8 = vmul.f32 0.5, %v6004_v28  ;;  %v6005_v6 = vadd.f32 1.0, %v8628_v23  ;;  %v5991_v33 = vmul.f32 0.7978846, %v5983_v10  ;;  %v5960_v31 = vmul.f32 %v11618_v40, %v11618_v40 }
 0x6b8   :  { %v5945_v30 = vmul.f32 %v12343_v4, %v5839_v27  ;;  %v5832_v56 = vmul.f32 %v5824_v53, %v11563_v18  ;;  %v5817_v49 = vadd.f32 1.0, %v8630_v32  ;;  %v12352_v27 = vld [vmem:[#allocation53_spill] sm:$0xff] }
 0x6b9   :  { %v11626_v21 = vmul.f32 %v6012_v8, %v11566_v34  ;;  %v6013_v20 = vmul.f32 0.5, %v6005_v6  ;;  %8633 = vtanh.f32 %v5991_v33  ;;  %v5968_v13 = vmul.f32 %v5960_v31, %v11618_v40  ;;  %v12353_v33 = vld [vmem:[#allocation59_spill] sm:$0xff] }
 0x6ba   :  { %v11630_v57 = vadd.f32 %v5945_v30, %v11375_v60  ;;  %v5840_v15 = vadd.f32 %v5832_v56, %v11223_v61  ;;  %v5825_v47 = vmul.f32 0.5, %v5817_v49  ;;  %v12350_v61 = vld [vmem:[#allocation79_spill] sm:$0xff]  ;;  %v12354_v30 = vld [vmem:[#allocation80_spill] sm:$0xff] }
 0x6bb   :  { %v6069_v37 = vmul.f32 %v12348_v3, %v11626_v21  ;;  %v11636_v4 = vmul.f32 %v6013_v20, %v11575_v62  ;;  %v5976_v18 = vmul.f32 0.044715, %v5968_v13 }
 0x6bc   :  { %v5961_v34 = vmul.f32 %v11630_v57, %v11630_v57  ;;  %v5946_v14 = vmul.f32 %v12345_v59, %v5840_v15  ;;  %v5833_v55 = vmul.f32 %v5825_v47, %v11578_v42 }
 0x6bd   :  { %v11643_v60 = vadd.f32 %v12349_v46, %v6069_v37  ;;  %v6070_v36 = vmul.f32 %v12350_v61, %v11636_v4  ;;  %v5984_v7 = vadd.f32 %v5976_v18, %v11618_v40 }
 0x6be   :  { %v5969_v11 = vmul.f32 %v5961_v34, %v11630_v57  ;;  %v11650_v62 = vadd.f32 %v5946_v14, %v11394_v50  ;;  %v5841_v2 = vadd.f32 %v5833_v55, %v11236_v0 }
 0x6bf   :  { %v6126_v59 = vmul.f32 %v11643_v60, %v11643_v60  ;;  %v11656_v42 = vadd.f32 %v12351_v25, %v6070_v36  ;;  %v5992_v29 = vmul.f32 0.7978846, %v5984_v7 }
 0x6c0   :  { %v5977_v45 = vmul.f32 0.044715, %v5969_v11  ;;  %v5962_v12 = vmul.f32 %v11650_v62, %v11650_v62  ;;  %v5947_v26 = vmul.f32 %v12347_v22, %v5841_v2  ;;  %v8632_v44 = vpop.eup %8631 }
 0x6c1   :  { %v6134_v43 = vmul.f32 %v6126_v59, %v11643_v60  ;;  %v6127_v50 = vmul.f32 %v11656_v42, %v11656_v42  ;;  %v6006_v0 = vadd.f32 1.0, %v8632_v44  ;;  %8635 = vtanh.f32 %v5992_v29 }
 0x6c2   :  { %v5985_v16 = vadd.f32 %v5977_v45, %v11630_v57  ;;  %v5970_v38 = vmul.f32 %v5962_v12, %v11650_v62  ;;  %v11668_v5 = vadd.f32 %v5947_v26, %v11407_v52 }
 0x6c3   :  { %v8634_v63 = vpop.eup %8633  ;;  %v6142_v17 = vmul.f32 0.044715, %v6134_v43  ;;  %v6135_v1 = vmul.f32 %v6127_v50, %v11656_v42  ;;  %v6014_v22 = vmul.f32 0.5, %v6006_v0 }
 0x6c4   :  { %v6007_v48 = vadd.f32 1.0, %v8634_v63  ;;  %v5993_v54 = vmul.f32 0.7978846, %v5985_v16  ;;  %v5978_v51 = vmul.f32 0.044715, %v5970_v38  ;;  %v5963_v58 = vmul.f32 %v11668_v5, %v11668_v5 }
 0x6c5   :  { %v6150_v9 = vadd.f32 %v6142_v17, %v11643_v60  ;;  %v6143_v39 = vmul.f32 0.044715, %v6135_v1  ;;  %v11674_v35 = vmul.f32 %v6014_v22, %v11599_v24 }
 0x6c6   :  { %v6015_v28 = vmul.f32 0.5, %v6007_v48  ;;  %8637 = vtanh.f32 %v5993_v54  ;;  %v5986_v19 = vadd.f32 %v5978_v51, %v11650_v62  ;;  %v5971_v23 = vmul.f32 %v5963_v58, %v11668_v5 }
 0x6c7   :  { %v6158_v10 = vmul.f32 0.7978846, %v6150_v9  ;;  %v6151_v52 = vadd.f32 %v6143_v39, %v11656_v42  ;;  %v6071_v53 = vmul.f32 %v12352_v27, %v11674_v35 }
 0x6c8   :  { %v11682_v32 = vmul.f32 %v6015_v28, %v11605_v41  ;;  %v5994_v8 = vmul.f32 0.7978846, %v5986_v19  ;;  %v5979_v24 = vmul.f32 0.044715, %v5971_v23 }
 0x6c9   :  { %8639 = vtanh.f32 %v6158_v10  ;;  %v6159_v6 = vmul.f32 0.7978846, %v6151_v52  ;;  %v11685_v31 = vadd.f32 %v12353_v33, %v6071_v53 }
 0x6ca   :  { %v6072_v56 = vmul.f32 %v12354_v30, %v11682_v32  ;;  %8641 = vtanh.f32 %v5994_v8  ;;  %v5987_v49 = vadd.f32 %v5979_v24, %v11668_v5 }
 0x6cb   :  { %8643 = vtanh.f32 %v6159_v6 }
 0x6cc   :  { %8702 = shalt.err (!%p8699_p2)
}
 0x6cd   :  { %s8711_s22 = smov [#allocation3]   ;;  %v8636_v41 = vpop.eup %8635  ;;  %v6128_v20 = vmul.f32 %v11685_v31, %v11685_v31  ;;  %v12355_v13 = vld [vmem:[#allocation82_spill] sm:$0xff]  ;;  %v5995_v37 = vmul.f32 0.7978846, %v5987_v49  ;;  %v12356_v28 = vld [vmem:[#allocation60_spill] sm:$0xff]  ;;  %v12357_v10 = vld [vmem:[#allocation83_spill] sm:$0xff] }
 0x6ce   :  { %7278 = dma.smem_to_hbm %s8711_s22, 16, %s11999_s10, [#allocation4]   ;;  %v11705_v15 = vadd.f32 %v12355_v13, %v6072_v56  ;;  %v6008_v47 = vadd.f32 1.0, %v8636_v41  ;;  %v12358_v23 = vld [vmem:[#allocation61_spill] sm:$0xff] }
 0x6cf   :  { %v6136_v18 = vmul.f32 %v6128_v20, %v11685_v31  ;;  %8645 = vtanh.f32 %v5995_v37  ;;  %v12361_v49 = vld [vmem:[#allocation85_spill] sm:$0xff]  ;;  %v12362_v20 = vld [vmem:[#allocation63_spill] sm:$0xff]  ;;  %v12363_v37 = vld [vmem:[#allocation86_spill] sm:$0xff] }
 0x6d0   :  { %v6129_v34 = vmul.f32 %v11705_v15, %v11705_v15  ;;  %v6016_v14 = vmul.f32 0.5, %v6008_v47  ;;  %v8638_v55 = vpop.eup %8637 }
 0x6d1   :  { %v6144_v36 = vmul.f32 0.044715, %v6136_v18  ;;  %v6009_v2 = vadd.f32 1.0, %v8638_v55 }
 0x6d2   :  { %v6137_v7 = vmul.f32 %v6129_v34, %v11705_v15  ;;  %v11712_v11 = vmul.f32 %v6016_v14, %v11618_v40 }
 0x6d3   :  { %v6152_v59 = vadd.f32 %v6144_v36, %v11685_v31  ;;  %v8640_v45 = vpop.eup %8639  ;;  %v6017_v26 = vmul.f32 0.5, %v6009_v2 }
 0x6d4   :  { %v6145_v29 = vmul.f32 0.044715, %v6137_v7  ;;  %v6073_v12 = vmul.f32 %v12348_v3, %v11712_v11  ;;  %v8642_v44 = vpop.eup %8641  ;;  %v6174_v43 = vadd.f32 1.0, %v8640_v45 }
 0x6d5   :  { %v6160_v50 = vmul.f32 0.7978846, %v6152_v59  ;;  %v8644_v16 = vpop.eup %8643  ;;  %v11722_v40 = vmul.f32 %v6017_v26, %v11630_v57  ;;  %v6010_v63 = vadd.f32 1.0, %v8642_v44 }
 0x6d6   :  { %v6153_v0 = vadd.f32 %v6145_v29, %v11705_v15  ;;  %v11719_v38 = vadd.f32 %v12349_v46, %v6073_v12  ;;  %v6182_v17 = vmul.f32 0.5, %v6174_v43  ;;  %v6175_v1 = vadd.f32 1.0, %v8644_v16 }
 0x6d7   :  { %8647 = vtanh.f32 %v6160_v50  ;;  %v6074_v48 = vmul.f32 %v12350_v61, %v11722_v40  ;;  %v6018_v54 = vmul.f32 0.5, %v6010_v63 }
 0x6d8   :  { %v6161_v22 = vmul.f32 0.7978846, %v6153_v0  ;;  %v6130_v3 = vmul.f32 %v11719_v38, %v11719_v38  ;;  %v6190_v51 = vmul.f32 %v6182_v17, %v11643_v60  ;;  %v6183_v9 = vmul.f32 0.5, %v6175_v1  ;;  %v12359_v60 = vld [vmem:[#allocation84_spill] sm:$0xff] }
 0x6d9   :  { %v11731_v57 = vadd.f32 %v12351_v25, %v6074_v48  ;;  %v11734_v39 = vmul.f32 %v6018_v54, %v11650_v62  ;;  %v8646_v58 = vpop.eup %8645  ;;  %v12360_v62 = vld [vmem:[#allocation62_spill] sm:$0xff] }
 0x6da   :  { %8649 = vtanh.f32 %v6161_v22  ;;  %v6138_v46 = vmul.f32 %v6130_v3, %v11719_v38  ;;  %v6239_v19 = vmul.f32 %v12356_v28, %v6190_v51  ;;  %v6240_v52 = vmul.f32 %v12357_v10, %v6190_v51 }
 0x6db   :  { %v6241_v61 = vmul.f32 %v12358_v23, %v6190_v51  ;;  %v6191_v53 = vmul.f32 %v6183_v9, %v11656_v42  ;;  %v6242_v8 = vmul.f32 %v12359_v60, %v6190_v51  ;;  %v6131_v24 = vmul.f32 %v11731_v57, %v11731_v57  ;;  %v12364_v9 = vld [vmem:[#allocation64_spill] sm:$0xff] }
 0x6dc   :  { %v6146_v6 = vmul.f32 0.044715, %v6138_v46  ;;  %v6075_v25 = vmul.f32 %v12352_v27, %v11734_v39  ;;  %v6011_v55 = vadd.f32 1.0, %v8646_v58 }
 0x6dd   :  { %v6288_v56 = vmul.f32 %v12360_v62, %v6191_v53  ;;  %v6289_v41 = vmul.f32 %v12361_v49, %v6191_v53  ;;  %v6290_v47 = vmul.f32 %v12362_v20, %v6191_v53  ;;  %v6291_v18 = vmul.f32 %v12363_v37, %v6191_v53  ;;  %v12367_v53 = vld [vmem:[#allocation91_spill] sm:$0xff] }
 0x6de   :  { %v6154_v34 = vadd.f32 %v6146_v6, %v11719_v38  ;;  %v6139_v42 = vmul.f32 %v6131_v24, %v11731_v57  ;;  %v11752_v14 = vadd.f32 %v12353_v33, %v6075_v25  ;;  %v6019_v12 = vmul.f32 0.5, %v6011_v55  ;;  %v12371_v55 = vld [vmem:[#allocation95_spill] sm:$0xff] }
 0x6df   :  { %v6296_v36 = vadd.f32 %v6288_v56, %v6239_v19  ;;  %v6297_v7 = vadd.f32 %v6289_v41, %v6240_v52  ;;  %v6298_v2 = vadd.f32 %v6290_v47, %v6241_v61  ;;  %v6299_v27 = vadd.f32 %v6291_v18, %v6242_v8  ;;  %v12366_v19 = vld [vmem:[#allocation65_spill] sm:$0xff]  ;;  %v12368_v56 = vld [vmem:[#allocation66_spill] sm:$0xff]  ;;  %v12369_v47 = vld [vmem:[#allocation92_spill] sm:$0xff] }
 0x6e0   :  { %v6162_v59 = vmul.f32 0.7978846, %v6154_v34  ;;  %v6147_v29 = vmul.f32 0.044715, %v6139_v42  ;;  %v6132_v45 = vmul.f32 %v11752_v14, %v11752_v14  ;;  %v11759_v0 = vmul.f32 %v6019_v12, %v11668_v5  ;;  %v12365_v5 = vld [vmem:[#allocation88_spill] sm:$0xff] }
 0x6e1   :  { %v8648_v26 = vpop.eup %8647  ;;  %v12370_v34 = vld [vmem:[#allocation68_spill] sm:$0xff] }
 0x6e2   :  { %v6176_v44 = vadd.f32 1.0, %v8648_v26  ;;  %8651 = vtanh.f32 %v6162_v59  ;;  %v6155_v43 = vadd.f32 %v6147_v29, %v11731_v57  ;;  %v6140_v50 = vmul.f32 %v6132_v45, %v11752_v14 }
 0x6e3   :  { %v6076_v22 = vmul.f32 %v12354_v30, %v11759_v0 }
 0x6e4   :  { %v8650_v33 = vpop.eup %8649  ;;  %v6184_v16 = vmul.f32 0.5, %v6176_v44  ;;  %v6163_v17 = vmul.f32 0.7978846, %v6155_v43  ;;  %v6148_v1 = vmul.f32 0.044715, %v6140_v50 }
 0x6e5   :  { %v6177_v63 = vadd.f32 1.0, %v8650_v33  ;;  %v11766_v51 = vadd.f32 %v12355_v13, %v6076_v22  ;;  %v12373_v22 = vld [vmem:[#allocation100_spill] sm:$0xff] }
 0x6e6   :  { %v6192_v3 = vmul.f32 %v6184_v16, %v11685_v31  ;;  %8653 = vtanh.f32 %v6163_v17  ;;  %v6156_v54 = vadd.f32 %v6148_v1, %v11752_v14 }
 0x6e7   :  { %v6185_v48 = vmul.f32 0.5, %v6177_v63  ;;  %v6133_v31 = vmul.f32 %v11766_v51, %v11766_v51  ;;  %v12372_v63 = vld [vmem:[#allocation87_spill] sm:$0xff] }
 0x6e8   :  { %v6345_v46 = vmul.f32 %v12364_v9, %v6192_v3  ;;  %v6346_v58 = vmul.f32 %v12365_v5, %v6192_v3  ;;  %v6347_v52 = vmul.f32 %v12366_v19, %v6192_v3  ;;  %v6348_v8 = vmul.f32 %v12367_v53, %v6192_v3 }
 0x6e9   :  { %v6193_v61 = vmul.f32 %v6185_v48, %v11705_v15  ;;  %v6164_v30 = vmul.f32 0.7978846, %v6156_v54  ;;  %v6141_v45 = vmul.f32 %v6133_v31, %v11766_v51  ;;  %v12374_v48 = vld [vmem:[#allocation90_spill] sm:$0xff] }
 0x6ea   :  { %v6353_v6 = vadd.f32 %v6345_v46, %v6296_v36  ;;  %v6354_v24 = vadd.f32 %v6346_v58, %v6297_v7  ;;  %v6355_v25 = vadd.f32 %v6347_v52, %v6298_v2  ;;  %v6356_v41 = vadd.f32 %v6348_v8, %v6299_v27 }
 0x6eb   :  { %v6402_v13 = vmul.f32 %v12368_v56, %v6193_v61  ;;  %v6403_v18 = vmul.f32 %v12369_v47, %v6193_v61  ;;  %v6404_v42 = vmul.f32 %v12370_v34, %v6193_v61  ;;  %v6405_v59 = vmul.f32 %v12371_v55, %v6193_v61 }
 0x6ec   :  { %v8652_v29 = vpop.eup %8651  ;;  %8655 = vtanh.f32 %v6164_v30  ;;  %v6149_v2 = vmul.f32 0.044715, %v6141_v45 }
 0x6ed   :  { %v6410_v15 = vadd.f32 %v6402_v13, %v6353_v6  ;;  %v6411_v12 = vadd.f32 %v6403_v18, %v6354_v24  ;;  %v6412_v26 = vadd.f32 %v6404_v42, %v6355_v25  ;;  %v6413_v44 = vadd.f32 %v6405_v59, %v6356_v41 }
 0x6ee   :  { %v6178_v36 = vadd.f32 1.0, %v8652_v29  ;;  %v6157_v1 = vadd.f32 %v6149_v2, %v11766_v51 }
 0x6ef   :  { %v6418_v7 = vadd.f32 %v6410_v15, %v11626_v21  ;;  %v6419_v27 = vadd.f32 %v6411_v12, %v11636_v4  ;;  %v6420_v43 = vadd.f32 %v6412_v26, %v11674_v35  ;;  %v6421_v50 = vadd.f32 %v6413_v44, %v11682_v32  ;;  %v12375_v21 = vld [vmem:[#allocation103_spill] sm:$0xff] }
 0x6f0   :  { %v6186_v33 = vmul.f32 0.5, %v6178_v36  ;;  %v8654_v16 = vpop.eup %8653  ;;  %v6165_v58 = vmul.f32 0.7978846, %v6157_v1 }
 0x6f1   :  { %v11785_v17 = vadd.f32 %v12372_v63, %v6418_v7  ;;  %v11789_v3 = vadd.f32 %v12373_v22, %v6419_v27  ;;  %v11792_v54 = vadd.f32 %v12374_v48, %v6420_v43  ;;  %v11795_v46 = vadd.f32 %v12375_v21, %v6421_v50 }
 0x6f2   :  { %v6194_v4 = vmul.f32 %v6186_v33, %v11719_v38  ;;  %v6179_v32 = vadd.f32 1.0, %v8654_v16  ;;  %8657 = vtanh.f32 %v6165_v58 }
 0x6f3   :  { %v6475_v35 = vmul.f32 %v11785_v17, %v11785_v17  ;;  %v6476_v52 = vmul.f32 %v11789_v3, %v11789_v3  ;;  %v6477_v61 = vmul.f32 %v11792_v54, %v11792_v54  ;;  %v6478_v8 = vmul.f32 %v11795_v46, %v11795_v46 }
 0x6f4   :  { %v6243_v31 = vmul.f32 %v12356_v28, %v6194_v4  ;;  %v6187_v6 = vmul.f32 0.5, %v6179_v32  ;;  %v6244_v18 = vmul.f32 %v12357_v10, %v6194_v4  ;;  %v6245_v42 = vmul.f32 %v12358_v23, %v6194_v4 }
 0x6f5   :  { %v6483_v30 = vmul.f32 %v6475_v35, %v11785_v17  ;;  %v6484_v38 = vmul.f32 %v6476_v52, %v11789_v3  ;;  %v6485_v24 = vmul.f32 %v6477_v61, %v11792_v54  ;;  %v6486_v25 = vmul.f32 %v6478_v8, %v11795_v46 }
 0x6f6   :  { %v8656_v13 = vpop.eup %8655  ;;  %v6195_v59 = vmul.f32 %v6187_v6, %v11731_v57  ;;  %v6246_v28 = vmul.f32 %v12359_v60, %v6194_v4 }
 0x6f7   :  { %v6491_v41 = vmul.f32 0.044715, %v6483_v30  ;;  %v6492_v29 = vmul.f32 0.044715, %v6484_v38  ;;  %v6493_v15 = vmul.f32 0.044715, %v6485_v24 }
 0x6f8   :  { %v6494_v45 = vmul.f32 0.044715, %v6486_v25  ;;  %v6292_v26 = vmul.f32 %v12360_v62, %v6195_v59  ;;  %v6293_v44 = vmul.f32 %v12361_v49, %v6195_v59  ;;  %v6294_v36 = vmul.f32 %v12362_v20, %v6195_v59 }
 0x6f9   :  { %v6499_v12 = vadd.f32 %v6491_v41, %v11785_v17  ;;  %v6500_v7 = vadd.f32 %v6492_v29, %v11789_v3  ;;  %v6501_v10 = vadd.f32 %v6493_v15, %v11792_v54  ;;  %v6180_v57 = vadd.f32 1.0, %v8656_v13  ;;  %v11833_v13 = vpop.permute.xlu1 %6553 }
 0x6fa   :  { %v6502_v23 = vadd.f32 %v6494_v45, %v11795_v46  ;;  %v6300_v27 = vadd.f32 %v6292_v26, %v6243_v31  ;;  %v6301_v43 = vadd.f32 %v6293_v44, %v6244_v18  ;;  %v6302_v50 = vadd.f32 %v6294_v36, %v6245_v42  ;;  %v11835_v18 = vpop.permute.xlu0 %6558 }
 0x6fb   :  { %v6507_v2 = vmul.f32 0.7978846, %v6499_v12  ;;  %v6508_v60 = vmul.f32 0.7978846, %v6500_v7  ;;  %v6509_v33 = vmul.f32 0.7978846, %v6501_v10  ;;  %v6295_v62 = vmul.f32 %v12363_v37, %v6195_v59 }
 0x6fc   :  { %v6510_v16 = vmul.f32 0.7978846, %v6502_v23  ;;  %v6188_v49 = vmul.f32 0.5, %v6180_v57  ;;  %v8658_v4 = vpop.eup %8657 }
 0x6fd   :  { %8659 = vtanh.f32 %v6507_v2  ;;  %v6303_v20 = vadd.f32 %v6295_v62, %v6246_v28  ;;  %v6181_v52 = vadd.f32 1.0, %v8658_v4 }
 0x6fe   :  { %8661 = vtanh.f32 %v6508_v60  ;;  %v6196_v1 = vmul.f32 %v6188_v49, %v11752_v14 }
 0x6ff   :  { %8663 = vtanh.f32 %v6509_v33  ;;  %v6189_v31 = vmul.f32 0.5, %v6181_v52 }
 0x700   :  { %8665 = vtanh.f32 %v6510_v16  ;;  %v6349_v35 = vmul.f32 %v12364_v9, %v6196_v1  ;;  %v6350_v32 = vmul.f32 %v12365_v5, %v6196_v1  ;;  %v6351_v58 = vmul.f32 %v12366_v19, %v6196_v1 }
 0x701   :  { %v6352_v61 = vmul.f32 %v12367_v53, %v6196_v1  ;;  %v6197_v38 = vmul.f32 %v6189_v31, %v11766_v51 }
 0x702   :  { %v6357_v8 = vadd.f32 %v6349_v35, %v6300_v27  ;;  %v6358_v37 = vadd.f32 %v6350_v32, %v6301_v43  ;;  %v6359_v30 = vadd.f32 %v6351_v58, %v6302_v50  ;;  %v11849_v27 = vpop.permute.xlu1 %6563 }
 0x703   :  { %v6360_v6 = vadd.f32 %v6352_v61, %v6303_v20  ;;  %v6406_v14 = vmul.f32 %v12368_v56, %v6197_v38  ;;  %v6407_v25 = vmul.f32 %v12369_v47, %v6197_v38  ;;  %v6408_v9 = vmul.f32 %v12370_v34, %v6197_v38 }
 0x704   :  { %v6409_v5 = vmul.f32 %v12371_v55, %v6197_v38 }
 0x705   :  { %v6414_v59 = vadd.f32 %v6406_v14, %v6357_v8  ;;  %v6415_v29 = vadd.f32 %v6407_v25, %v6358_v37  ;;  %v6416_v51 = vadd.f32 %v6408_v9, %v6359_v30 }
 0x706   :  { %v6417_v28 = vadd.f32 %v6409_v5, %v6360_v6  ;;  %v6643_v52 = vpop.permute.xlu1 %6642 }
 0x707   :  { %v8660_v24 = vpop.eup %8659  ;;  %v6422_v34 = vadd.f32 %v6414_v59, %v11712_v11  ;;  %v6423_v55 = vadd.f32 %v6415_v29, %v11722_v40  ;;  %v6424_v36 = vadd.f32 %v6416_v51, %v11734_v39 }
 0x708   :  { %v8662_v19 = vpop.eup %8661  ;;  %v6523_v53 = vadd.f32 1.0, %v8660_v24  ;;  %v6425_v7 = vadd.f32 %v6417_v28, %v11759_v0  ;;  %v11859_v0 = vpop.permute.xlu0 %6568 }
 0x709   :  { %v8664_v41 = vpop.eup %8663  ;;  %v6524_v42 = vadd.f32 1.0, %v8662_v19  ;;  %v11844_v57 = vadd.f32 %v12372_v63, %v6422_v34  ;;  %v11847_v2 = vadd.f32 %v12373_v22, %v6423_v55 }
 0x70a   :  { %v8666_v15 = vpop.eup %8665  ;;  %v6525_v45 = vadd.f32 1.0, %v8664_v41  ;;  %v6531_v56 = vmul.f32 0.5, %v6523_v53  ;;  %v11857_v39 = vadd.f32 %v12375_v21, %v6425_v7  ;;  %v6661_v34 = vpop.permute.xlu1 %6660 }
 0x70b   :  { %v6526_v47 = vadd.f32 1.0, %v8666_v15  ;;  %v6532_v12 = vmul.f32 0.5, %v6524_v42  ;;  %v6479_v22 = vmul.f32 %v11844_v57, %v11844_v57 }
 0x70c   :  { %v6533_v26 = vmul.f32 0.5, %v6525_v45  ;;  %v6539_v44 = vmul.f32 %v6531_v56, %v11785_v17  ;;  %v11854_v17 = vadd.f32 %v12374_v48, %v6424_v36  ;;  %v6482_v50 = vmul.f32 %v11857_v39, %v11857_v39  ;;  %v6652_v31 = vpop.permute.xlu0 %6651  ;;  %v12376_v36 = vld [vmem:[#allocation96_spill] sm:$0xff] }
 0x70d   :  { %v6534_v10 = vmul.f32 0.5, %v6526_v47  ;;  %v6540_v23 = vmul.f32 %v6532_v12, %v11789_v3  ;;  %v6487_v16 = vmul.f32 %v6479_v22, %v11844_v57  ;;  %v11886_v7 = vrot.slane %v6643_v52, %v12376_v36 }
 0x70e   :  { %v6541_v11 = vmul.f32 %v6533_v26, %v11792_v54  ;;  %v6571_v40 = vmul.f32 %v11833_v13, %v6539_v44  ;;  %v6480_v54 = vmul.f32 %v11847_v2, %v11847_v2  ;;  %v6481_v21 = vmul.f32 %v11854_v17, %v11854_v17 }
 0x70f   :  { %v6542_v63 = vmul.f32 %v6534_v10, %v11795_v46  ;;  %v6572_v3 = vmul.f32 %v11835_v18, %v6540_v23  ;;  %v6490_v58 = vmul.f32 %v6482_v50, %v11857_v39  ;;  %v6495_v37 = vmul.f32 0.044715, %v6487_v16 }
 0x710   :  { %v6573_v43 = vmul.f32 %v11849_v27, %v6541_v11  ;;  %v6579_v48 = vsel %vm1473_vm6, %v6571_v40, 0.0  ;;  %v6488_v20 = vmul.f32 %v6480_v54, %v11847_v2  ;;  %v6489_v1 = vmul.f32 %v6481_v21, %v11854_v17  ;;  %v6670_v44 = vpop.permute.xlu0 %6669 }
 0x711   :  { %v6574_v46 = vmul.f32 %v11859_v0, %v6542_v63  ;;  %v6580_v60 = vrot.slane %v6579_v48, 4  ;;  %v6586_v33 = vsel %vm1473_vm6, %v6572_v3, 0.0  ;;  %v6498_v14 = vmul.f32 0.044715, %v6490_v58 }
 0x712   :  { %v6587_v62 = vrot.slane %v6586_v33, 4  ;;  %v6593_v49 = vsel %vm1473_vm6, %v6573_v43, 0.0  ;;  %v6496_v30 = vmul.f32 0.044715, %v6488_v20  ;;  %v6497_v24 = vmul.f32 0.044715, %v6489_v1 }
 0x713   :  { %v6581_v4 = vadd.f32 %v6580_v60, %v6579_v48  ;;  %v6594_v35 = vrot.slane %v6593_v49, 4  ;;  %v6600_v32 = vsel %vm1473_vm6, %v6574_v46, 0.0  ;;  %v6503_v5 = vadd.f32 %v6495_v37, %v11844_v57  ;;  %v12377_v37 = vld [vmem:[#allocation101_spill] sm:$0xff] }
 0x714   :  { %v6588_v61 = vadd.f32 %v6587_v62, %v6586_v33  ;;  %v6601_v8 = vrot.slane %v6600_v32, 4  ;;  %v6504_v19 = vadd.f32 %v6496_v30, %v11847_v2  ;;  %v6505_v42 = vadd.f32 %v6497_v24, %v11854_v17  ;;  %v12378_v24 = vld [vmem:[#allocation89_spill] sm:$0xff] }
 0x715   :  { %v6582_v6 = vrot.slane %v6581_v4, 2  ;;  %v6595_v38 = vadd.f32 %v6594_v35, %v6593_v49  ;;  %v6506_v59 = vadd.f32 %v6498_v14, %v11857_v39  ;;  %v6511_v15 = vmul.f32 0.7978846, %v6503_v5  ;;  %v12379_v5 = vld [vmem:[#allocation52_spill] sm:$0xff] }
 0x716   :  { %v6589_v25 = vrot.slane %v6588_v61, 2  ;;  %v6602_v9 = vadd.f32 %v6601_v8, %v6600_v32  ;;  %v6512_v45 = vmul.f32 0.7978846, %v6504_v19  ;;  %v6513_v47 = vmul.f32 0.7978846, %v6505_v42 }
 0x717   :  { %v6583_v53 = vadd.f32 %v6582_v6, %v6581_v4  ;;  %v6596_v41 = vrot.slane %v6595_v38, 2  ;;  %v6514_v12 = vmul.f32 0.7978846, %v6506_v59  ;;  %8667 = vtanh.f32 %v6511_v15 }
 0x718   :  { %v6590_v29 = vadd.f32 %v6589_v25, %v6588_v61  ;;  %v6603_v51 = vrot.slane %v6602_v9, 2  ;;  %8669 = vtanh.f32 %v6512_v45  ;;  %v11889_v11 = vrot.slane %v6652_v31, %v12376_v36 }
 0x719   :  { %v6584_v56 = vrot.slane %v6583_v53, 1  ;;  %v6597_v28 = vadd.f32 %v6596_v41, %v6595_v38  ;;  %8671 = vtanh.f32 %v6513_v47  ;;  %v11892_v3 = vrot.slane %v6661_v34, %v12376_v36 }
 0x71a   :  { %v6591_v55 = vrot.slane %v6590_v29, 1  ;;  %v6604_v26 = vadd.f32 %v6603_v51, %v6602_v9  ;;  %8673 = vtanh.f32 %v6514_v12  ;;  %v11896_v43 = vrot.slane %v6670_v44, %v12376_v36 }
 0x71b   :  { %v6585_v10 = vadd.f32 %v6584_v56, %v6583_v53  ;;  %v6598_v23 = vrot.slane %v6597_v28, 1 }
 0x71c   :  { %v6592_v40 = vadd.f32 %v6591_v55, %v6590_v29  ;;  %v6605_v63 = vrot.slane %v6604_v26, 1 }
 0x71d   :  { %v6599_v22 = vadd.f32 %v6598_v23, %v6597_v28  ;;  %v6676_v54 = vadd.f32 %v11886_v7, %v6585_v10 }
 0x71e   :  { %v6606_v48 = vadd.f32 %v6605_v63, %v6604_v26  ;;  %v6677_v21 = vadd.f32 %v11889_v11, %v6592_v40 }
 0x71f   :  { %v6678_v50 = vadd.f32 %v11892_v3, %v6599_v22  ;;  %8675 = vtanh.f32 %v6676_v54 }
 0x720   :  { %v6679_v46 = vadd.f32 %v11896_v43, %v6606_v48  ;;  %8677 = vtanh.f32 %v6677_v21 }
 0x721   :  { %8679 = vtanh.f32 %v6678_v50  ;;  %v8668_v60 = vpop.eup %8667 }
 0x722   :  { %8681 = vtanh.f32 %v6679_v46  ;;  %v8670_v33 = vpop.eup %8669  ;;  %v6527_v16 = vadd.f32 1.0, %v8668_v60 }
 0x723   :  { %v8672_v62 = vpop.eup %8671  ;;  %v6528_v49 = vadd.f32 1.0, %v8670_v33 }
 0x724   :  { %v8674_v20 = vpop.eup %8673  ;;  %v6529_v1 = vadd.f32 1.0, %v8672_v62  ;;  %v6535_v4 = vmul.f32 0.5, %v6527_v16 }
 0x725   :  { %v6530_v35 = vadd.f32 1.0, %v8674_v20  ;;  %v6536_v32 = vmul.f32 0.5, %v6528_v49 }
 0x726   :  { %v6537_v52 = vmul.f32 0.5, %v6529_v1  ;;  %v6543_v61 = vmul.f32 %v6535_v4, %v11844_v57  ;;  %v12381_v1 = vld [vmem:[#allocation102_spill] sm:$0xff] }
 0x727   :  { %v6538_v31 = vmul.f32 0.5, %v6530_v35  ;;  %v6544_v6 = vmul.f32 %v6536_v32, %v11847_v2  ;;  %v12383_v35 = vld [vmem:[#allocation93_spill] sm:$0xff] }
 0x728   :  { %v6545_v57 = vmul.f32 %v6537_v52, %v11854_v17  ;;  %v6575_v25 = vmul.f32 %v11833_v13, %v6543_v61  ;;  %v12380_v13 = vld [vmem:[#allocation94_spill] sm:$0xff] }
 0x729   :  { %v8676_v58 = vpop.eup %8675  ;;  %v6546_v19 = vmul.f32 %v6538_v31, %v11857_v39  ;;  %v6576_v53 = vmul.f32 %v11835_v18, %v6544_v6 }
 0x72a   :  { %v8678_v8 = vpop.eup %8677  ;;  %7235 = vst.msk [vmem:[%s11998_s9] sm:$0x1] %vm7234_vm8, %v8676_v58  ;;  %v7251_v30 = vmul.f32 %v8676_v58, %v12377_v37  ;;  %v6577_v41 = vmul.f32 %v11849_v27, %v6545_v57  ;;  %v6607_v42 = vsel %vm1473_vm6, %v6575_v25, 0.0  ;;  %v12384_v58 = vld [vmem:[#allocation48_spill] sm:$0xff] }
 0x72b   :  { %v8680_v38 = vpop.eup %8679  ;;  %7236 = vst.msk [vmem:[%s11998_s9 + $0x4] sm:$0x1] %vm7234_vm8, %v8678_v8  ;;  %v7252_v14 = vmul.f32 %v8678_v8, %v12378_v24  ;;  %v6578_v18 = vmul.f32 %v11859_v0, %v6546_v19  ;;  %v6608_v39 = vrot.slane %v6607_v42, 4  ;;  %v6614_v59 = vsel %vm1473_vm6, %v6576_v53, 0.0 }
 0x72c   :  { %v8682_v9 = vpop.eup %8681  ;;  %7237 = vst.msk [vmem:[%s11998_s9 + $0x8] sm:$0x1] %vm7234_vm8, %v8680_v38  ;;  %v7253_v2 = vmul.f32 %v8680_v38, %v12379_v5  ;;  %7259 = vst.msk [vmem:[%s11998_s9 + $0x2] sm:$0x1] %vm7234_vm8, %v7251_v30  ;;  %v6615_v29 = vrot.slane %v6614_v59, 4  ;;  %v6621_v27 = vsel %vm1473_vm6, %v6577_v41, 0.0 }
 0x72d   :  { %7238 = vst.msk [vmem:[%s11998_s9 + $0xc] sm:$0x1] %vm7234_vm8, %v8682_v9  ;;  %v7254_v17 = vmul.f32 %v8682_v9, %v12380_v13  ;;  %7260 = vst.msk [vmem:[%s11998_s9 + $0x6] sm:$0x1] %vm7234_vm8, %v7252_v14  ;;  %v6609_v51 = vadd.f32 %v6608_v39, %v6607_v42  ;;  %v6622_v15 = vrot.slane %v6621_v27, 4  ;;  %v6628_v45 = vsel %vm1473_vm6, %v6578_v18, 0.0 }
 0x72e   :  { %7261 = vst.msk [vmem:[%s11998_s9 + $0xa] sm:$0x1] %vm7234_vm8, %v7253_v2  ;;  %v6616_v56 = vadd.f32 %v6615_v29, %v6614_v59  ;;  %v6629_v28 = vrot.slane %v6628_v45, 4 }
 0x72f   :  { %7262 = vst.msk [vmem:[%s11998_s9 + $0xe] sm:$0x1] %vm7234_vm8, %v7254_v17  ;;  %v6610_v47 = vrot.slane %v6609_v51, 2  ;;  %v6623_v12 = vadd.f32 %v6622_v15, %v6621_v27 }
 0x730   :  { %v6617_v0 = vrot.slane %v6616_v56, 2  ;;  %v6630_v34 = vadd.f32 %v6629_v28, %v6628_v45 }
 0x731   :  { %v6611_v55 = vadd.f32 %v6610_v47, %v6609_v51  ;;  %v6624_v26 = vrot.slane %v6623_v12, 2 }
 0x732   :  { %v6618_v44 = vadd.f32 %v6617_v0, %v6616_v56  ;;  %v6631_v36 = vrot.slane %v6630_v34, 2 }
 0x733   :  { %v6612_v10 = vrot.slane %v6611_v55, 1  ;;  %v6625_v23 = vadd.f32 %v6624_v26, %v6623_v12 }
 0x734   :  { %v6619_v40 = vrot.slane %v6618_v44, 1  ;;  %v6632_v63 = vadd.f32 %v6631_v36, %v6630_v34 }
 0x735   :  { %v6613_v22 = vadd.f32 %v6612_v10, %v6611_v55  ;;  %v6626_v54 = vrot.slane %v6625_v23, 1 }
 0x736   :  { %v6620_v48 = vadd.f32 %v6619_v40, %v6618_v44  ;;  %v6633_v21 = vrot.slane %v6632_v63, 1 }
 0x737   :  { %v6627_v50 = vadd.f32 %v6626_v54, %v6625_v23  ;;  %v6680_v46 = vadd.f32 %v11886_v7, %v6613_v22 }
 0x738   :  { %v6634_v60 = vadd.f32 %v6633_v21, %v6632_v63  ;;  %v6681_v33 = vadd.f32 %v11889_v11, %v6620_v48  ;;  %v12382_v11 = vld [vmem:[#allocation40_spill] sm:$0xff] }
 0x739   :  { %v6682_v16 = vadd.f32 %v11892_v3, %v6627_v50  ;;  %8683 = vtanh.f32 %v6680_v46 }
 0x73a   :  { %v6683_v62 = vadd.f32 %v11896_v43, %v6634_v60  ;;  %8685 = vtanh.f32 %v6681_v33 }
 0x73b   :  { %8687 = vtanh.f32 %v6682_v16 }
 0x73c   :  { %8689 = vtanh.f32 %v6683_v62 }
 0x743   :  { %v8684_v49 = vpop.eup %8683 }
 0x744   :  { %v8686_v20 = vpop.eup %8685  ;;  %7239 = vst.msk [vmem:[%s11998_s9 + $0x10] sm:$0x1] %vm7234_vm8, %v8684_v49  ;;  %v7255_v7 = vmul.f32 %v8684_v49, %v12381_v1 }
 0x745   :  { %v8688_v4 = vpop.eup %8687  ;;  %7240 = vst.msk [vmem:[%s11998_s9 + $0x14] sm:$0x1] %vm7234_vm8, %v8686_v20  ;;  %v7256_v3 = vmul.f32 %v8686_v20, %v12382_v11 }
 0x746   :  { %v8690_v43 = vpop.eup %8689  ;;  %7241 = vst.msk [vmem:[%s11998_s9 + $0x18] sm:$0x1] %vm7234_vm8, %v8688_v4  ;;  %v7257_v32 = vmul.f32 %v8688_v4, %v12383_v35  ;;  %7263 = vst.msk [vmem:[%s11998_s9 + $0x12] sm:$0x1] %vm7234_vm8, %v7255_v7 }
 0x747   :  { %7242 = vst.msk [vmem:[%s11998_s9 + $0x1c] sm:$0x1] %vm7234_vm8, %v8690_v43  ;;  %v7258_v52 = vmul.f32 %v8690_v43, %v12384_v58  ;;  %7264 = vst.msk [vmem:[%s11998_s9 + $0x16] sm:$0x1] %vm7234_vm8, %v7256_v3 }
 0x748   :  { %7265 = vst.msk [vmem:[%s11998_s9 + $0x1a] sm:$0x1] %vm7234_vm8, %v7257_v32 }
 0x749   :  { %7266 = vst.msk [vmem:[%s11998_s9 + $0x1e] sm:$0x1] %vm7234_vm8, %v7258_v52 }
 0x74a   :  { %8703 = dma.done.wait [#allocation4], 16  }
 0x74b   :  { %8704 = vsyncadd [#allocation4], 4294967280 }
 0x74c   :  { %7286 = sfence }
 0x74d   :  { %7287 = vsyncpa [#allocation4], 1 }

</bundles_post_ra>
